<compile_context>
chip_gen: v7x
topology: tpu7x:2x2x1
jax: 0.10.0
libtpu: 0.0.40
codegen_flags: <defaults>
</compile_context>

<pallas_src>
import jax
import jax.numpy as jnp
from jax.experimental import pallas as pl
from jax.experimental.pallas import tpu as pltpu


def _bn_relu_conv1x1_kernel(x_ref, scale_ref, shift_ref, w_ref, o_ref):
    # x_ref:     (1, Cin, TM)   f32   channel-major activation tile
    # scale_ref: (Cin, 1)       f32   gamma / sqrt(var + eps)
    # shift_ref: (Cin, 1)       f32   beta - mean * scale
    # w_ref:     (Cout, Cin)    bf16  1x1 conv weight (channel-major)
    # o_ref:     (1, Cout, TM)  f32
    x = x_ref[0]                                        # (Cin, TM)
    y = x * scale_ref[...] + shift_ref[...]             # BatchNorm (folded, eval mode), f32 VPU
    y = jnp.maximum(y, 0.0)                             # ReLU
    o_ref[0] = jnp.dot(
        w_ref[...],                                     # bf16
        y.astype(jnp.bfloat16),                         # bf16 matmul operand
        preferred_element_type=jnp.float32,             # f32 accumulation on MXU
    ).astype(o_ref.dtype)                               # 1x1 conv == channel matmul


def bn_relu_conv1x1(x_nchw, gamma, beta, running_mean, running_var, conv_w, eps=1e-5):
    """x_nchw: [N, Cin, H, W] f32; conv_w: [Cout, Cin, 1, 1] -> [N, Cout, H, W] f32."""
    N, C, H, W = x_nchw.shape
    Cout = conv_w.shape[0]
    HW = H * W

    # Fold BN into per-channel affine (plain JAX glue); keep along the sublane (channel) axis.
    scale = (gamma / jnp.sqrt(running_var + eps)).astype(jnp.float32)
    shift = (beta - running_mean * scale).astype(jnp.float32)
    scale = scale.reshape(C, 1)
    shift = shift.reshape(C, 1)

    # Free views: no NCHW<->NHWC transpose passes, no weight transpose.
    x3d = x_nchw.reshape(N, C, HW).astype(jnp.float32)      # [N, Cin, M]
    w2d = conv_w.reshape(Cout, C).astype(jnp.bfloat16)      # [Cout, Cin] bf16 (halves weight DMA)

    # Spatial tiling: single full-width block when small, else 512-lane tiles
    # (512 is a multiple of 128 -> valid Pallas block, dense vregs, pipelined DMA).
    TM = HW if HW <= 512 else 512
    grid = (N, pl.cdiv(HW, TM))

    flops = 2 * N * HW * C * Cout
    bytes_accessed = (
        x3d.size * 4            # activations in (f32)
        + w2d.size * 2          # weight (bf16)
        + 2 * C * 4             # scale + shift
        + N * Cout * HW * 4     # output (f32)
    )

    out3d = pl.pallas_call(
        _bn_relu_conv1x1_kernel,
        out_shape=jax.ShapeDtypeStruct((N, Cout, HW), jnp.float32),
        grid=grid,
        in_specs=[
            pl.BlockSpec((1, C, TM), lambda n, m: (n, 0, m)),   # activation tile
            pl.BlockSpec((C, 1), lambda n, m: (0, 0)),          # scale (resident)
            pl.BlockSpec((C, 1), lambda n, m: (0, 0)),          # shift (resident)
            pl.BlockSpec((Cout, C), lambda n, m: (0, 0)),       # weight (resident)
        ],
        out_specs=pl.BlockSpec((1, Cout, TM), lambda n, m: (n, 0, m)),
        compiler_params=pltpu.CompilerParams(
            # both grid axes are independent -> shard across TensorCores on v7x
            dimension_semantics=("parallel", "parallel"),
        ),
        cost_estimate=pl.CostEstimate(
            flops=flops, transcendentals=0, bytes_accessed=bytes_accessed
        ),
    )(x3d, scale, shift, w2d)

    # [N, Cout, H*W] -> NCHW (free view)
    return out3d.reshape(N, Cout, H, W)


if __name__ == "__main__":
    # Shapes implied by the module's forward: x456 = [1, 1696, 14, 14]
    N, Cin, H, W = 1, 1696, 14, 14
    Cout = 128
    eps = 1e-5

    key = jax.random.PRNGKey(0)
    k_x, k_g, k_b, k_m, k_v, k_w = jax.random.split(key, 6)

    x = jax.random.normal(k_x, (N, Cin, H, W), dtype=jnp.float32)
    gamma = jax.random.normal(k_g, (Cin,), dtype=jnp.float32) * 0.1 + 1.0
    beta = jax.random.normal(k_b, (Cin,), dtype=jnp.float32) * 0.1
    running_mean = jax.random.normal(k_m, (Cin,), dtype=jnp.float32) * 0.1
    running_var = jax.random.uniform(k_v, (Cin,), dtype=jnp.float32, minval=0.5, maxval=1.5)
    conv_w = jax.random.normal(k_w, (Cout, Cin, 1, 1), dtype=jnp.float32) * 0.02

    out = bn_relu_conv1x1(x, gamma, beta, running_mean, running_var, conv_w, eps=eps)
    out = jax.block_until_ready(out)

    # Pure-JAX f32 reference (inference-mode BN -> ReLU -> 1x1 conv).
    xn = (x - running_mean[None, :, None, None]) / jnp.sqrt(
        running_var[None, :, None, None] + eps
    )
    ref = xn * gamma[None, :, None, None] + beta[None, :, None, None]
    ref = jnp.maximum(ref, 0.0)
    ref = jnp.einsum("nchw,oc->nohw", ref, conv_w.reshape(Cout, Cin))

    assert out.shape == (N, Cout, H, W), out.shape
    # bf16 matmul operands with f32 accumulation over K=1696 -> loosened tolerance.
    max_err = float(jnp.max(jnp.abs(out - ref)))
    assert jnp.allclose(out, ref, atol=5e-2, rtol=5e-2), max_err

    print("KERNEL_OK")
</pallas_src>

<mosaic_0001>
module attributes {stable_mosaic.version = 11 : i64} {
  func.func @_bn_relu_conv1x1_kernel(%arg0: i32, %arg1: i32, %arg2: memref<1x1696x196xf32, #tpu.memory_space<vmem>>, %arg3: memref<1696x1xf32, #tpu.memory_space<vmem>>, %arg4: memref<1696x1xf32, #tpu.memory_space<vmem>>, %arg5: memref<128x1696xbf16, #tpu.memory_space<vmem>>, %arg6: memref<1x128x196xf32, #tpu.memory_space<vmem>>) attributes {dimension_semantics = [#tpu.dimension_semantics<parallel>, #tpu.dimension_semantics<parallel>], iteration_bounds = array<i64: 1, 1>, scalar_prefetch = 0 : i64, scratch_operands = 0 : i64, tpu.core_type = #tpu.core_type<tc>, window_params = [{transform_indices = @transform_0, window_bounds = array<i64: 1, 1696, 196>}, {pipeline_mode = #tpu.pipeline_mode<synchronous>, transform_indices = @transform_1, window_bounds = array<i64: 1696, 1>}, {pipeline_mode = #tpu.pipeline_mode<synchronous>, transform_indices = @transform_2, window_bounds = array<i64: 1696, 1>}, {pipeline_mode = #tpu.pipeline_mode<synchronous>, transform_indices = @transform_3, window_bounds = array<i64: 128, 1696>}, {transform_indices = @transform_4, window_bounds = array<i64: 1, 128, 196>}]} {
    %c0 = arith.constant 0 : index
    %c0_0 = arith.constant 0 : index
    %c0_1 = arith.constant 0 : index
    %0 = vector.load %arg2[%c0, %c0_0, %c0_1] : memref<1x1696x196xf32, #tpu.memory_space<vmem>>, vector<1x1696x196xf32>
    %1 = vector.shape_cast %0 : vector<1x1696x196xf32> to vector<1696x196xf32>
    %c0_2 = arith.constant 0 : index
    %c0_3 = arith.constant 0 : index
    %2 = vector.load %arg3[%c0_2, %c0_3] : memref<1696x1xf32, #tpu.memory_space<vmem>>, vector<1696x1xf32>
    %3 = vector.broadcast %2 : vector<1696x1xf32> to vector<1696x196xf32>
    %4 = arith.mulf %1, %3 : vector<1696x196xf32>
    %c0_4 = arith.constant 0 : index
    %c0_5 = arith.constant 0 : index
    %5 = vector.load %arg4[%c0_4, %c0_5] : memref<1696x1xf32, #tpu.memory_space<vmem>>, vector<1696x1xf32>
    %6 = vector.broadcast %5 : vector<1696x1xf32> to vector<1696x196xf32>
    %7 = arith.addf %4, %6 : vector<1696x196xf32>
    %cst = arith.constant 0.000000e+00 : f32
    %8 = vector.broadcast %cst : f32 to vector<1696x196xf32>
    %9 = arith.maximumf %7, %8 : vector<1696x196xf32>
    %c0_6 = arith.constant 0 : index
    %c0_7 = arith.constant 0 : index
    %10 = vector.load %arg5[%c0_6, %c0_7] : memref<128x1696xbf16, #tpu.memory_space<vmem>>, vector<128x1696xbf16>
    %11 = arith.truncf %9 : vector<1696x196xf32> to vector<1696x196xbf16>
    %cst_8 = arith.constant dense<0.000000e+00> : vector<128x196xf32>
    %12 = tpu.matmul %10, %11, %cst_8 {dimension_numbers = #tpu.dot_dimension_numbers<[1], [0], [0], [1], [0, 0, 1, 1], [], []>} : vector<128x1696xbf16>, vector<1696x196xbf16>, vector<128x196xf32> -> vector<128x196xf32>
    %c0_9 = arith.constant 0 : index
    %c0_10 = arith.constant 0 : index
    %c0_11 = arith.constant 0 : index
    %13 = vector.load %arg6[%c0_9, %c0_10, %c0_11] : memref<1x128x196xf32, #tpu.memory_space<vmem>>, vector<1x128x196xf32>
    %14 = vector.shape_cast %13 : vector<1x128x196xf32> to vector<128x196xf32>
    %15 = vector.shape_cast %12 : vector<128x196xf32> to vector<1x128x196xf32>
    tpu.vector_store %arg6[%c0_9, %c0_10, %c0_11], %15 {strides = array<i32>} : memref<1x128x196xf32, #tpu.memory_space<vmem>>, vector<1x128x196xf32>,
    return
  }
  func.func @transform_0(%arg0: i32, %arg1: i32) -> (i32, i32, i32) {
    %c0_i32 = arith.constant 0 : i32
    %c0_i32_0 = arith.constant 0 : i32
    return %arg0, %c0_i32, %arg1 : i32, i32, i32
  }
  func.func @transform_1(%arg0: i32, %arg1: i32) -> (i32, i32) {
    %c0_i32 = arith.constant 0 : i32
    %c0_i32_0 = arith.constant 0 : i32
    %c0_i32_1 = arith.constant 0 : i32
    return %c0_i32, %c0_i32_0 : i32, i32
  }
  func.func @transform_2(%arg0: i32, %arg1: i32) -> (i32, i32) {
    %c0_i32 = arith.constant 0 : i32
    %c0_i32_0 = arith.constant 0 : i32
    %c0_i32_1 = arith.constant 0 : i32
    return %c0_i32, %c0_i32_0 : i32, i32
  }
  func.func @transform_3(%arg0: i32, %arg1: i32) -> (i32, i32) {
    %c0_i32 = arith.constant 0 : i32
    %c0_i32_0 = arith.constant 0 : i32
    %c0_i32_1 = arith.constant 0 : i32
    return %c0_i32, %c0_i32_0 : i32, i32
  }
  func.func @transform_4(%arg0: i32, %arg1: i32) -> (i32, i32, i32) {
    %c0_i32 = arith.constant 0 : i32
    %c0_i32_0 = arith.constant 0 : i32
    return %arg0, %c0_i32, %arg1 : i32, i32, i32
  }
}

</mosaic_0001>

<bundles_post_ra>
// kernel: tpu_custom_call.1
= control target key start
LH: loop header
LB: loop body
LE: loop exit
PB: predicated region body
PF: predicated region fallthrough
CT: control target
= control target key end

     0   :  { %v6490_v0 = vmov 0   ;;  %vm5134_vm0 = vcmask 261120   ;;  %vm5951_vm1 = vcmask 556032   ;;  %s10436_s1 = inlined_call_operand.vmem [shape: f32[1696,1], index: 1, kind: input, shape index: {}]   ;;  %s10437_s2 = inlined_call_operand.vmem [shape: f32[1696,1], index: 2, kind: input, shape index: {}]   ;;  %s10438_s3 = inlined_call_operand.vmem [shape: bf16[128,1696], index: 3, kind: input, shape index: {}]   ;;  %s10439_s0 = inlined_call_operand.vmem [shape: f32[1,1696,196], index: 0, kind: input, shape index: {}]   ;;  %s10440_s4 = inlined_call_operand.vmem [shape: f32[1,128,196], index: 4, kind: output, shape index: {}]  }
   0x1   :  { %6321 = vset.pattern.permute.xlu1 %v6490_v0  ;;  %6320 = vset.pattern.permute.xlu0 %v6490_v0  ;;  %v444_v1 = vld [vmem:[%s10436_s1 + $0x10] sm:$0xff]  ;;  %v442_v2 = vld [vmem:[%s10436_s1] sm:$0xff]  ;;  %v445_v3 = vld [vmem:[%s10436_s1 + $0x18] sm:$0xff] }
   0x2   :  { %666 = vperm.xlu1 %6321, %v444_v1   ;;  %656 = vperm.xlu0 %6320, %v442_v2   ;;  %v443_v4 = vld [vmem:[%s10436_s1 + $0x8] sm:$0xff]  ;;  %v446_v6 = vld [vmem:[%s10436_s1 + $0x20] sm:$0xff]  ;;  %v449_v7 = vld [vmem:[%s10436_s1 + $0x38] sm:$0xff] }
   0x3   :  { %v447_v5 = vld [vmem:[%s10436_s1 + $0x28] sm:$0xff]  ;;  %v448_v8 = vld [vmem:[%s10436_s1 + $0x30] sm:$0xff]  ;;  %v450_v10 = vld [vmem:[%s10436_s1 + $0x40] sm:$0xff] }
   0x4   :  { %v451_v9 = vld [vmem:[%s10436_s1 + $0x48] sm:$0xff]  ;;  %v453_v11 = vld [vmem:[%s10436_s1 + $0x58] sm:$0xff]  ;;  %v452_v12 = vld [vmem:[%s10436_s1 + $0x50] sm:$0xff] }
   0x5   :  { %v455_v13 = vld [vmem:[%s10436_s1 + $0x68] sm:$0xff]  ;;  %v454_v14 = vld [vmem:[%s10436_s1 + $0x60] sm:$0xff]  ;;  %v457_v15 = vld [vmem:[%s10436_s1 + $0x78] sm:$0xff] }
   0x6   :  { %671 = vperm.xlu1 %6321, %v445_v3   ;;  %661 = vperm.xlu0 %6320, %v443_v4   ;;  %v456_v16 = vld [vmem:[%s10436_s1 + $0x70] sm:$0xff]  ;;  %v459_v17 = vld [vmem:[%s10436_s1 + $0x88] sm:$0xff]  ;;  %v458_v18 = vld [vmem:[%s10436_s1 + $0x80] sm:$0xff] }
   0x7   :  { %v461_v19 = vld [vmem:[%s10436_s1 + $0x98] sm:$0xff]  ;;  %v460_v20 = vld [vmem:[%s10436_s1 + $0x90] sm:$0xff]  ;;  %v463_v21 = vld [vmem:[%s10436_s1 + $0xa8] sm:$0xff] }
   0x8   :  { %v462_v22 = vld [vmem:[%s10436_s1 + $0xa0] sm:$0xff]  ;;  %v465_v23 = vld [vmem:[%s10436_s1 + $0xb8] sm:$0xff]  ;;  %v464_v24 = vld [vmem:[%s10436_s1 + $0xb0] sm:$0xff] }
   0x9   :  { %v467_v25 = vld [vmem:[%s10436_s1 + $0xc8] sm:$0xff]  ;;  %v466_v26 = vld [vmem:[%s10436_s1 + $0xc0] sm:$0xff]  ;;  %v469_v27 = vld [vmem:[%s10436_s1 + $0xd8] sm:$0xff] }
   0xa   :  { %681 = vperm.xlu1 %6321, %v447_v5   ;;  %676 = vperm.xlu0 %6320, %v446_v6   ;;  %v468_v28 = vld [vmem:[%s10436_s1 + $0xd0] sm:$0xff]  ;;  %v471_v29 = vld [vmem:[%s10436_s1 + $0xe8] sm:$0xff]  ;;  %v470_v30 = vld [vmem:[%s10436_s1 + $0xe0] sm:$0xff] }
   0xb   :  { %v473_v31 = vld [vmem:[%s10436_s1 + $0xf8] sm:$0xff]  ;;  %v472_v32 = vld [vmem:[%s10436_s1 + $0xf0] sm:$0xff]  ;;  %v475_v33 = vld [vmem:[%s10436_s1 + $0x108] sm:$0xff] }
   0xc   :  { %v474_v34 = vld [vmem:[%s10436_s1 + $0x100] sm:$0xff]  ;;  %v477_v35 = vld [vmem:[%s10436_s1 + $0x118] sm:$0xff]  ;;  %v476_v36 = vld [vmem:[%s10436_s1 + $0x110] sm:$0xff] }
   0xd   :  { %v479_v37 = vld [vmem:[%s10436_s1 + $0x128] sm:$0xff]  ;;  %v478_v38 = vld [vmem:[%s10436_s1 + $0x120] sm:$0xff]  ;;  %v481_v39 = vld [vmem:[%s10436_s1 + $0x138] sm:$0xff] }
   0xe   :  { %691 = vperm.xlu1 %6321, %v449_v7   ;;  %686 = vperm.xlu0 %6320, %v448_v8   ;;  %v480_v40 = vld [vmem:[%s10436_s1 + $0x130] sm:$0xff]  ;;  %v483_v41 = vld [vmem:[%s10436_s1 + $0x148] sm:$0xff]  ;;  %v482_v42 = vld [vmem:[%s10436_s1 + $0x140] sm:$0xff] }
   0xf   :  { %v485_v43 = vld [vmem:[%s10436_s1 + $0x158] sm:$0xff]  ;;  %v484_v44 = vld [vmem:[%s10436_s1 + $0x150] sm:$0xff]  ;;  %v487_v45 = vld [vmem:[%s10436_s1 + $0x168] sm:$0xff] }
  0x10   :  { %v486_v46 = vld [vmem:[%s10436_s1 + $0x160] sm:$0xff]  ;;  %v489_v47 = vld [vmem:[%s10436_s1 + $0x178] sm:$0xff]  ;;  %v488_v48 = vld [vmem:[%s10436_s1 + $0x170] sm:$0xff] }
  0x11   :  { %v491_v49 = vld [vmem:[%s10436_s1 + $0x188] sm:$0xff]  ;;  %v490_v50 = vld [vmem:[%s10436_s1 + $0x180] sm:$0xff]  ;;  %v493_v51 = vld [vmem:[%s10436_s1 + $0x198] sm:$0xff] }
  0x12   :  { %701 = vperm.xlu1 %6321, %v451_v9   ;;  %696 = vperm.xlu0 %6320, %v450_v10   ;;  %v492_v52 = vld [vmem:[%s10436_s1 + $0x190] sm:$0xff]  ;;  %v495_v53 = vld [vmem:[%s10436_s1 + $0x1a8] sm:$0xff]  ;;  %v494_v54 = vld [vmem:[%s10436_s1 + $0x1a0] sm:$0xff] }
  0x13   :  { %v497_v55 = vld [vmem:[%s10436_s1 + $0x1b8] sm:$0xff]  ;;  %v496_v56 = vld [vmem:[%s10436_s1 + $0x1b0] sm:$0xff]  ;;  %v499_v57 = vld [vmem:[%s10436_s1 + $0x1c8] sm:$0xff] }
  0x14   :  { %v498_v58 = vld [vmem:[%s10436_s1 + $0x1c0] sm:$0xff]  ;;  %v501_v59 = vld [vmem:[%s10436_s1 + $0x1d8] sm:$0xff]  ;;  %v500_v60 = vld [vmem:[%s10436_s1 + $0x1d0] sm:$0xff] }
  0x15   :  { %v503_v61 = vld [vmem:[%s10436_s1 + $0x1e8] sm:$0xff]  ;;  %v502_v62 = vld [vmem:[%s10436_s1 + $0x1e0] sm:$0xff]  ;;  %v505_v63 = vld [vmem:[%s10436_s1 + $0x1f8] sm:$0xff] }
  0x16   :  { %711 = vperm.xlu1 %6321, %v453_v11   ;;  %706 = vperm.xlu0 %6320, %v452_v12   ;;  %v504_v0 = vld [vmem:[%s10436_s1 + $0x1f0] sm:$0xff]  ;;  %v507_v1 = vld [vmem:[%s10436_s1 + $0x208] sm:$0xff]  ;;  %v506_v2 = vld [vmem:[%s10436_s1 + $0x200] sm:$0xff] }
  0x17   :  { %v509_v5 = vld [vmem:[%s10436_s1 + $0x218] sm:$0xff]  ;;  %v508_v6 = vld [vmem:[%s10436_s1 + $0x210] sm:$0xff]  ;;  %v511_v9 = vld [vmem:[%s10436_s1 + $0x228] sm:$0xff] }
  0x18   :  { %v510_v10 = vld [vmem:[%s10436_s1 + $0x220] sm:$0xff] }
  0x1a   :  { %721 = vperm.xlu1 %6321, %v455_v13   ;;  %716 = vperm.xlu0 %6320, %v454_v14   ;;  %v513_v13 = vld [vmem:[%s10436_s1 + $0x238] sm:$0xff]  ;;  %v512_v14 = vld [vmem:[%s10436_s1 + $0x230] sm:$0xff] }
  0x1e   :  { %731 = vperm.xlu1 %6321, %v457_v15   ;;  %726 = vperm.xlu0 %6320, %v456_v16  }
  0x22   :  { %741 = vperm.xlu1 %6321, %v459_v17   ;;  %736 = vperm.xlu0 %6320, %v458_v18   ;;  %v515_v17 = vld [vmem:[%s10436_s1 + $0x248] sm:$0xff]  ;;  %v514_v18 = vld [vmem:[%s10436_s1 + $0x240] sm:$0xff] }
  0x26   :  { %751 = vperm.xlu1 %6321, %v461_v19   ;;  %746 = vperm.xlu0 %6320, %v460_v20  }
  0x2a   :  { %761 = vperm.xlu1 %6321, %v463_v21   ;;  %756 = vperm.xlu0 %6320, %v462_v22   ;;  %v517_v21 = vld [vmem:[%s10436_s1 + $0x258] sm:$0xff]  ;;  %v516_v22 = vld [vmem:[%s10436_s1 + $0x250] sm:$0xff] }
  0x2e   :  { %771 = vperm.xlu1 %6321, %v465_v23   ;;  %766 = vperm.xlu0 %6320, %v464_v24  }
  0x32   :  { %781 = vperm.xlu1 %6321, %v467_v25   ;;  %776 = vperm.xlu0 %6320, %v466_v26   ;;  %v519_v25 = vld [vmem:[%s10436_s1 + $0x268] sm:$0xff]  ;;  %v518_v26 = vld [vmem:[%s10436_s1 + $0x260] sm:$0xff] }
  0x36   :  { %791 = vperm.xlu1 %6321, %v469_v27   ;;  %786 = vperm.xlu0 %6320, %v468_v28  }
  0x3a   :  { %801 = vperm.xlu1 %6321, %v471_v29   ;;  %796 = vperm.xlu0 %6320, %v470_v30   ;;  %v521_v29 = vld [vmem:[%s10436_s1 + $0x278] sm:$0xff]  ;;  %v520_v30 = vld [vmem:[%s10436_s1 + $0x270] sm:$0xff] }
  0x3e   :  { %811 = vperm.xlu1 %6321, %v473_v31   ;;  %806 = vperm.xlu0 %6320, %v472_v32  }
  0x42   :  { %821 = vperm.xlu1 %6321, %v475_v33   ;;  %816 = vperm.xlu0 %6320, %v474_v34   ;;  %v523_v33 = vld [vmem:[%s10436_s1 + $0x288] sm:$0xff]  ;;  %v522_v34 = vld [vmem:[%s10436_s1 + $0x280] sm:$0xff] }
  0x46   :  { %831 = vperm.xlu1 %6321, %v477_v35   ;;  %826 = vperm.xlu0 %6320, %v476_v36  }
  0x4a   :  { %841 = vperm.xlu1 %6321, %v479_v37   ;;  %836 = vperm.xlu0 %6320, %v478_v38   ;;  %v525_v37 = vld [vmem:[%s10436_s1 + $0x298] sm:$0xff]  ;;  %v524_v38 = vld [vmem:[%s10436_s1 + $0x290] sm:$0xff] }
  0x4e   :  { %851 = vperm.xlu1 %6321, %v481_v39   ;;  %846 = vperm.xlu0 %6320, %v480_v40  }
  0x52   :  { %861 = vperm.xlu1 %6321, %v483_v41   ;;  %856 = vperm.xlu0 %6320, %v482_v42   ;;  %v527_v41 = vld [vmem:[%s10436_s1 + $0x2a8] sm:$0xff]  ;;  %v526_v42 = vld [vmem:[%s10436_s1 + $0x2a0] sm:$0xff] }
  0x56   :  { %871 = vperm.xlu1 %6321, %v485_v43   ;;  %866 = vperm.xlu0 %6320, %v484_v44  }
  0x5a   :  { %881 = vperm.xlu1 %6321, %v487_v45   ;;  %876 = vperm.xlu0 %6320, %v486_v46   ;;  %v529_v45 = vld [vmem:[%s10436_s1 + $0x2b8] sm:$0xff]  ;;  %v528_v46 = vld [vmem:[%s10436_s1 + $0x2b0] sm:$0xff] }
  0x5e   :  { %891 = vperm.xlu1 %6321, %v489_v47   ;;  %886 = vperm.xlu0 %6320, %v488_v48  }
  0x62   :  { %901 = vperm.xlu1 %6321, %v491_v49   ;;  %896 = vperm.xlu0 %6320, %v490_v50   ;;  %v531_v49 = vld [vmem:[%s10436_s1 + $0x2c8] sm:$0xff]  ;;  %v530_v50 = vld [vmem:[%s10436_s1 + $0x2c0] sm:$0xff] }
  0x66   :  { %911 = vperm.xlu1 %6321, %v493_v51   ;;  %906 = vperm.xlu0 %6320, %v492_v52  }
  0x6a   :  { %921 = vperm.xlu1 %6321, %v495_v53   ;;  %916 = vperm.xlu0 %6320, %v494_v54   ;;  %v533_v53 = vld [vmem:[%s10436_s1 + $0x2d8] sm:$0xff]  ;;  %v532_v54 = vld [vmem:[%s10436_s1 + $0x2d0] sm:$0xff] }
  0x6e   :  { %931 = vperm.xlu1 %6321, %v497_v55   ;;  %926 = vperm.xlu0 %6320, %v496_v56  }
  0x72   :  { %941 = vperm.xlu1 %6321, %v499_v57   ;;  %936 = vperm.xlu0 %6320, %v498_v58   ;;  %v535_v57 = vld [vmem:[%s10436_s1 + $0x2e8] sm:$0xff]  ;;  %v534_v58 = vld [vmem:[%s10436_s1 + $0x2e0] sm:$0xff] }
  0x76   :  { %951 = vperm.xlu1 %6321, %v501_v59   ;;  %946 = vperm.xlu0 %6320, %v500_v60  }
  0x7a   :  { %961 = vperm.xlu1 %6321, %v503_v61   ;;  %956 = vperm.xlu0 %6320, %v502_v62   ;;  %v537_v61 = vld [vmem:[%s10436_s1 + $0x2f8] sm:$0xff]  ;;  %v536_v62 = vld [vmem:[%s10436_s1 + $0x2f0] sm:$0xff] }
  0x7e   :  { %971 = vperm.xlu1 %6321, %v505_v63   ;;  %966 = vperm.xlu0 %6320, %v504_v0  }
  0x81   :  { %v6714_v3 = vpop.permute.xlu1 %666  ;;  %v6716_v4 = vpop.permute.xlu0 %656 }
  0x82   :  { %981 = vperm.xlu1 %6321, %v507_v1   ;;  %976 = vperm.xlu0 %6320, %v506_v2   ;;  %v539_v1 = vld [vmem:[%s10436_s1 + $0x308] sm:$0xff]  ;;  %v538_v2 = vld [vmem:[%s10436_s1 + $0x300] sm:$0xff] }
  0x85   :  { %v6724_v7 = vpop.permute.xlu1 %671  ;;  %v6726_v8 = vpop.permute.xlu0 %661 }
  0x86   :  { %991 = vperm.xlu1 %6321, %v509_v5   ;;  %986 = vperm.xlu0 %6320, %v508_v6  }
  0x89   :  { %v6734_v11 = vpop.permute.xlu1 %681  ;;  %v6736_v12 = vpop.permute.xlu0 %676 }
  0x8a   :  { %1001 = vperm.xlu1 %6321, %v511_v9   ;;  %996 = vperm.xlu0 %6320, %v510_v10   ;;  %v541_v9 = vld [vmem:[%s10436_s1 + $0x318] sm:$0xff]  ;;  %v540_v10 = vld [vmem:[%s10436_s1 + $0x310] sm:$0xff] }
  0x8d   :  { %v6744_v15 = vpop.permute.xlu1 %691  ;;  %v6746_v16 = vpop.permute.xlu0 %686 }
  0x8e   :  { %1011 = vperm.xlu1 %6321, %v513_v13   ;;  %1006 = vperm.xlu0 %6320, %v512_v14  }
  0x91   :  { %v6754_v19 = vpop.permute.xlu1 %701  ;;  %v6756_v20 = vpop.permute.xlu0 %696 }
  0x92   :  { %1021 = vperm.xlu1 %6321, %v515_v17   ;;  %1016 = vperm.xlu0 %6320, %v514_v18   ;;  %v543_v17 = vld [vmem:[%s10436_s1 + $0x328] sm:$0xff]  ;;  %v542_v18 = vld [vmem:[%s10436_s1 + $0x320] sm:$0xff] }
  0x95   :  { %v6764_v23 = vpop.permute.xlu1 %711  ;;  %v6766_v24 = vpop.permute.xlu0 %706 }
  0x96   :  { %1031 = vperm.xlu1 %6321, %v517_v21   ;;  %1026 = vperm.xlu0 %6320, %v516_v22  }
  0x99   :  { %v6774_v27 = vpop.permute.xlu1 %721  ;;  %v6776_v28 = vpop.permute.xlu0 %716 }
  0x9a   :  { %1041 = vperm.xlu1 %6321, %v519_v25   ;;  %1036 = vperm.xlu0 %6320, %v518_v26   ;;  %v545_v25 = vld [vmem:[%s10436_s1 + $0x338] sm:$0xff]  ;;  %v544_v26 = vld [vmem:[%s10436_s1 + $0x330] sm:$0xff] }
  0x9d   :  { %v6784_v31 = vpop.permute.xlu1 %731  ;;  %v6786_v32 = vpop.permute.xlu0 %726 }
  0x9e   :  { %1051 = vperm.xlu1 %6321, %v521_v29   ;;  %1046 = vperm.xlu0 %6320, %v520_v30  }
  0xa1   :  { %v6794_v35 = vpop.permute.xlu1 %741  ;;  %v6796_v36 = vpop.permute.xlu0 %736 }
  0xa2   :  { %1061 = vperm.xlu1 %6321, %v523_v33   ;;  %1056 = vperm.xlu0 %6320, %v522_v34   ;;  %v547_v33 = vld [vmem:[%s10436_s1 + $0x348] sm:$0xff]  ;;  %v546_v34 = vld [vmem:[%s10436_s1 + $0x340] sm:$0xff] }
  0xa5   :  { %v6804_v39 = vpop.permute.xlu1 %751  ;;  %v6806_v40 = vpop.permute.xlu0 %746 }
  0xa6   :  { %1071 = vperm.xlu1 %6321, %v525_v37   ;;  %1066 = vperm.xlu0 %6320, %v524_v38  }
  0xa9   :  { %v6814_v43 = vpop.permute.xlu1 %761  ;;  %v6816_v44 = vpop.permute.xlu0 %756 }
  0xaa   :  { %1081 = vperm.xlu1 %6321, %v527_v41   ;;  %1076 = vperm.xlu0 %6320, %v526_v42   ;;  %v549_v41 = vld [vmem:[%s10436_s1 + $0x358] sm:$0xff]  ;;  %v548_v42 = vld [vmem:[%s10436_s1 + $0x350] sm:$0xff] }
  0xad   :  { %v6824_v47 = vpop.permute.xlu1 %771  ;;  %v6826_v48 = vpop.permute.xlu0 %766 }
  0xae   :  { %1091 = vperm.xlu1 %6321, %v529_v45   ;;  %1086 = vperm.xlu0 %6320, %v528_v46  }
  0xb1   :  { %v6834_v51 = vpop.permute.xlu1 %781  ;;  %v6836_v52 = vpop.permute.xlu0 %776 }
  0xb2   :  { %1101 = vperm.xlu1 %6321, %v531_v49   ;;  %1096 = vperm.xlu0 %6320, %v530_v50   ;;  %v551_v49 = vld [vmem:[%s10436_s1 + $0x368] sm:$0xff]  ;;  %v550_v50 = vld [vmem:[%s10436_s1 + $0x360] sm:$0xff] }
  0xb5   :  { %v6844_v55 = vpop.permute.xlu1 %791  ;;  %v6846_v56 = vpop.permute.xlu0 %786 }
  0xb6   :  { %1111 = vperm.xlu1 %6321, %v533_v53   ;;  %1106 = vperm.xlu0 %6320, %v532_v54  }
  0xb9   :  { %v6854_v59 = vpop.permute.xlu1 %801  ;;  %v6856_v60 = vpop.permute.xlu0 %796 }
  0xba   :  { %1121 = vperm.xlu1 %6321, %v535_v57   ;;  %1116 = vperm.xlu0 %6320, %v534_v58   ;;  %v553_v57 = vld [vmem:[%s10436_s1 + $0x378] sm:$0xff]  ;;  %v552_v58 = vld [vmem:[%s10436_s1 + $0x370] sm:$0xff] }
  0xbd   :  { %v6864_v63 = vpop.permute.xlu1 %811  ;;  %v6866_v0 = vpop.permute.xlu0 %806 }
  0xbe   :  { %1131 = vperm.xlu1 %6321, %v537_v61   ;;  %1126 = vperm.xlu0 %6320, %v536_v62  }
  0xc1   :  { %v6874_v5 = vpop.permute.xlu1 %821  ;;  %v6876_v6 = vpop.permute.xlu0 %816 }
  0xc2   :  { %1141 = vperm.xlu1 %6321, %v539_v1   ;;  %1136 = vperm.xlu0 %6320, %v538_v2   ;;  %v555_v1 = vld [vmem:[%s10436_s1 + $0x388] sm:$0xff]  ;;  %v554_v2 = vld [vmem:[%s10436_s1 + $0x380] sm:$0xff] }
  0xc5   :  { %v6884_v13 = vpop.permute.xlu1 %831  ;;  %v6886_v14 = vpop.permute.xlu0 %826 }
  0xc6   :  { %1151 = vperm.xlu1 %6321, %v541_v9   ;;  %1146 = vperm.xlu0 %6320, %v540_v10  }
  0xc9   :  { %v6894_v21 = vpop.permute.xlu1 %841  ;;  %v6896_v22 = vpop.permute.xlu0 %836 }
  0xca   :  { %1161 = vperm.xlu1 %6321, %v543_v17   ;;  %1156 = vperm.xlu0 %6320, %v542_v18   ;;  %v557_v17 = vld [vmem:[%s10436_s1 + $0x398] sm:$0xff]  ;;  %v556_v18 = vld [vmem:[%s10436_s1 + $0x390] sm:$0xff] }
  0xcd   :  { %v6904_v29 = vpop.permute.xlu1 %851  ;;  %v6906_v30 = vpop.permute.xlu0 %846 }
  0xce   :  { %1171 = vperm.xlu1 %6321, %v545_v25   ;;  %1166 = vperm.xlu0 %6320, %v544_v26  }
  0xd1   :  { %v6914_v37 = vpop.permute.xlu1 %861  ;;  %v6916_v38 = vpop.permute.xlu0 %856 }
  0xd2   :  { %10612 = vst [vmem:[#allocation2_spill] sm:$0xff] %v6916_v38  ;;  %1181 = vperm.xlu1 %6321, %v547_v33   ;;  %1176 = vperm.xlu0 %6320, %v546_v34   ;;  %v559_v33 = vld [vmem:[%s10436_s1 + $0x3a8] sm:$0xff]  ;;  %v558_v34 = vld [vmem:[%s10436_s1 + $0x3a0] sm:$0xff] }
  0xd5   :  { %v6924_v45 = vpop.permute.xlu1 %871  ;;  %v6926_v46 = vpop.permute.xlu0 %866 }
  0xd6   :  { %10613 = vst [vmem:[#allocation3_spill] sm:$0xff] %v6924_v45  ;;  %10614 = vst [vmem:[#allocation4_spill] sm:$0xff] %v6926_v46  ;;  %1191 = vperm.xlu1 %6321, %v549_v41   ;;  %1186 = vperm.xlu0 %6320, %v548_v42  }
  0xd9   :  { %v6934_v53 = vpop.permute.xlu1 %881  ;;  %v6936_v54 = vpop.permute.xlu0 %876 }
  0xda   :  { %10615 = vst [vmem:[#allocation5_spill] sm:$0xff] %v6934_v53  ;;  %10616 = vst [vmem:[#allocation6_spill] sm:$0xff] %v6936_v54  ;;  %1201 = vperm.xlu1 %6321, %v551_v49   ;;  %1196 = vperm.xlu0 %6320, %v550_v50   ;;  %v561_v49 = vld [vmem:[%s10436_s1 + $0x3b8] sm:$0xff]  ;;  %v560_v50 = vld [vmem:[%s10436_s1 + $0x3b0] sm:$0xff] }
  0xdd   :  { %v6944_v61 = vpop.permute.xlu1 %891  ;;  %v6946_v62 = vpop.permute.xlu0 %886 }
  0xde   :  { %10617 = vst [vmem:[#allocation7_spill] sm:$0xff] %v6944_v61  ;;  %10618 = vst [vmem:[#allocation8_spill] sm:$0xff] %v6946_v62  ;;  %1211 = vperm.xlu1 %6321, %v553_v57   ;;  %1206 = vperm.xlu0 %6320, %v552_v58   ;;  %v2204_v61 = vld [vmem:[%s10437_s2 + $0x210] sm:$0xff] }
  0xe1   :  { %v6954_v9 = vpop.permute.xlu1 %901  ;;  %v6956_v10 = vpop.permute.xlu0 %896 }
  0xe2   :  { %10619 = vst [vmem:[#allocation9_spill] sm:$0xff] %v6954_v9  ;;  %10620 = vst [vmem:[#allocation10_spill] sm:$0xff] %v6956_v10  ;;  %1221 = vperm.xlu1 %6321, %v555_v1   ;;  %1216 = vperm.xlu0 %6320, %v554_v2   ;;  %v563_v1 = vld [vmem:[%s10436_s1 + $0x3c8] sm:$0xff]  ;;  %v562_v2 = vld [vmem:[%s10436_s1 + $0x3c0] sm:$0xff] }
  0xe5   :  { %v6964_v25 = vpop.permute.xlu1 %911  ;;  %v6966_v26 = vpop.permute.xlu0 %906 }
  0xe6   :  { %10621 = vst [vmem:[#allocation11_spill] sm:$0xff] %v6964_v25  ;;  %10622 = vst [vmem:[#allocation12_spill] sm:$0xff] %v6966_v26  ;;  %1231 = vperm.xlu1 %6321, %v557_v17   ;;  %1226 = vperm.xlu0 %6320, %v556_v18   ;;  %v2205_v25 = vld [vmem:[%s10437_s2 + $0x218] sm:$0xff] }
  0xe9   :  { %v6974_v41 = vpop.permute.xlu1 %921  ;;  %v6976_v42 = vpop.permute.xlu0 %916 }
  0xea   :  { %10623 = vst [vmem:[#allocation13_spill] sm:$0xff] %v6974_v41  ;;  %10624 = vst [vmem:[#allocation14_spill] sm:$0xff] %v6976_v42  ;;  %1241 = vperm.xlu1 %6321, %v559_v33   ;;  %1236 = vperm.xlu0 %6320, %v558_v34   ;;  %v565_v33 = vld [vmem:[%s10436_s1 + $0x3d8] sm:$0xff]  ;;  %v564_v34 = vld [vmem:[%s10436_s1 + $0x3d0] sm:$0xff] }
  0xeb   :  { %v2202_v42 = vld [vmem:[%s10437_s2 + $0x200] sm:$0xff] }
  0xed   :  { %v6984_v57 = vpop.permute.xlu1 %931  ;;  %v6986_v58 = vpop.permute.xlu0 %926 }
  0xee   :  { %10625 = vst [vmem:[#allocation15_spill] sm:$0xff] %v6984_v57  ;;  %10626 = vst [vmem:[#allocation16_spill] sm:$0xff] %v6986_v58  ;;  %1251 = vperm.xlu1 %6321, %v561_v49   ;;  %1246 = vperm.xlu0 %6320, %v560_v50  }
  0xf1   :  { %v6994_v17 = vpop.permute.xlu1 %941  ;;  %v6996_v18 = vpop.permute.xlu0 %936 }
  0xf2   :  { %10627 = vst [vmem:[#allocation17_spill] sm:$0xff] %v6994_v17  ;;  %10628 = vst [vmem:[#allocation18_spill] sm:$0xff] %v6996_v18  ;;  %1261 = vperm.xlu1 %6321, %v563_v1   ;;  %1256 = vperm.xlu0 %6320, %v562_v2   ;;  %v567_v18 = vld [vmem:[%s10436_s1 + $0x3e8] sm:$0xff]  ;;  %v566_v1 = vld [vmem:[%s10436_s1 + $0x3e0] sm:$0xff] }
  0xf5   :  { %v7004_v49 = vpop.permute.xlu1 %951  ;;  %v7006_v50 = vpop.permute.xlu0 %946 }
  0xf6   :  { %10629 = vst [vmem:[#allocation19_spill] sm:$0xff] %v7004_v49  ;;  %10630 = vst [vmem:[#allocation20_spill] sm:$0xff] %v7006_v50  ;;  %1271 = vperm.xlu1 %6321, %v565_v33   ;;  %1266 = vperm.xlu0 %6320, %v564_v34   ;;  %v569_v50 = vld [vmem:[%s10436_s1 + $0x3f8] sm:$0xff]  ;;  %v568_v33 = vld [vmem:[%s10436_s1 + $0x3f0] sm:$0xff] }
  0xf9   :  { %v7014_v2 = vpop.permute.xlu1 %961  ;;  %v7016_v17 = vpop.permute.xlu0 %956 }
  0xfa   :  { %10631 = vst [vmem:[#allocation21_spill] sm:$0xff] %v7014_v2  ;;  %10632 = vst [vmem:[#allocation22_spill] sm:$0xff] %v7016_v17  ;;  %1281 = vperm.xlu1 %6321, %v567_v18   ;;  %1276 = vperm.xlu0 %6320, %v566_v1   ;;  %v571_v17 = vld [vmem:[%s10436_s1 + $0x408] sm:$0xff]  ;;  %v570_v18 = vld [vmem:[%s10436_s1 + $0x400] sm:$0xff] }
  0xfd   :  { %v7024_v34 = vpop.permute.xlu1 %971  ;;  %v7026_v49 = vpop.permute.xlu0 %966 }
  0xfe   :  { %10633 = vst [vmem:[#allocation23_spill] sm:$0xff] %v7024_v34  ;;  %10634 = vst [vmem:[#allocation24_spill] sm:$0xff] %v7026_v49  ;;  %1291 = vperm.xlu1 %6321, %v569_v50   ;;  %1286 = vperm.xlu0 %6320, %v568_v33   ;;  %v573_v49 = vld [vmem:[%s10436_s1 + $0x418] sm:$0xff]  ;;  %v572_v50 = vld [vmem:[%s10436_s1 + $0x410] sm:$0xff] }
 0x101   :  { %v7034_v1 = vpop.permute.xlu1 %981  ;;  %v7036_v2 = vpop.permute.xlu0 %976 }
 0x102   :  { %10635 = vst [vmem:[#allocation25_spill] sm:$0xff] %v7034_v1  ;;  %10636 = vst [vmem:[#allocation26_spill] sm:$0xff] %v7036_v2  ;;  %1301 = vperm.xlu1 %6321, %v571_v17   ;;  %1296 = vperm.xlu0 %6320, %v570_v18   ;;  %v575_v2 = vld [vmem:[%s10436_s1 + $0x428] sm:$0xff]  ;;  %v574_v17 = vld [vmem:[%s10436_s1 + $0x420] sm:$0xff] }
 0x105   :  { %v7044_v33 = vpop.permute.xlu1 %991  ;;  %v7046_v34 = vpop.permute.xlu0 %986 }
 0x106   :  { %10637 = vst [vmem:[#allocation27_spill] sm:$0xff] %v7044_v33  ;;  %10638 = vst [vmem:[#allocation28_spill] sm:$0xff] %v7046_v34  ;;  %1311 = vperm.xlu1 %6321, %v573_v49   ;;  %1306 = vperm.xlu0 %6320, %v572_v50   ;;  %v577_v34 = vld [vmem:[%s10436_s1 + $0x438] sm:$0xff]  ;;  %v576_v49 = vld [vmem:[%s10436_s1 + $0x430] sm:$0xff] }
 0x109   :  { %v7054_v18 = vpop.permute.xlu1 %1001  ;;  %v7056_v1 = vpop.permute.xlu0 %996 }
 0x10a   :  { %10639 = vst [vmem:[#allocation29_spill] sm:$0xff] %v7054_v18  ;;  %10640 = vst [vmem:[#allocation30_spill] sm:$0xff] %v7056_v1  ;;  %1321 = vperm.xlu1 %6321, %v575_v2   ;;  %1316 = vperm.xlu0 %6320, %v574_v17   ;;  %v579_v1 = vld [vmem:[%s10436_s1 + $0x448] sm:$0xff]  ;;  %v578_v2 = vld [vmem:[%s10436_s1 + $0x440] sm:$0xff] }
 0x10d   :  { %v7064_v50 = vpop.permute.xlu1 %1011  ;;  %v7066_v33 = vpop.permute.xlu0 %1006 }
 0x10e   :  { %10641 = vst [vmem:[#allocation31_spill] sm:$0xff] %v7064_v50  ;;  %10642 = vst [vmem:[#allocation32_spill] sm:$0xff] %v7066_v33  ;;  %1331 = vperm.xlu1 %6321, %v577_v34   ;;  %1326 = vperm.xlu0 %6320, %v576_v49   ;;  %v581_v33 = vld [vmem:[%s10436_s1 + $0x458] sm:$0xff]  ;;  %v580_v34 = vld [vmem:[%s10436_s1 + $0x450] sm:$0xff] }
 0x111   :  { %v7074_v17 = vpop.permute.xlu1 %1021  ;;  %v7076_v18 = vpop.permute.xlu0 %1016 }
 0x112   :  { %10643 = vst [vmem:[#allocation33_spill] sm:$0xff] %v7074_v17  ;;  %10644 = vst [vmem:[#allocation34_spill] sm:$0xff] %v7076_v18  ;;  %1341 = vperm.xlu1 %6321, %v579_v1   ;;  %1336 = vperm.xlu0 %6320, %v578_v2   ;;  %v583_v18 = vld [vmem:[%s10436_s1 + $0x468] sm:$0xff]  ;;  %v582_v1 = vld [vmem:[%s10436_s1 + $0x460] sm:$0xff] }
 0x115   :  { %v7084_v49 = vpop.permute.xlu1 %1031  ;;  %v7086_v50 = vpop.permute.xlu0 %1026 }
 0x116   :  { %10645 = vst [vmem:[#allocation35_spill] sm:$0xff] %v7084_v49  ;;  %10646 = vst [vmem:[#allocation36_spill] sm:$0xff] %v7086_v50  ;;  %1351 = vperm.xlu1 %6321, %v581_v33   ;;  %1346 = vperm.xlu0 %6320, %v580_v34   ;;  %v585_v50 = vld [vmem:[%s10436_s1 + $0x478] sm:$0xff]  ;;  %v584_v33 = vld [vmem:[%s10436_s1 + $0x470] sm:$0xff] }
 0x119   :  { %v7094_v2 = vpop.permute.xlu1 %1041  ;;  %v7096_v17 = vpop.permute.xlu0 %1036 }
 0x11a   :  { %10647 = vst [vmem:[#allocation37_spill] sm:$0xff] %v7094_v2  ;;  %10648 = vst [vmem:[#allocation38_spill] sm:$0xff] %v7096_v17  ;;  %1361 = vperm.xlu1 %6321, %v583_v18   ;;  %1356 = vperm.xlu0 %6320, %v582_v1   ;;  %v587_v17 = vld [vmem:[%s10436_s1 + $0x488] sm:$0xff]  ;;  %v586_v18 = vld [vmem:[%s10436_s1 + $0x480] sm:$0xff] }
 0x11d   :  { %v7104_v34 = vpop.permute.xlu1 %1051  ;;  %v7106_v49 = vpop.permute.xlu0 %1046 }
 0x11e   :  { %10649 = vst [vmem:[#allocation39_spill] sm:$0xff] %v7104_v34  ;;  %10650 = vst [vmem:[#allocation40_spill] sm:$0xff] %v7106_v49  ;;  %1371 = vperm.xlu1 %6321, %v585_v50   ;;  %1366 = vperm.xlu0 %6320, %v584_v33   ;;  %v589_v49 = vld [vmem:[%s10436_s1 + $0x498] sm:$0xff]  ;;  %v588_v50 = vld [vmem:[%s10436_s1 + $0x490] sm:$0xff] }
 0x121   :  { %v7114_v1 = vpop.permute.xlu1 %1061  ;;  %v7116_v2 = vpop.permute.xlu0 %1056 }
 0x122   :  { %10651 = vst [vmem:[#allocation41_spill] sm:$0xff] %v7114_v1  ;;  %10652 = vst [vmem:[#allocation42_spill] sm:$0xff] %v7116_v2  ;;  %1381 = vperm.xlu1 %6321, %v587_v17   ;;  %1376 = vperm.xlu0 %6320, %v586_v18   ;;  %v591_v2 = vld [vmem:[%s10436_s1 + $0x4a8] sm:$0xff]  ;;  %v590_v17 = vld [vmem:[%s10436_s1 + $0x4a0] sm:$0xff] }
 0x125   :  { %v7124_v33 = vpop.permute.xlu1 %1071  ;;  %v7126_v34 = vpop.permute.xlu0 %1066 }
 0x126   :  { %10653 = vst [vmem:[#allocation43_spill] sm:$0xff] %v7124_v33  ;;  %10654 = vst [vmem:[#allocation44_spill] sm:$0xff] %v7126_v34  ;;  %1391 = vperm.xlu1 %6321, %v589_v49   ;;  %1386 = vperm.xlu0 %6320, %v588_v50   ;;  %v593_v34 = vld [vmem:[%s10436_s1 + $0x4b8] sm:$0xff]  ;;  %v592_v49 = vld [vmem:[%s10436_s1 + $0x4b0] sm:$0xff] }
 0x129   :  { %v7134_v18 = vpop.permute.xlu1 %1081  ;;  %v7136_v1 = vpop.permute.xlu0 %1076 }
 0x12a   :  { %10655 = vst [vmem:[#allocation45_spill] sm:$0xff] %v7134_v18  ;;  %10656 = vst [vmem:[#allocation46_spill] sm:$0xff] %v7136_v1  ;;  %1401 = vperm.xlu1 %6321, %v591_v2   ;;  %1396 = vperm.xlu0 %6320, %v590_v17   ;;  %v595_v1 = vld [vmem:[%s10436_s1 + $0x4c8] sm:$0xff]  ;;  %v594_v2 = vld [vmem:[%s10436_s1 + $0x4c0] sm:$0xff] }
 0x12d   :  { %v7144_v50 = vpop.permute.xlu1 %1091  ;;  %v7146_v33 = vpop.permute.xlu0 %1086 }
 0x12e   :  { %10657 = vst [vmem:[#allocation47_spill] sm:$0xff] %v7144_v50  ;;  %10658 = vst [vmem:[#allocation48_spill] sm:$0xff] %v7146_v33  ;;  %1411 = vperm.xlu1 %6321, %v593_v34   ;;  %1406 = vperm.xlu0 %6320, %v592_v49   ;;  %v597_v33 = vld [vmem:[%s10436_s1 + $0x4d8] sm:$0xff]  ;;  %v596_v34 = vld [vmem:[%s10436_s1 + $0x4d0] sm:$0xff] }
 0x131   :  { %v7154_v17 = vpop.permute.xlu1 %1101  ;;  %v7156_v18 = vpop.permute.xlu0 %1096 }
 0x132   :  { %10659 = vst [vmem:[#allocation49_spill] sm:$0xff] %v7154_v17  ;;  %10660 = vst [vmem:[#allocation50_spill] sm:$0xff] %v7156_v18  ;;  %1421 = vperm.xlu1 %6321, %v595_v1   ;;  %1416 = vperm.xlu0 %6320, %v594_v2   ;;  %v599_v18 = vld [vmem:[%s10436_s1 + $0x4e8] sm:$0xff]  ;;  %v598_v1 = vld [vmem:[%s10436_s1 + $0x4e0] sm:$0xff] }
 0x135   :  { %v7164_v49 = vpop.permute.xlu1 %1111  ;;  %v7166_v50 = vpop.permute.xlu0 %1106 }
 0x136   :  { %10661 = vst [vmem:[#allocation51_spill] sm:$0xff] %v7164_v49  ;;  %10662 = vst [vmem:[#allocation52_spill] sm:$0xff] %v7166_v50  ;;  %1431 = vperm.xlu1 %6321, %v597_v33   ;;  %1426 = vperm.xlu0 %6320, %v596_v34   ;;  %v601_v50 = vld [vmem:[%s10436_s1 + $0x4f8] sm:$0xff]  ;;  %v600_v33 = vld [vmem:[%s10436_s1 + $0x4f0] sm:$0xff] }
 0x139   :  { %v7174_v2 = vpop.permute.xlu1 %1121  ;;  %v7176_v17 = vpop.permute.xlu0 %1116 }
 0x13a   :  { %10663 = vst [vmem:[#allocation53_spill] sm:$0xff] %v7174_v2  ;;  %10664 = vst [vmem:[#allocation54_spill] sm:$0xff] %v7176_v17  ;;  %1441 = vperm.xlu1 %6321, %v599_v18   ;;  %1436 = vperm.xlu0 %6320, %v598_v1   ;;  %v603_v17 = vld [vmem:[%s10436_s1 + $0x508] sm:$0xff]  ;;  %v602_v18 = vld [vmem:[%s10436_s1 + $0x500] sm:$0xff] }
 0x13d   :  { %v7184_v34 = vpop.permute.xlu1 %1131  ;;  %v7186_v49 = vpop.permute.xlu0 %1126 }
 0x13e   :  { %10665 = vst [vmem:[#allocation55_spill] sm:$0xff] %v7184_v34  ;;  %10666 = vst [vmem:[#allocation56_spill] sm:$0xff] %v7186_v49  ;;  %1451 = vperm.xlu1 %6321, %v601_v50   ;;  %1446 = vperm.xlu0 %6320, %v600_v33   ;;  %v605_v49 = vld [vmem:[%s10436_s1 + $0x518] sm:$0xff]  ;;  %v604_v50 = vld [vmem:[%s10436_s1 + $0x510] sm:$0xff] }
 0x141   :  { %v7194_v1 = vpop.permute.xlu1 %1141  ;;  %v7196_v2 = vpop.permute.xlu0 %1136 }
 0x142   :  { %10667 = vst [vmem:[#allocation57_spill] sm:$0xff] %v7194_v1  ;;  %10668 = vst [vmem:[#allocation58_spill] sm:$0xff] %v7196_v2  ;;  %1461 = vperm.xlu1 %6321, %v603_v17   ;;  %1456 = vperm.xlu0 %6320, %v602_v18   ;;  %v607_v2 = vld [vmem:[%s10436_s1 + $0x528] sm:$0xff]  ;;  %v606_v17 = vld [vmem:[%s10436_s1 + $0x520] sm:$0xff] }
 0x145   :  { %v7204_v33 = vpop.permute.xlu1 %1151  ;;  %v7206_v34 = vpop.permute.xlu0 %1146 }
 0x146   :  { %10669 = vst [vmem:[#allocation59_spill] sm:$0xff] %v7204_v33  ;;  %10670 = vst [vmem:[#allocation60_spill] sm:$0xff] %v7206_v34  ;;  %1471 = vperm.xlu1 %6321, %v605_v49   ;;  %1466 = vperm.xlu0 %6320, %v604_v50   ;;  %v609_v34 = vld [vmem:[%s10436_s1 + $0x538] sm:$0xff]  ;;  %v608_v49 = vld [vmem:[%s10436_s1 + $0x530] sm:$0xff] }
 0x149   :  { %v7214_v18 = vpop.permute.xlu1 %1161  ;;  %v7216_v1 = vpop.permute.xlu0 %1156 }
 0x14a   :  { %10671 = vst [vmem:[#allocation61_spill] sm:$0xff] %v7214_v18  ;;  %10672 = vst [vmem:[#allocation62_spill] sm:$0xff] %v7216_v1  ;;  %1481 = vperm.xlu1 %6321, %v607_v2   ;;  %1476 = vperm.xlu0 %6320, %v606_v17   ;;  %v611_v1 = vld [vmem:[%s10436_s1 + $0x548] sm:$0xff]  ;;  %v610_v2 = vld [vmem:[%s10436_s1 + $0x540] sm:$0xff] }
 0x14d   :  { %v7224_v50 = vpop.permute.xlu1 %1171  ;;  %v7226_v33 = vpop.permute.xlu0 %1166 }
 0x14e   :  { %10673 = vst [vmem:[#allocation63_spill] sm:$0xff] %v7224_v50  ;;  %10674 = vst [vmem:[#allocation64_spill] sm:$0xff] %v7226_v33  ;;  %1491 = vperm.xlu1 %6321, %v609_v34   ;;  %1486 = vperm.xlu0 %6320, %v608_v49   ;;  %v613_v33 = vld [vmem:[%s10436_s1 + $0x558] sm:$0xff]  ;;  %v612_v34 = vld [vmem:[%s10436_s1 + $0x550] sm:$0xff] }
 0x151   :  { %v7234_v17 = vpop.permute.xlu1 %1181  ;;  %v7236_v18 = vpop.permute.xlu0 %1176 }
 0x152   :  { %10675 = vst [vmem:[#allocation65_spill] sm:$0xff] %v7234_v17  ;;  %10676 = vst [vmem:[#allocation66_spill] sm:$0xff] %v7236_v18  ;;  %1501 = vperm.xlu1 %6321, %v611_v1   ;;  %1496 = vperm.xlu0 %6320, %v610_v2   ;;  %v615_v18 = vld [vmem:[%s10436_s1 + $0x568] sm:$0xff]  ;;  %v614_v1 = vld [vmem:[%s10436_s1 + $0x560] sm:$0xff] }
 0x155   :  { %v7244_v49 = vpop.permute.xlu1 %1191  ;;  %v7246_v50 = vpop.permute.xlu0 %1186 }
 0x156   :  { %10677 = vst [vmem:[#allocation67_spill] sm:$0xff] %v7244_v49  ;;  %10678 = vst [vmem:[#allocation68_spill] sm:$0xff] %v7246_v50  ;;  %1511 = vperm.xlu1 %6321, %v613_v33   ;;  %1506 = vperm.xlu0 %6320, %v612_v34   ;;  %v617_v50 = vld [vmem:[%s10436_s1 + $0x578] sm:$0xff]  ;;  %v616_v33 = vld [vmem:[%s10436_s1 + $0x570] sm:$0xff] }
 0x159   :  { %v7254_v2 = vpop.permute.xlu1 %1201  ;;  %v7256_v17 = vpop.permute.xlu0 %1196 }
 0x15a   :  { %10679 = vst [vmem:[#allocation69_spill] sm:$0xff] %v7254_v2  ;;  %10680 = vst [vmem:[#allocation70_spill] sm:$0xff] %v7256_v17  ;;  %1521 = vperm.xlu1 %6321, %v615_v18   ;;  %1516 = vperm.xlu0 %6320, %v614_v1   ;;  %v619_v17 = vld [vmem:[%s10436_s1 + $0x588] sm:$0xff]  ;;  %v618_v18 = vld [vmem:[%s10436_s1 + $0x580] sm:$0xff] }
 0x15d   :  { %v7264_v34 = vpop.permute.xlu1 %1211  ;;  %v7266_v49 = vpop.permute.xlu0 %1206 }
 0x15e   :  { %10681 = vst [vmem:[#allocation71_spill] sm:$0xff] %v7264_v34  ;;  %10682 = vst [vmem:[#allocation72_spill] sm:$0xff] %v7266_v49  ;;  %1531 = vperm.xlu1 %6321, %v617_v50   ;;  %1526 = vperm.xlu0 %6320, %v616_v33   ;;  %v621_v49 = vld [vmem:[%s10436_s1 + $0x598] sm:$0xff]  ;;  %v620_v50 = vld [vmem:[%s10436_s1 + $0x590] sm:$0xff] }
 0x161   :  { %v7274_v1 = vpop.permute.xlu1 %1221  ;;  %v7276_v2 = vpop.permute.xlu0 %1216 }
 0x162   :  { %10683 = vst [vmem:[#allocation73_spill] sm:$0xff] %v7274_v1  ;;  %10684 = vst [vmem:[#allocation74_spill] sm:$0xff] %v7276_v2  ;;  %1541 = vperm.xlu1 %6321, %v619_v17   ;;  %1536 = vperm.xlu0 %6320, %v618_v18   ;;  %v623_v2 = vld [vmem:[%s10436_s1 + $0x5a8] sm:$0xff]  ;;  %v622_v17 = vld [vmem:[%s10436_s1 + $0x5a0] sm:$0xff] }
 0x165   :  { %v7284_v33 = vpop.permute.xlu1 %1231  ;;  %v7286_v34 = vpop.permute.xlu0 %1226 }
 0x166   :  { %10685 = vst [vmem:[#allocation75_spill] sm:$0xff] %v7284_v33  ;;  %10686 = vst [vmem:[#allocation76_spill] sm:$0xff] %v7286_v34  ;;  %1551 = vperm.xlu1 %6321, %v621_v49   ;;  %1546 = vperm.xlu0 %6320, %v620_v50   ;;  %v625_v34 = vld [vmem:[%s10436_s1 + $0x5b8] sm:$0xff]  ;;  %v624_v49 = vld [vmem:[%s10436_s1 + $0x5b0] sm:$0xff] }
 0x169   :  { %v7294_v18 = vpop.permute.xlu1 %1241  ;;  %v7296_v1 = vpop.permute.xlu0 %1236 }
 0x16a   :  { %10687 = vst [vmem:[#allocation77_spill] sm:$0xff] %v7294_v18  ;;  %10688 = vst [vmem:[#allocation78_spill] sm:$0xff] %v7296_v1  ;;  %1561 = vperm.xlu1 %6321, %v623_v2   ;;  %1556 = vperm.xlu0 %6320, %v622_v17   ;;  %v627_v1 = vld [vmem:[%s10436_s1 + $0x5c8] sm:$0xff]  ;;  %v626_v2 = vld [vmem:[%s10436_s1 + $0x5c0] sm:$0xff] }
 0x16d   :  { %v7304_v50 = vpop.permute.xlu1 %1251  ;;  %v7306_v33 = vpop.permute.xlu0 %1246 }
 0x16e   :  { %10689 = vst [vmem:[#allocation79_spill] sm:$0xff] %v7304_v50  ;;  %10690 = vst [vmem:[#allocation80_spill] sm:$0xff] %v7306_v33  ;;  %1571 = vperm.xlu1 %6321, %v625_v34   ;;  %1566 = vperm.xlu0 %6320, %v624_v49   ;;  %v629_v33 = vld [vmem:[%s10436_s1 + $0x5d8] sm:$0xff]  ;;  %v628_v34 = vld [vmem:[%s10436_s1 + $0x5d0] sm:$0xff] }
 0x171   :  { %v7314_v17 = vpop.permute.xlu1 %1261  ;;  %v7316_v18 = vpop.permute.xlu0 %1256 }
 0x172   :  { %10691 = vst [vmem:[#allocation81_spill] sm:$0xff] %v7314_v17  ;;  %10692 = vst [vmem:[#allocation82_spill] sm:$0xff] %v7316_v18  ;;  %1581 = vperm.xlu1 %6321, %v627_v1   ;;  %1576 = vperm.xlu0 %6320, %v626_v2   ;;  %v631_v18 = vld [vmem:[%s10436_s1 + $0x5e8] sm:$0xff]  ;;  %v630_v1 = vld [vmem:[%s10436_s1 + $0x5e0] sm:$0xff] }
 0x175   :  { %v7324_v49 = vpop.permute.xlu1 %1271  ;;  %v7326_v50 = vpop.permute.xlu0 %1266 }
 0x176   :  { %10693 = vst [vmem:[#allocation83_spill] sm:$0xff] %v7324_v49  ;;  %10694 = vst [vmem:[#allocation84_spill] sm:$0xff] %v7326_v50  ;;  %1591 = vperm.xlu1 %6321, %v629_v33   ;;  %1586 = vperm.xlu0 %6320, %v628_v34   ;;  %v633_v50 = vld [vmem:[%s10436_s1 + $0x5f8] sm:$0xff]  ;;  %v632_v33 = vld [vmem:[%s10436_s1 + $0x5f0] sm:$0xff] }
 0x179   :  { %v7334_v2 = vpop.permute.xlu1 %1281  ;;  %v7336_v17 = vpop.permute.xlu0 %1276 }
 0x17a   :  { %10695 = vst [vmem:[#allocation85_spill] sm:$0xff] %v7334_v2  ;;  %10696 = vst [vmem:[#allocation86_spill] sm:$0xff] %v7336_v17  ;;  %1601 = vperm.xlu1 %6321, %v631_v18   ;;  %1596 = vperm.xlu0 %6320, %v630_v1   ;;  %v635_v17 = vld [vmem:[%s10436_s1 + $0x608] sm:$0xff]  ;;  %v634_v18 = vld [vmem:[%s10436_s1 + $0x600] sm:$0xff] }
 0x17d   :  { %v7344_v34 = vpop.permute.xlu1 %1291  ;;  %v7346_v49 = vpop.permute.xlu0 %1286 }
 0x17e   :  { %10697 = vst [vmem:[#allocation87_spill] sm:$0xff] %v7344_v34  ;;  %10698 = vst [vmem:[#allocation88_spill] sm:$0xff] %v7346_v49  ;;  %1611 = vperm.xlu1 %6321, %v633_v50   ;;  %1606 = vperm.xlu0 %6320, %v632_v33   ;;  %v637_v49 = vld [vmem:[%s10436_s1 + $0x618] sm:$0xff]  ;;  %v636_v50 = vld [vmem:[%s10436_s1 + $0x610] sm:$0xff] }
 0x181   :  { %v7354_v1 = vpop.permute.xlu1 %1301  ;;  %v7356_v2 = vpop.permute.xlu0 %1296 }
 0x182   :  { %10699 = vst [vmem:[#allocation89_spill] sm:$0xff] %v7354_v1  ;;  %10700 = vst [vmem:[#allocation90_spill] sm:$0xff] %v7356_v2  ;;  %1621 = vperm.xlu1 %6321, %v635_v17   ;;  %1616 = vperm.xlu0 %6320, %v634_v18   ;;  %v639_v2 = vld [vmem:[%s10436_s1 + $0x628] sm:$0xff]  ;;  %v638_v17 = vld [vmem:[%s10436_s1 + $0x620] sm:$0xff] }
 0x185   :  { %v7364_v33 = vpop.permute.xlu1 %1311  ;;  %v7366_v34 = vpop.permute.xlu0 %1306 }
 0x186   :  { %10701 = vst [vmem:[#allocation91_spill] sm:$0xff] %v7364_v33  ;;  %10702 = vst [vmem:[#allocation92_spill] sm:$0xff] %v7366_v34  ;;  %1631 = vperm.xlu1 %6321, %v637_v49   ;;  %1626 = vperm.xlu0 %6320, %v636_v50   ;;  %v641_v34 = vld [vmem:[%s10436_s1 + $0x638] sm:$0xff]  ;;  %v640_v49 = vld [vmem:[%s10436_s1 + $0x630] sm:$0xff] }
 0x189   :  { %v7374_v18 = vpop.permute.xlu1 %1321  ;;  %v7376_v1 = vpop.permute.xlu0 %1316 }
 0x18a   :  { %10703 = vst [vmem:[#allocation93_spill] sm:$0xff] %v7374_v18  ;;  %10704 = vst [vmem:[#allocation94_spill] sm:$0xff] %v7376_v1  ;;  %1641 = vperm.xlu1 %6321, %v639_v2   ;;  %1636 = vperm.xlu0 %6320, %v638_v17   ;;  %v643_v1 = vld [vmem:[%s10436_s1 + $0x648] sm:$0xff]  ;;  %v642_v2 = vld [vmem:[%s10436_s1 + $0x640] sm:$0xff] }
 0x18d   :  { %v7384_v50 = vpop.permute.xlu1 %1331  ;;  %v7386_v33 = vpop.permute.xlu0 %1326 }
 0x18e   :  { %10705 = vst [vmem:[#allocation95_spill] sm:$0xff] %v7384_v50  ;;  %10706 = vst [vmem:[#allocation96_spill] sm:$0xff] %v7386_v33  ;;  %1651 = vperm.xlu1 %6321, %v641_v34   ;;  %1646 = vperm.xlu0 %6320, %v640_v49   ;;  %v645_v33 = vld [vmem:[%s10436_s1 + $0x658] sm:$0xff]  ;;  %v644_v34 = vld [vmem:[%s10436_s1 + $0x650] sm:$0xff] }
 0x191   :  { %v7394_v17 = vpop.permute.xlu1 %1341  ;;  %v7396_v18 = vpop.permute.xlu0 %1336 }
 0x192   :  { %10707 = vst [vmem:[#allocation97_spill] sm:$0xff] %v7394_v17  ;;  %10708 = vst [vmem:[#allocation98_spill] sm:$0xff] %v7396_v18  ;;  %1661 = vperm.xlu1 %6321, %v643_v1   ;;  %1656 = vperm.xlu0 %6320, %v642_v2   ;;  %v647_v18 = vld [vmem:[%s10436_s1 + $0x668] sm:$0xff]  ;;  %v646_v1 = vld [vmem:[%s10436_s1 + $0x660] sm:$0xff] }
 0x195   :  { %v7404_v49 = vpop.permute.xlu1 %1351  ;;  %v7406_v50 = vpop.permute.xlu0 %1346 }
 0x196   :  { %10709 = vst [vmem:[#allocation99_spill] sm:$0xff] %v7404_v49  ;;  %10710 = vst [vmem:[#allocation100_spill] sm:$0xff] %v7406_v50  ;;  %1671 = vperm.xlu1 %6321, %v645_v33   ;;  %1666 = vperm.xlu0 %6320, %v644_v34   ;;  %v649_v50 = vld [vmem:[%s10436_s1 + $0x678] sm:$0xff]  ;;  %v648_v33 = vld [vmem:[%s10436_s1 + $0x670] sm:$0xff] }
 0x199   :  { %v7414_v2 = vpop.permute.xlu1 %1361  ;;  %v7416_v17 = vpop.permute.xlu0 %1356 }
 0x19a   :  { %10711 = vst [vmem:[#allocation101_spill] sm:$0xff] %v7414_v2  ;;  %10712 = vst [vmem:[#allocation102_spill] sm:$0xff] %v7416_v17  ;;  %1681 = vperm.xlu1 %6321, %v647_v18   ;;  %1676 = vperm.xlu0 %6320, %v646_v1   ;;  %v651_v17 = vld [vmem:[%s10436_s1 + $0x688] sm:$0xff]  ;;  %v650_v18 = vld [vmem:[%s10436_s1 + $0x680] sm:$0xff] }
 0x19d   :  { %v7424_v34 = vpop.permute.xlu1 %1371  ;;  %v7426_v49 = vpop.permute.xlu0 %1366 }
 0x19e   :  { %10713 = vst [vmem:[#allocation103_spill] sm:$0xff] %v7424_v34  ;;  %10714 = vst [vmem:[#allocation104_spill] sm:$0xff] %v7426_v49  ;;  %1691 = vperm.xlu1 %6321, %v649_v50   ;;  %1686 = vperm.xlu0 %6320, %v648_v33   ;;  %v653_v49 = vld [vmem:[%s10436_s1 + $0x698] sm:$0xff]  ;;  %v652_v50 = vld [vmem:[%s10436_s1 + $0x690] sm:$0xff] }
 0x1a1   :  { %v7434_v1 = vpop.permute.xlu1 %1381  ;;  %v7436_v2 = vpop.permute.xlu0 %1376 }
 0x1a2   :  { %10715 = vst [vmem:[#allocation105_spill] sm:$0xff] %v7434_v1  ;;  %10716 = vst [vmem:[#allocation106_spill] sm:$0xff] %v7436_v2  ;;  %1701 = vperm.xlu1 %6321, %v651_v17   ;;  %1696 = vperm.xlu0 %6320, %v650_v18   ;;  %v2139_v2 = vld [vmem:[%s10437_s2 + $0x8] sm:$0xff]  ;;  %v2138_v17 = vld [vmem:[%s10437_s2] sm:$0xff] }
 0x1a5   :  { %v7444_v33 = vpop.permute.xlu1 %1391  ;;  %v7446_v34 = vpop.permute.xlu0 %1386 }
 0x1a6   :  { %10717 = vst [vmem:[#allocation107_spill] sm:$0xff] %v7444_v33  ;;  %10718 = vst [vmem:[#allocation108_spill] sm:$0xff] %v7446_v34  ;;  %1711 = vperm.xlu1 %6321, %v653_v49   ;;  %1706 = vperm.xlu0 %6320, %v652_v50   ;;  %v2141_v34 = vld [vmem:[%s10437_s2 + $0x18] sm:$0xff]  ;;  %v2140_v49 = vld [vmem:[%s10437_s2 + $0x10] sm:$0xff] }
 0x1a9   :  { %v7454_v18 = vpop.permute.xlu1 %1401  ;;  %v7456_v1 = vpop.permute.xlu0 %1396 }
 0x1aa   :  { %10719 = vst [vmem:[#allocation109_spill] sm:$0xff] %v7454_v18  ;;  %10720 = vst [vmem:[#allocation110_spill] sm:$0xff] %v7456_v1  ;;  %2357 = vperm.xlu1 %6321, %v2139_v2   ;;  %2352 = vperm.xlu0 %6320, %v2138_v17   ;;  %v2143_v1 = vld [vmem:[%s10437_s2 + $0x28] sm:$0xff]  ;;  %v2142_v2 = vld [vmem:[%s10437_s2 + $0x20] sm:$0xff] }
 0x1ad   :  { %v7464_v50 = vpop.permute.xlu1 %1411  ;;  %v7466_v33 = vpop.permute.xlu0 %1406 }
 0x1ae   :  { %10721 = vst [vmem:[#allocation111_spill] sm:$0xff] %v7464_v50  ;;  %10722 = vst [vmem:[#allocation112_spill] sm:$0xff] %v7466_v33  ;;  %2367 = vperm.xlu1 %6321, %v2141_v34   ;;  %2362 = vperm.xlu0 %6320, %v2140_v49   ;;  %v2145_v33 = vld [vmem:[%s10437_s2 + $0x38] sm:$0xff]  ;;  %v2144_v34 = vld [vmem:[%s10437_s2 + $0x30] sm:$0xff] }
 0x1b1   :  { %v7474_v17 = vpop.permute.xlu1 %1421  ;;  %v7476_v18 = vpop.permute.xlu0 %1416 }
 0x1b2   :  { %10723 = vst [vmem:[#allocation113_spill] sm:$0xff] %v7474_v17  ;;  %10724 = vst [vmem:[#allocation114_spill] sm:$0xff] %v7476_v18  ;;  %2377 = vperm.xlu1 %6321, %v2143_v1   ;;  %2372 = vperm.xlu0 %6320, %v2142_v2   ;;  %v2147_v18 = vld [vmem:[%s10437_s2 + $0x48] sm:$0xff]  ;;  %v2146_v1 = vld [vmem:[%s10437_s2 + $0x40] sm:$0xff] }
 0x1b5   :  { %v7484_v49 = vpop.permute.xlu1 %1431  ;;  %v7486_v50 = vpop.permute.xlu0 %1426 }
 0x1b6   :  { %10725 = vst [vmem:[#allocation115_spill] sm:$0xff] %v7484_v49  ;;  %10726 = vst [vmem:[#allocation116_spill] sm:$0xff] %v7486_v50  ;;  %2387 = vperm.xlu1 %6321, %v2145_v33   ;;  %2382 = vperm.xlu0 %6320, %v2144_v34   ;;  %v2149_v50 = vld [vmem:[%s10437_s2 + $0x58] sm:$0xff]  ;;  %v2148_v33 = vld [vmem:[%s10437_s2 + $0x50] sm:$0xff] }
 0x1b9   :  { %v7494_v2 = vpop.permute.xlu1 %1441  ;;  %v7496_v17 = vpop.permute.xlu0 %1436 }
 0x1ba   :  { %10727 = vst [vmem:[#allocation117_spill] sm:$0xff] %v7494_v2  ;;  %10728 = vst [vmem:[#allocation118_spill] sm:$0xff] %v7496_v17  ;;  %2397 = vperm.xlu1 %6321, %v2147_v18   ;;  %2392 = vperm.xlu0 %6320, %v2146_v1   ;;  %v2151_v17 = vld [vmem:[%s10437_s2 + $0x68] sm:$0xff]  ;;  %v2150_v18 = vld [vmem:[%s10437_s2 + $0x60] sm:$0xff] }
 0x1bd   :  { %v7504_v34 = vpop.permute.xlu1 %1451  ;;  %v7506_v49 = vpop.permute.xlu0 %1446 }
 0x1be   :  { %10729 = vst [vmem:[#allocation119_spill] sm:$0xff] %v7504_v34  ;;  %10730 = vst [vmem:[#allocation120_spill] sm:$0xff] %v7506_v49  ;;  %2407 = vperm.xlu1 %6321, %v2149_v50   ;;  %2402 = vperm.xlu0 %6320, %v2148_v33   ;;  %v2153_v49 = vld [vmem:[%s10437_s2 + $0x78] sm:$0xff]  ;;  %v2152_v50 = vld [vmem:[%s10437_s2 + $0x70] sm:$0xff] }
 0x1c1   :  { %v7514_v1 = vpop.permute.xlu1 %1461  ;;  %v7516_v2 = vpop.permute.xlu0 %1456 }
 0x1c2   :  { %10731 = vst [vmem:[#allocation121_spill] sm:$0xff] %v7514_v1  ;;  %10732 = vst [vmem:[#allocation122_spill] sm:$0xff] %v7516_v2  ;;  %2417 = vperm.xlu1 %6321, %v2151_v17   ;;  %2412 = vperm.xlu0 %6320, %v2150_v18   ;;  %v2155_v2 = vld [vmem:[%s10437_s2 + $0x88] sm:$0xff]  ;;  %v2154_v17 = vld [vmem:[%s10437_s2 + $0x80] sm:$0xff] }
 0x1c5   :  { %v7524_v33 = vpop.permute.xlu1 %1471  ;;  %v7526_v34 = vpop.permute.xlu0 %1466 }
 0x1c6   :  { %10733 = vst [vmem:[#allocation123_spill] sm:$0xff] %v7524_v33  ;;  %10734 = vst [vmem:[#allocation124_spill] sm:$0xff] %v7526_v34  ;;  %2427 = vperm.xlu1 %6321, %v2153_v49   ;;  %2422 = vperm.xlu0 %6320, %v2152_v50   ;;  %v2157_v34 = vld [vmem:[%s10437_s2 + $0x98] sm:$0xff]  ;;  %v2156_v49 = vld [vmem:[%s10437_s2 + $0x90] sm:$0xff] }
 0x1c9   :  { %v7534_v18 = vpop.permute.xlu1 %1481  ;;  %v7536_v1 = vpop.permute.xlu0 %1476 }
 0x1ca   :  { %10735 = vst [vmem:[#allocation125_spill] sm:$0xff] %v7534_v18  ;;  %10736 = vst [vmem:[#allocation126_spill] sm:$0xff] %v7536_v1  ;;  %2437 = vperm.xlu1 %6321, %v2155_v2   ;;  %2432 = vperm.xlu0 %6320, %v2154_v17   ;;  %v2159_v1 = vld [vmem:[%s10437_s2 + $0xa8] sm:$0xff]  ;;  %v2158_v2 = vld [vmem:[%s10437_s2 + $0xa0] sm:$0xff] }
 0x1cd   :  { %v7544_v50 = vpop.permute.xlu1 %1491  ;;  %v7546_v33 = vpop.permute.xlu0 %1486 }
 0x1ce   :  { %10737 = vst [vmem:[#allocation127_spill] sm:$0xff] %v7544_v50  ;;  %10738 = vst [vmem:[#allocation128_spill] sm:$0xff] %v7546_v33  ;;  %2447 = vperm.xlu1 %6321, %v2157_v34   ;;  %2442 = vperm.xlu0 %6320, %v2156_v49   ;;  %v2161_v33 = vld [vmem:[%s10437_s2 + $0xb8] sm:$0xff]  ;;  %v2160_v34 = vld [vmem:[%s10437_s2 + $0xb0] sm:$0xff] }
 0x1d1   :  { %v7554_v17 = vpop.permute.xlu1 %1501  ;;  %v7556_v18 = vpop.permute.xlu0 %1496 }
 0x1d2   :  { %10739 = vst [vmem:[#allocation129_spill] sm:$0xff] %v7554_v17  ;;  %10740 = vst [vmem:[#allocation130_spill] sm:$0xff] %v7556_v18  ;;  %2457 = vperm.xlu1 %6321, %v2159_v1   ;;  %2452 = vperm.xlu0 %6320, %v2158_v2   ;;  %v2163_v18 = vld [vmem:[%s10437_s2 + $0xc8] sm:$0xff]  ;;  %v2162_v1 = vld [vmem:[%s10437_s2 + $0xc0] sm:$0xff] }
 0x1d5   :  { %v7564_v49 = vpop.permute.xlu1 %1511  ;;  %v7566_v50 = vpop.permute.xlu0 %1506 }
 0x1d6   :  { %10741 = vst [vmem:[#allocation131_spill] sm:$0xff] %v7564_v49  ;;  %10742 = vst [vmem:[#allocation132_spill] sm:$0xff] %v7566_v50  ;;  %2467 = vperm.xlu1 %6321, %v2161_v33   ;;  %2462 = vperm.xlu0 %6320, %v2160_v34   ;;  %v2165_v50 = vld [vmem:[%s10437_s2 + $0xd8] sm:$0xff]  ;;  %v2164_v33 = vld [vmem:[%s10437_s2 + $0xd0] sm:$0xff] }
 0x1d9   :  { %v7574_v2 = vpop.permute.xlu1 %1521  ;;  %v7576_v17 = vpop.permute.xlu0 %1516 }
 0x1da   :  { %10743 = vst [vmem:[#allocation133_spill] sm:$0xff] %v7574_v2  ;;  %10744 = vst [vmem:[#allocation134_spill] sm:$0xff] %v7576_v17  ;;  %2477 = vperm.xlu1 %6321, %v2163_v18   ;;  %2472 = vperm.xlu0 %6320, %v2162_v1   ;;  %v2167_v17 = vld [vmem:[%s10437_s2 + $0xe8] sm:$0xff]  ;;  %v2166_v18 = vld [vmem:[%s10437_s2 + $0xe0] sm:$0xff] }
 0x1dd   :  { %v7584_v34 = vpop.permute.xlu1 %1531  ;;  %v7586_v49 = vpop.permute.xlu0 %1526 }
 0x1de   :  { %10745 = vst [vmem:[#allocation135_spill] sm:$0xff] %v7584_v34  ;;  %10746 = vst [vmem:[#allocation136_spill] sm:$0xff] %v7586_v49  ;;  %2487 = vperm.xlu1 %6321, %v2165_v50   ;;  %2482 = vperm.xlu0 %6320, %v2164_v33   ;;  %v2169_v49 = vld [vmem:[%s10437_s2 + $0xf8] sm:$0xff]  ;;  %v2168_v50 = vld [vmem:[%s10437_s2 + $0xf0] sm:$0xff] }
 0x1e1   :  { %v7594_v1 = vpop.permute.xlu1 %1541  ;;  %v7596_v2 = vpop.permute.xlu0 %1536 }
 0x1e2   :  { %10747 = vst [vmem:[#allocation137_spill] sm:$0xff] %v7594_v1  ;;  %10748 = vst [vmem:[#allocation138_spill] sm:$0xff] %v7596_v2  ;;  %2497 = vperm.xlu1 %6321, %v2167_v17   ;;  %2492 = vperm.xlu0 %6320, %v2166_v18   ;;  %v2171_v2 = vld [vmem:[%s10437_s2 + $0x108] sm:$0xff]  ;;  %v2170_v17 = vld [vmem:[%s10437_s2 + $0x100] sm:$0xff] }
 0x1e5   :  { %v7604_v33 = vpop.permute.xlu1 %1551  ;;  %v7606_v34 = vpop.permute.xlu0 %1546 }
 0x1e6   :  { %10749 = vst [vmem:[#allocation139_spill] sm:$0xff] %v7604_v33  ;;  %10750 = vst [vmem:[#allocation140_spill] sm:$0xff] %v7606_v34  ;;  %2507 = vperm.xlu1 %6321, %v2169_v49   ;;  %2502 = vperm.xlu0 %6320, %v2168_v50   ;;  %v2173_v34 = vld [vmem:[%s10437_s2 + $0x118] sm:$0xff]  ;;  %v2172_v49 = vld [vmem:[%s10437_s2 + $0x110] sm:$0xff] }
 0x1e9   :  { %v7614_v18 = vpop.permute.xlu1 %1561  ;;  %v7616_v1 = vpop.permute.xlu0 %1556 }
 0x1ea   :  { %10751 = vst [vmem:[#allocation141_spill] sm:$0xff] %v7614_v18  ;;  %10752 = vst [vmem:[#allocation142_spill] sm:$0xff] %v7616_v1  ;;  %2517 = vperm.xlu1 %6321, %v2171_v2   ;;  %2512 = vperm.xlu0 %6320, %v2170_v17   ;;  %v2175_v18 = vld [vmem:[%s10437_s2 + $0x128] sm:$0xff]  ;;  %v6324_v2 = vld [vmem:[%s10438_s3 + $0x4] ss:$56 sps:$4 sm:$0xff]  }
 0x1eb   :  { %v2174_v17 = vld [vmem:[%s10437_s2 + $0x120] sm:$0xff]  ;;  %5191 = vmatprep.mubr.bf16.mxu1 %v6324_v2  ;;  %v2179_v2 = vld [vmem:[%s10437_s2 + $0x148] sm:$0xff] }
 0x1ed   :  { %v7624_v50 = vpop.permute.xlu1 %1571  ;;  %v7626_v33 = vpop.permute.xlu0 %1566 }
 0x1ee   :  { %10753 = vst [vmem:[#allocation143_spill] sm:$0xff] %v7624_v50  ;;  %10754 = vst [vmem:[#allocation144_spill] sm:$0xff] %v7626_v33  ;;  %2527 = vperm.xlu1 %6321, %v2173_v34   ;;  %2522 = vperm.xlu0 %6320, %v2172_v49   ;;  %v2177_v34 = vld [vmem:[%s10437_s2 + $0x138] sm:$0xff]  ;;  %v2176_v49 = vld [vmem:[%s10437_s2 + $0x130] sm:$0xff] }
 0x1f1   :  { %v7637_v1 = vpop.permute.xlu1 %1581  ;;  %v7639_v50 = vpop.permute.xlu0 %1576 }
 0x1f2   :  { %10755 = vst [vmem:[#allocation145_spill] sm:$0xff] %v7637_v1  ;;  %10756 = vst [vmem:[#allocation146_spill] sm:$0xff] %v7639_v50  ;;  %2537 = vperm.xlu1 %6321, %v2175_v18   ;;  %2532 = vperm.xlu0 %6320, %v2174_v17   ;;  %v2178_v18 = vld [vmem:[%s10437_s2 + $0x140] sm:$0xff]  ;;  %v2181_v17 = vld [vmem:[%s10437_s2 + $0x158] sm:$0xff] }
 0x1f5   :  { %v7647_v33 = vpop.permute.xlu1 %1591  ;;  %v7649_v58 = vpop.permute.xlu0 %1586 }
 0x1f6   :  { %10757 = vst [vmem:[#allocation147_spill] sm:$0xff] %v7647_v33  ;;  %10758 = vst [vmem:[#allocation148_spill] sm:$0xff] %v7649_v58  ;;  %2547 = vperm.xlu1 %6321, %v2177_v34   ;;  %2542 = vperm.xlu0 %6320, %v2176_v49   ;;  %v2180_v34 = vld [vmem:[%s10437_s2 + $0x150] sm:$0xff] }
 0x1f9   :  { %v7657_v50 = vpop.permute.xlu1 %1601  ;;  %v7659_v1 = vpop.permute.xlu0 %1596 }
 0x1fa   :  { %10759 = vst [vmem:[#allocation149_spill] sm:$0xff] %v7657_v50  ;;  %10760 = vst [vmem:[#allocation150_spill] sm:$0xff] %v7659_v1  ;;  %2557 = vperm.xlu1 %6321, %v2179_v2   ;;  %2552 = vperm.xlu0 %6320, %v2178_v18   ;;  %v2183_v1 = vld [vmem:[%s10437_s2 + $0x168] sm:$0xff]  ;;  %v2182_v2 = vld [vmem:[%s10437_s2 + $0x160] sm:$0xff] }
 0x1fb   :  { %v2185_v18 = vld [vmem:[%s10437_s2 + $0x178] sm:$0xff] }
 0x1fd   :  { %v7667_v49 = vpop.permute.xlu1 %1611  ;;  %v7669_v58 = vpop.permute.xlu0 %1606 }
 0x1fe   :  { %10761 = vst [vmem:[#allocation151_spill] sm:$0xff] %v7667_v49  ;;  %10762 = vst [vmem:[#allocation152_spill] sm:$0xff] %v7669_v58  ;;  %2567 = vperm.xlu1 %6321, %v2181_v17   ;;  %2562 = vperm.xlu0 %6320, %v2180_v34   ;;  %v2184_v17 = vld [vmem:[%s10437_s2 + $0x170] sm:$0xff] }
 0x201   :  { %v7677_v50 = vpop.permute.xlu1 %1621  ;;  %v7679_v33 = vpop.permute.xlu0 %1616 }
 0x202   :  { %10763 = vst [vmem:[#allocation153_spill] sm:$0xff] %v7677_v50  ;;  %10764 = vst [vmem:[#allocation154_spill] sm:$0xff] %v7679_v33  ;;  %2577 = vperm.xlu1 %6321, %v2183_v1   ;;  %2572 = vperm.xlu0 %6320, %v2182_v2   ;;  %v2187_v33 = vld [vmem:[%s10437_s2 + $0x188] sm:$0xff]  ;;  %v2186_v1 = vld [vmem:[%s10437_s2 + $0x180] sm:$0xff] }
 0x203   :  { %v2189_v2 = vld [vmem:[%s10437_s2 + $0x198] sm:$0xff] }
 0x205   :  { %v7687_v34 = vpop.permute.xlu1 %1631  ;;  %v7689_v58 = vpop.permute.xlu0 %1626 }
 0x206   :  { %10765 = vst [vmem:[#allocation155_spill] sm:$0xff] %v7687_v34  ;;  %10766 = vst [vmem:[#allocation156_spill] sm:$0xff] %v7689_v58  ;;  %2587 = vperm.xlu1 %6321, %v2185_v18   ;;  %2582 = vperm.xlu0 %6320, %v2184_v17   ;;  %v2188_v18 = vld [vmem:[%s10437_s2 + $0x190] sm:$0xff] }
 0x209   :  { %v7697_v50 = vpop.permute.xlu1 %1641  ;;  %v7699_v49 = vpop.permute.xlu0 %1636 }
 0x20a   :  { %10767 = vst [vmem:[#allocation157_spill] sm:$0xff] %v7697_v50  ;;  %10768 = vst [vmem:[#allocation158_spill] sm:$0xff] %v7699_v49  ;;  %2597 = vperm.xlu1 %6321, %v2187_v33   ;;  %2592 = vperm.xlu0 %6320, %v2186_v1   ;;  %v2191_v49 = vld [vmem:[%s10437_s2 + $0x1a8] sm:$0xff]  ;;  %v2190_v33 = vld [vmem:[%s10437_s2 + $0x1a0] sm:$0xff] }
 0x20b   :  { %v2193_v1 = vld [vmem:[%s10437_s2 + $0x1b8] sm:$0xff] }
 0x20d   :  { %v7707_v17 = vpop.permute.xlu1 %1651  ;;  %v7709_v58 = vpop.permute.xlu0 %1646 }
 0x20e   :  { %10769 = vst [vmem:[#allocation159_spill] sm:$0xff] %v7707_v17  ;;  %10770 = vst [vmem:[#allocation160_spill] sm:$0xff] %v7709_v58  ;;  %2607 = vperm.xlu1 %6321, %v2189_v2   ;;  %2602 = vperm.xlu0 %6320, %v2188_v18   ;;  %v2192_v2 = vld [vmem:[%s10437_s2 + $0x1b0] sm:$0xff] }
 0x211   :  { %v7717_v50 = vpop.permute.xlu1 %1661  ;;  %v7719_v34 = vpop.permute.xlu0 %1656 }
 0x212   :  { %10771 = vst [vmem:[#allocation161_spill] sm:$0xff] %v7717_v50  ;;  %10772 = vst [vmem:[#allocation162_spill] sm:$0xff] %v7719_v34  ;;  %2617 = vperm.xlu1 %6321, %v2191_v49   ;;  %2612 = vperm.xlu0 %6320, %v2190_v33   ;;  %v2195_v34 = vld [vmem:[%s10437_s2 + $0x1c8] sm:$0xff]  ;;  %v2194_v49 = vld [vmem:[%s10437_s2 + $0x1c0] sm:$0xff] }
 0x213   :  { %v2197_v33 = vld [vmem:[%s10437_s2 + $0x1d8] sm:$0xff] }
 0x215   :  { %v7727_v18 = vpop.permute.xlu1 %1671  ;;  %v7729_v58 = vpop.permute.xlu0 %1666 }
 0x216   :  { %10773 = vst [vmem:[#allocation163_spill] sm:$0xff] %v7727_v18  ;;  %10774 = vst [vmem:[#allocation164_spill] sm:$0xff] %v7729_v58  ;;  %2627 = vperm.xlu1 %6321, %v2193_v1   ;;  %2622 = vperm.xlu0 %6320, %v2192_v2   ;;  %v2196_v1 = vld [vmem:[%s10437_s2 + $0x1d0] sm:$0xff] }
 0x219   :  { %v7737_v50 = vpop.permute.xlu1 %1681  ;;  %v7739_v17 = vpop.permute.xlu0 %1676 }
 0x21a   :  { %10775 = vst [vmem:[#allocation165_spill] sm:$0xff] %v7737_v50  ;;  %10776 = vst [vmem:[#allocation166_spill] sm:$0xff] %v7739_v17  ;;  %2637 = vperm.xlu1 %6321, %v2195_v34   ;;  %2632 = vperm.xlu0 %6320, %v2194_v49   ;;  %v2199_v17 = vld [vmem:[%s10437_s2 + $0x1e8] sm:$0xff]  ;;  %v2198_v34 = vld [vmem:[%s10437_s2 + $0x1e0] sm:$0xff] }
 0x21b   :  { %v2201_v49 = vld [vmem:[%s10437_s2 + $0x1f8] sm:$0xff] }
 0x21d   :  { %v7747_v2 = vpop.permute.xlu1 %1691  ;;  %v7749_v58 = vpop.permute.xlu0 %1686 }
 0x21e   :  { %10777 = vst [vmem:[#allocation167_spill] sm:$0xff] %v7747_v2  ;;  %10778 = vst [vmem:[#allocation168_spill] sm:$0xff] %v7749_v58  ;;  %2647 = vperm.xlu1 %6321, %v2197_v33   ;;  %2642 = vperm.xlu0 %6320, %v2196_v1   ;;  %v2200_v33 = vld [vmem:[%s10437_s2 + $0x1f0] sm:$0xff]  ;;  %v2203_v2 = vld [vmem:[%s10437_s2 + $0x208] sm:$0xff] }
 0x21f   :  { %v20_v1 = vld [vmem:[%s10439_s0 + $0x10] sm:$0xff] }
 0x220   :  { %v1716_v57 = vmul.f32 %v6726_v8, %v20_v1 }
 0x221   :  { %v7757_v50 = vpop.permute.xlu1 %1701  ;;  %v7759_v18 = vpop.permute.xlu0 %1696 }
 0x222   :  { %10779 = vst [vmem:[#allocation169_spill] sm:$0xff] %v7757_v50  ;;  %10780 = vst [vmem:[#allocation170_spill] sm:$0xff] %v7759_v18  ;;  %2657 = vperm.xlu1 %6321, %v2199_v17   ;;  %2652 = vperm.xlu0 %6320, %v2198_v34   ;;  %v21_v50 = vld [vmem:[%s10439_s0 + $0x18] sm:$0xff]  ;;  %v18_v17 = vld [vmem:[%s10439_s0] sm:$0xff] }
 0x223   :  { %v19_v34 = vld [vmem:[%s10439_s0 + $0x8] sm:$0xff]  ;;  %v1714_v41 = vmul.f32 %v6716_v4, %v18_v17 }
 0x224   :  { %v1715_v26 = vmul.f32 %v6716_v4, %v19_v34 }
 0x225   :  { %v7773_v58 = vpop.permute.xlu1 %1711  ;;  %v7781_v18 = vpop.permute.xlu0 %1706 }
 0x226   :  { %10781 = vst [vmem:[#allocation171_spill] sm:$0xff] %v7773_v58  ;;  %10782 = vst [vmem:[#allocation172_spill] sm:$0xff] %v7781_v18  ;;  %2667 = vperm.xlu1 %6321, %v2201_v49   ;;  %2662 = vperm.xlu0 %6320, %v2200_v33   ;;  %v1717_v58 = vmul.f32 %v6726_v8, %v21_v50  ;;  %v24_v49 = vld [vmem:[%s10439_s0 + $0x30] sm:$0xff]  ;;  %v25_v33 = vld [vmem:[%s10439_s0 + $0x38] sm:$0xff] }
 0x227   :  { %v22_v8 = vld [vmem:[%s10439_s0 + $0x20] sm:$0xff]  ;;  %v23_v50 = vld [vmem:[%s10439_s0 + $0x28] sm:$0xff]  ;;  %v1720_v9 = vmul.f32 %v6724_v7, %v24_v49  ;;  %v1721_v62 = vmul.f32 %v6724_v7, %v25_v33 }
 0x228   :  { %v26_v49 = vld [vmem:[%s10439_s0 + $0x40] sm:$0xff]  ;;  %v27_v33 = vld [vmem:[%s10439_s0 + $0x48] sm:$0xff] }
 0x229   :  { %v2358_v18 = vpop.permute.xlu1 %2357  ;;  %v2353_v17 = vpop.permute.xlu0 %2352 }
 0x22a   :  { %v3412_v1 = vadd.f32 %v2358_v18, %v1716_v57  ;;  %2677 = vperm.xlu1 %6321, %v2203_v2   ;;  %v3413_v4 = vadd.f32 %v2358_v18, %v1717_v58  ;;  %v3410_v34 = vadd.f32 %v2353_v17, %v1714_v41  ;;  %2672 = vperm.xlu0 %6320, %v2202_v42   ;;  %v28_v42 = vld [vmem:[%s10439_s0 + $0x50] sm:$0xff] }
 0x22b   :  { %v3411_v10 = vadd.f32 %v2353_v17, %v1715_v26  ;;  %v1718_v2 = vmul.f32 %v6714_v3, %v22_v8  ;;  %v1719_v41 = vmul.f32 %v6714_v3, %v23_v50  ;;  %v29_v26 = vld [vmem:[%s10439_s0 + $0x58] sm:$0xff] }
 0x22c   :  { %v3837_v54 = vmax.f32 %v3413_v4, 0.0  ;;  %v3836_v57 = vmax.f32 %v3412_v1, 0.0  ;;  %v3834_v18 = vmax.f32 %v3410_v34, 0.0  ;;  %v1724_v34 = vmul.f32 %v6734_v11, %v28_v42 }
 0x22d   :  { %v2368_v58 = vpop.permute.xlu1 %2367  ;;  %v3835_v7 = vmax.f32 %v3411_v10, 0.0  ;;  %v2363_v50 = vpop.permute.xlu0 %2362  ;;  %v2207_v10 = vld [vmem:[%s10437_s2 + $0x228] sm:$0xff]  ;;  %v1725_v46 = vmul.f32 %v6734_v11, %v29_v26 }
 0x22e   :  { %v3416_v3 = vadd.f32 %v2368_v58, %v1720_v9  ;;  %v3417_v8 = vadd.f32 %v2368_v58, %v1721_v62  ;;  %2687 = vperm.xlu1 %6321, %v2205_v25   ;;  %v3414_v1 = vadd.f32 %v2363_v50, %v1718_v2  ;;  %v3415_v17 = vadd.f32 %v2363_v50, %v1719_v41  ;;  %v2206_v62 = vld [vmem:[%s10437_s2 + $0x220] sm:$0xff]  ;;  %v33_v25 = vld [vmem:[%s10439_s0 + $0x78] sm:$0xff] }
 0x22f   :  { %2682 = vperm.xlu0 %6320, %v2204_v61   ;;  %v4371_v4 = vpack.c.bf16 %v3837_v54, %v3835_v7  ;;  %v4370_v53 = vpack.c.bf16 %v3836_v57, %v3834_v18  ;;  %v1722_v9 = vmul.f32 %v6736_v12, %v26_v49  ;;  %v1723_v61 = vmul.f32 %v6736_v12, %v27_v33  ;;  %v32_v54 = vld [vmem:[%s10439_s0 + $0x70] sm:$0xff]  ;;  %v30_v41 = vld [vmem:[%s10439_s0 + $0x60] sm:$0xff]  ;;  %v31_v12 = vld [vmem:[%s10439_s0 + $0x68] sm:$0xff] }
 0x230   :  { %v3840_v45 = vmax.f32 %v3416_v3, 0.0  ;;  %v3841_v38 = vmax.f32 %v3417_v8, 0.0  ;;  %v3838_v57 = vmax.f32 %v3414_v1, 0.0  ;;  %v3839_v11 = vmax.f32 %v3415_v17, 0.0  ;;  %v2235_v3 = vld [vmem:[%s10437_s2 + $0x308] sm:$0xff] }
 0x231   :  { %5159 = vmatprep.subr.bf16.mxu1 %v4371_v4  ;;  %v2378_v2 = vpop.permute.xlu1 %2377  ;;  %v2373_v58 = vpop.permute.xlu0 %2372  ;;  %v1728_v8 = vmul.f32 %v6744_v15, %v32_v54  ;;  %v1729_v50 = vmul.f32 %v6744_v15, %v33_v25  ;;  %v1727_v4 = vmul.f32 %v6746_v16, %v31_v12 }
 0x232   :  { %v3420_v42 = vadd.f32 %v2378_v2, %v1724_v34  ;;  %v3421_v26 = vadd.f32 %v2378_v2, %v1725_v46  ;;  %5160 = vmatpush1.bf16.msra.mxu1 %v4370_v53  ;;  %2697 = vperm.xlu1 %6321, %v2207_v10   ;;  %v3418_v7 = vadd.f32 %v2373_v58, %v1722_v9  ;;  %v2234_v46 = vld [vmem:[%s10437_s2 + $0x300] sm:$0xff] }
 0x233   :  { %v3419_v18 = vadd.f32 %v2373_v58, %v1723_v61  ;;  %2692 = vperm.xlu0 %6320, %v2206_v62   ;;  %v4373_v49 = vpack.c.bf16 %v3841_v38, %v3839_v11  ;;  %v4372_v33 = vpack.c.bf16 %v3840_v45, %v3838_v57  ;;  %v1726_v53 = vmul.f32 %v6746_v16, %v30_v41  ;;  %v36_v38 = vld [vmem:[%s10439_s0 + $0x90] sm:$0xff]  ;;  %v37_v45 = vld [vmem:[%s10439_s0 + $0x98] sm:$0xff]  ;;  %v34_v62 = vld [vmem:[%s10439_s0 + $0x80] sm:$0xff] }
 0x234   :  { %v3844_v1 = vmax.f32 %v3420_v42, 0.0  ;;  %v3845_v17 = vmax.f32 %v3421_v26, 0.0  ;;  %v3842_v10 = vmax.f32 %v3418_v7, 0.0  ;;  %v35_v16 = vld [vmem:[%s10439_s0 + $0x88] sm:$0xff]  ;;  %v2237_v41 = vld [vmem:[%s10437_s2 + $0x318] sm:$0xff]  ;;  %v1732_v12 = vmul.f32 %v6754_v19, %v36_v38  ;;  %v2236_v7 = vld [vmem:[%s10437_s2 + $0x310] sm:$0xff] }
 0x235   :  { %v3843_v15 = vmax.f32 %v3419_v18, 0.0  ;;  %5161 = vmatprep.subr.bf16.mxu1 %v4373_v49  ;;  %v2388_v34 = vpop.permute.xlu1 %2387  ;;  %v2383_v54 = vpop.permute.xlu0 %2382  ;;  %v1733_v42 = vmul.f32 %v6754_v19, %v37_v45  ;;  %v1730_v18 = vmul.f32 %v6756_v20, %v34_v62  ;;  %v1731_v49 = vmul.f32 %v6756_v20, %v35_v16  ;;  %v39_v20 = vld [vmem:[%s10439_s0 + $0xa8] sm:$0xff] }
 0x236   :  { %v3424_v9 = vadd.f32 %v2388_v34, %v1728_v8  ;;  %v3425_v61 = vadd.f32 %v2388_v34, %v1729_v50  ;;  %5162 = vmatpush1.bf16.msra.mxu1 %v4372_v33  ;;  %2837 = vperm.xlu1 %6321, %v2235_v3   ;;  %v3422_v25 = vadd.f32 %v2383_v54, %v1726_v53  ;;  %v40_v33 = vld [vmem:[%s10439_s0 + $0xb0] sm:$0xff]  ;;  %v41_v3 = vld [vmem:[%s10439_s0 + $0xb8] sm:$0xff] }
 0x237   :  { %v3423_v57 = vadd.f32 %v2383_v54, %v1727_v4  ;;  %2832 = vperm.xlu0 %6320, %v2234_v46   ;;  %v4375_v11 = vpack.c.bf16 %v3845_v17, %v3843_v15  ;;  %v4374_v2 = vpack.c.bf16 %v3844_v1, %v3842_v10  ;;  %v38_v1 = vld [vmem:[%s10439_s0 + $0xa0] sm:$0xff]  ;;  %v2239_v15 = vld [vmem:[%s10437_s2 + $0x328] sm:$0xff]  ;;  %v1736_v34 = vmul.f32 %v6764_v23, %v40_v33 }
 0x238   :  { %v3848_v26 = vmax.f32 %v3424_v9, 0.0  ;;  %v3849_v58 = vmax.f32 %v3425_v61, 0.0  ;;  %v3846_v8 = vmax.f32 %v3422_v25, 0.0  ;;  %v1737_v62 = vmul.f32 %v6764_v23, %v41_v3  ;;  %v2238_v61 = vld [vmem:[%s10437_s2 + $0x320] sm:$0xff]  ;;  %v2241_v3 = vld [vmem:[%s10437_s2 + $0x338] sm:$0xff] }
 0x239   :  { %v3847_v19 = vmax.f32 %v3423_v57, 0.0  ;;  %5163 = vmatprep.subr.bf16.mxu1 %v4375_v11  ;;  %v2398_v50 = vpop.permute.xlu1 %2397  ;;  %v2393_v53 = vpop.permute.xlu0 %2392  ;;  %v1734_v54 = vmul.f32 %v6766_v24, %v38_v1  ;;  %v1735_v25 = vmul.f32 %v6766_v24, %v39_v20  ;;  %v44_v57 = vld [vmem:[%s10439_s0 + $0xd0] sm:$0xff]  ;;  %v45_v11 = vld [vmem:[%s10439_s0 + $0xd8] sm:$0xff]  ;;  %v43_v24 = vld [vmem:[%s10439_s0 + $0xc8] sm:$0xff] }
 0x23a   :  { %v3428_v17 = vadd.f32 %v2398_v50, %v1732_v12  ;;  %v3429_v46 = vadd.f32 %v2398_v50, %v1733_v42  ;;  %5164 = vmatpush1.bf16.msra.mxu1 %v4374_v2  ;;  %2847 = vperm.xlu1 %6321, %v2237_v41   ;;  %v3426_v4 = vadd.f32 %v2393_v53, %v1730_v18  ;;  %v42_v12 = vld [vmem:[%s10439_s0 + $0xc0] sm:$0xff]  ;;  %v2240_v20 = vld [vmem:[%s10437_s2 + $0x330] sm:$0xff] }
 0x23b   :  { %v3427_v38 = vadd.f32 %v2393_v53, %v1731_v49  ;;  %2842 = vperm.xlu0 %6320, %v2236_v7   ;;  %v4377_v45 = vpack.c.bf16 %v3849_v58, %v3847_v19  ;;  %v4376_v10 = vpack.c.bf16 %v3848_v26, %v3846_v8  ;;  %v1740_v8 = vmul.f32 %v6774_v27, %v44_v57  ;;  %v48_v53 = vld [vmem:[%s10439_s0 + $0xf0] sm:$0xff] }
 0x23c   :  { %v3852_v16 = vmax.f32 %v3428_v17, 0.0  ;;  %v3853_v9 = vmax.f32 %v3429_v46, 0.0  ;;  %v3850_v2 = vmax.f32 %v3426_v4, 0.0  ;;  %v1741_v19 = vmul.f32 %v6774_v27, %v45_v11  ;;  %v49_v4 = vld [vmem:[%s10439_s0 + $0xf8] sm:$0xff] }
 0x23d   :  { %v3851_v23 = vmax.f32 %v3427_v38, 0.0  ;;  %5165 = vmatprep.subr.bf16.mxu1 %v4377_v45  ;;  %v2408_v41 = vpop.permute.xlu1 %2407  ;;  %v2403_v58 = vpop.permute.xlu0 %2402  ;;  %v1738_v17 = vmul.f32 %v6776_v28, %v42_v12  ;;  %v1739_v46 = vmul.f32 %v6776_v28, %v43_v24  ;;  %v47_v28 = vld [vmem:[%s10439_s0 + $0xe8] sm:$0xff]  ;;  %v1744_v57 = vmul.f32 %v6784_v31, %v48_v53 }
 0x23e   :  { %v3432_v42 = vadd.f32 %v2408_v41, %v1736_v34  ;;  %v3433_v26 = vadd.f32 %v2408_v41, %v1737_v62  ;;  %5166 = vmatpush1.bf16.msra.mxu1 %v4376_v10  ;;  %2857 = vperm.xlu1 %6321, %v2239_v15   ;;  %v3430_v7 = vadd.f32 %v2403_v58, %v1734_v54  ;;  %v46_v10 = vld [vmem:[%s10439_s0 + $0xe0] sm:$0xff] }
 0x23f   :  { %v3431_v18 = vadd.f32 %v2403_v58, %v1735_v25  ;;  %2852 = vperm.xlu0 %6320, %v2238_v61   ;;  %v4379_v49 = vpack.c.bf16 %v3853_v9, %v3851_v23  ;;  %v4378_v33 = vpack.c.bf16 %v3852_v16, %v3850_v2  ;;  %v2243_v25 = vld [vmem:[%s10437_s2 + $0x348] sm:$0xff]  ;;  %v1745_v11 = vmul.f32 %v6784_v31, %v49_v4  ;;  %v2242_v41 = vld [vmem:[%s10437_s2 + $0x340] sm:$0xff] }
 0x240   :  { %v3856_v50 = vmax.f32 %v3432_v42, 0.0  ;;  %v3857_v1 = vmax.f32 %v3433_v26, 0.0  ;;  %v3854_v38 = vmax.f32 %v3430_v7, 0.0  ;;  %v1742_v12 = vmul.f32 %v6786_v32, %v46_v10  ;;  %v52_v42 = vld [vmem:[%s10439_s0 + $0x110] sm:$0xff]  ;;  %v53_v26 = vld [vmem:[%s10439_s0 + $0x118] sm:$0xff] }
 0x241   :  { %v3855_v27 = vmax.f32 %v3431_v18, 0.0  ;;  %5167 = vmatprep.subr.bf16.mxu1 %v4379_v49  ;;  %v2418_v45 = vpop.permute.xlu1 %2417  ;;  %v2413_v62 = vpop.permute.xlu0 %2412  ;;  %v1743_v24 = vmul.f32 %v6786_v32, %v47_v28  ;;  %v50_v18 = vld [vmem:[%s10439_s0 + $0x100] sm:$0xff]  ;;  %v51_v32 = vld [vmem:[%s10439_s0 + $0x108] sm:$0xff]  ;;  %v56_v10 = vld [vmem:[%s10439_s0 + $0x130] sm:$0xff] }
 0x242   :  { %v3436_v15 = vadd.f32 %v2418_v45, %v1740_v8  ;;  %v3437_v34 = vadd.f32 %v2418_v45, %v1741_v19  ;;  %5168 = vmatpush1.bf16.msra.mxu1 %v4378_v33  ;;  %2867 = vperm.xlu1 %6321, %v2241_v3   ;;  %v3434_v16 = vadd.f32 %v2413_v62, %v1738_v17  ;;  %v57_v28 = vld [vmem:[%s10439_s0 + $0x138] sm:$0xff] }
 0x243   :  { %v3435_v9 = vadd.f32 %v2413_v62, %v1739_v46  ;;  %2862 = vperm.xlu0 %6320, %v2240_v20   ;;  %v4381_v61 = vpack.c.bf16 %v3857_v1, %v3855_v27  ;;  %v4380_v54 = vpack.c.bf16 %v3856_v50, %v3854_v38  ;;  %v2245_v20 = vld [vmem:[%s10437_s2 + $0x358] sm:$0xff]  ;;  %v1748_v17 = vmul.f32 %v6794_v35, %v52_v42  ;;  %v2244_v38 = vld [vmem:[%s10437_s2 + $0x350] sm:$0xff]  ;;  %v54_v62 = vld [vmem:[%s10439_s0 + $0x120] sm:$0xff] }
 0x244   :  { %v3860_v2 = vmax.f32 %v3436_v15, 0.0  ;;  %v3861_v23 = vmax.f32 %v3437_v34, 0.0  ;;  %v3858_v58 = vmax.f32 %v3434_v16, 0.0  ;;  %v1749_v46 = vmul.f32 %v6794_v35, %v53_v26  ;;  %v2246_v42 = vld [vmem:[%s10437_s2 + $0x360] sm:$0xff] }
 0x245   :  { %v3859_v31 = vmax.f32 %v3435_v9, 0.0  ;;  %5169 = vmatprep.subr.bf16.mxu1 %v4381_v61  ;;  %v2428_v7 = vpop.permute.xlu1 %2427  ;;  %v2423_v3 = vpop.permute.xlu0 %2422  ;;  %v1746_v27 = vmul.f32 %v6796_v36, %v50_v18  ;;  %v1747_v45 = vmul.f32 %v6796_v36, %v51_v32  ;;  %v55_v36 = vld [vmem:[%s10439_s0 + $0x128] sm:$0xff]  ;;  %v1750_v26 = vmul.f32 %v6806_v40, %v54_v62  ;;  %v62_v62 = vld [vmem:[%s10439_s0 + $0x160] sm:$0xff] }
 0x246   :  { %v3440_v49 = vadd.f32 %v2428_v7, %v1744_v57  ;;  %v3441_v33 = vadd.f32 %v2428_v7, %v1745_v11  ;;  %5170 = vmatpush1.bf16.msra.mxu1 %v4380_v54  ;;  %2877 = vperm.xlu1 %6321, %v2243_v25   ;;  %v3438_v8 = vadd.f32 %v2423_v3, %v1742_v12  ;;  %v61_v7 = vld [vmem:[%s10439_s0 + $0x158] sm:$0xff] }
 0x247   :  { %v3439_v19 = vadd.f32 %v2423_v3, %v1743_v24  ;;  %2872 = vperm.xlu0 %6320, %v2242_v41   ;;  %v4383_v50 = vpack.c.bf16 %v3861_v23, %v3859_v31  ;;  %v4382_v1 = vpack.c.bf16 %v3860_v2, %v3858_v58  ;;  %v2247_v2 = vld [vmem:[%s10437_s2 + $0x368] sm:$0xff]  ;;  %v1752_v23 = vmul.f32 %v6804_v39, %v56_v10  ;;  %v60_v31 = vld [vmem:[%s10439_s0 + $0x150] sm:$0xff] }
 0x248   :  { %v3864_v53 = vmax.f32 %v3440_v49, 0.0  ;;  %v3865_v4 = vmax.f32 %v3441_v33, 0.0  ;;  %v3862_v15 = vmax.f32 %v3438_v8, 0.0  ;;  %v1753_v41 = vmul.f32 %v6804_v39, %v57_v28  ;;  %v58_v49 = vld [vmem:[%s10439_s0 + $0x140] sm:$0xff]  ;;  %v64_v28 = vld [vmem:[%s10439_s0 + $0x170] sm:$0xff] }
 0x249   :  { %v3863_v35 = vmax.f32 %v3439_v19, 0.0  ;;  %5171 = vmatprep.subr.bf16.mxu1 %v4383_v50  ;;  %v2438_v34 = vpop.permute.xlu1 %2437  ;;  %v2433_v61 = vpop.permute.xlu0 %2432  ;;  %v1751_v58 = vmul.f32 %v6806_v40, %v55_v36  ;;  %v59_v40 = vld [vmem:[%s10439_s0 + $0x148] sm:$0xff] }
 0x24a   :  { %v3444_v16 = vadd.f32 %v2438_v34, %v1748_v17  ;;  %v3445_v9 = vadd.f32 %v2438_v34, %v1749_v46  ;;  %5172 = vmatpush1.bf16.msra.mxu1 %v4382_v1  ;;  %2887 = vperm.xlu1 %6321, %v2245_v20   ;;  %v3442_v54 = vadd.f32 %v2433_v61, %v1746_v27  ;;  %v2249_v17 = vld [vmem:[%s10437_s2 + $0x378] sm:$0xff]  ;;  %v2248_v27 = vld [vmem:[%s10437_s2 + $0x370] sm:$0xff] }
 0x24b   :  { %v3443_v25 = vadd.f32 %v2433_v61, %v1747_v45  ;;  %2882 = vperm.xlu0 %6320, %v2244_v38   ;;  %v4385_v57 = vpack.c.bf16 %v3865_v4, %v3863_v35  ;;  %v4384_v11 = vpack.c.bf16 %v3864_v53, %v3862_v15  ;;  %v1756_v46 = vmul.f32 %v6814_v43, %v60_v31  ;;  %v65_v15 = vld [vmem:[%s10439_s0 + $0x178] sm:$0xff] }
 0x24c   :  { %v3868_v12 = vmax.f32 %v3444_v16, 0.0  ;;  %v3869_v24 = vmax.f32 %v3445_v9, 0.0  ;;  %v3866_v18 = vmax.f32 %v3442_v54, 0.0  ;;  %v1757_v53 = vmul.f32 %v6814_v43, %v61_v7  ;;  %v69_v31 = vld [vmem:[%s10439_s0 + $0x198] sm:$0xff] }
 0x24d   :  { %v3867_v39 = vmax.f32 %v3443_v25, 0.0  ;;  %5173 = vmatprep.subr.bf16.mxu1 %v4385_v57  ;;  %v2448_v32 = vpop.permute.xlu1 %2447  ;;  %v2443_v8 = vpop.permute.xlu0 %2442  ;;  %v1754_v45 = vmul.f32 %v6816_v44, %v58_v49  ;;  %v1755_v10 = vmul.f32 %v6816_v44, %v59_v40  ;;  %v63_v44 = vld [vmem:[%s10439_s0 + $0x168] sm:$0xff] }
 0x24e   :  { %v3448_v33 = vadd.f32 %v2448_v32, %v1752_v23  ;;  %v3449_v3 = vadd.f32 %v2448_v32, %v1753_v41  ;;  %5174 = vmatpush1.bf16.msra.mxu1 %v4384_v11  ;;  %2897 = vperm.xlu1 %6321, %v2247_v2   ;;  %v3446_v19 = vadd.f32 %v2443_v8, %v1750_v26  ;;  %v2251_v11 = vld [vmem:[%s10437_s2 + $0x388] sm:$0xff] }
 0x24f   :  { %v3447_v50 = vadd.f32 %v2443_v8, %v1751_v58  ;;  %2892 = vperm.xlu0 %6320, %v2246_v42   ;;  %v4387_v1 = vpack.c.bf16 %v3869_v24, %v3867_v39  ;;  %v4386_v20 = vpack.c.bf16 %v3868_v12, %v3866_v18  ;;  %v1760_v2 = vmul.f32 %v6824_v47, %v64_v28  ;;  %v2250_v24 = vld [vmem:[%s10437_s2 + $0x380] sm:$0xff]  ;;  %v68_v58 = vld [vmem:[%s10439_s0 + $0x190] sm:$0xff] }
 0x250   :  { %v3872_v4 = vmax.f32 %v3448_v33, 0.0  ;;  %v3873_v38 = vmax.f32 %v3449_v3, 0.0  ;;  %v3870_v35 = vmax.f32 %v3446_v19, 0.0  ;;  %v1761_v23 = vmul.f32 %v6824_v47, %v65_v15  ;;  %v66_v39 = vld [vmem:[%s10439_s0 + $0x180] sm:$0xff] }
 0x251   :  { %v3871_v43 = vmax.f32 %v3447_v50, 0.0  ;;  %5175 = vmatprep.subr.bf16.mxu1 %v4387_v1  ;;  %v2458_v34 = vpop.permute.xlu1 %2457  ;;  %v2453_v9 = vpop.permute.xlu0 %2452  ;;  %v1758_v42 = vmul.f32 %v6826_v48, %v62_v62  ;;  %v1759_v26 = vmul.f32 %v6826_v48, %v63_v44  ;;  %v67_v48 = vld [vmem:[%s10439_s0 + $0x188] sm:$0xff]  ;;  %v2253_v50 = vld [vmem:[%s10437_s2 + $0x398] sm:$0xff]  ;;  %v1764_v1 = vmul.f32 %v6834_v51, %v68_v58  ;;  %v70_v15 = vld [vmem:[%s10439_s0 + $0x1a0] sm:$0xff] }
 0x252   :  { %v3452_v36 = vadd.f32 %v2458_v34, %v1756_v46  ;;  %v3453_v16 = vadd.f32 %v2458_v34, %v1757_v53  ;;  %5176 = vmatpush1.bf16.msra.mxu1 %v4386_v20  ;;  %2907 = vperm.xlu1 %6321, %v2249_v17   ;;  %v3450_v61 = vadd.f32 %v2453_v9, %v1754_v45  ;;  %v2252_v53 = vld [vmem:[%s10437_s2 + $0x390] sm:$0xff]  ;;  %v73_v45 = vld [vmem:[%s10439_s0 + $0x1b8] sm:$0xff] }
 0x253   :  { %v3451_v54 = vadd.f32 %v2453_v9, %v1755_v10  ;;  %2902 = vperm.xlu0 %6320, %v2248_v27   ;;  %v4389_v25 = vpack.c.bf16 %v3873_v38, %v3871_v43  ;;  %v4388_v57 = vpack.c.bf16 %v3872_v4, %v3870_v35  ;;  %v1765_v20 = vmul.f32 %v6834_v51, %v69_v31  ;;  %v72_v27 = vld [vmem:[%s10439_s0 + $0x1b0] sm:$0xff]  ;;  %v2255_v9 = vld [vmem:[%s10437_s2 + $0x3a8] sm:$0xff] }
 0x254   :  { %v3876_v41 = vmax.f32 %v3452_v36, 0.0  ;;  %v3877_v12 = vmax.f32 %v3453_v16, 0.0  ;;  %v3874_v7 = vmax.f32 %v3450_v61, 0.0  ;;  %v1762_v4 = vmul.f32 %v6836_v52, %v66_v39 }
 0x255   :  { %v3875_v47 = vmax.f32 %v3451_v54, 0.0  ;;  %5177 = vmatprep.subr.bf16.mxu1 %v4389_v25  ;;  %v2468_v18 = vpop.permute.xlu1 %2467  ;;  %v2463_v40 = vpop.permute.xlu0 %2462  ;;  %v1763_v38 = vmul.f32 %v6836_v52, %v67_v48  ;;  %v71_v52 = vld [vmem:[%s10439_s0 + $0x1a8] sm:$0xff]  ;;  %v1768_v61 = vmul.f32 %v6844_v55, %v72_v27  ;;  %v1769_v54 = vmul.f32 %v6844_v55, %v73_v45 }
 0x256   :  { %v3456_v32 = vadd.f32 %v2468_v18, %v1760_v2  ;;  %v3457_v49 = vadd.f32 %v2468_v18, %v1761_v23  ;;  %5178 = vmatpush1.bf16.msra.mxu1 %v4388_v57  ;;  %2917 = vperm.xlu1 %6321, %v2251_v11   ;;  %v3454_v33 = vadd.f32 %v2463_v40, %v1758_v42  ;;  %v2254_v11 = vld [vmem:[%s10437_s2 + $0x3a0] sm:$0xff] }
 0x257   :  { %v3455_v3 = vadd.f32 %v2463_v40, %v1759_v26  ;;  %2912 = vperm.xlu0 %6320, %v2250_v24   ;;  %v4391_v8 = vpack.c.bf16 %v3877_v12, %v3875_v47  ;;  %v4390_v19 = vpack.c.bf16 %v3876_v41, %v3874_v7  ;;  %v1766_v2 = vmul.f32 %v6846_v56, %v70_v15  ;;  %v76_v41 = vld [vmem:[%s10439_s0 + $0x1d0] sm:$0xff]  ;;  %v77_v12 = vld [vmem:[%s10439_s0 + $0x1d8] sm:$0xff]  ;;  %v74_v26 = vld [vmem:[%s10439_s0 + $0x1c0] sm:$0xff] }
 0x258   :  { %v3880_v17 = vmax.f32 %v3456_v32, 0.0  ;;  %v3881_v46 = vmax.f32 %v3457_v49, 0.0  ;;  %v3878_v10 = vmax.f32 %v3454_v33, 0.0  ;;  %v1767_v23 = vmul.f32 %v6846_v56, %v71_v52  ;;  %v75_v56 = vld [vmem:[%s10439_s0 + $0x1c8] sm:$0xff]  ;;  %v2257_v32 = vld [vmem:[%s10437_s2 + $0x3b8] sm:$0xff] }
 0x259   :  { %v3879_v51 = vmax.f32 %v3455_v3, 0.0  ;;  %5179 = vmatprep.subr.bf16.mxu1 %v4391_v8  ;;  %v2478_v28 = vpop.permute.xlu1 %2477  ;;  %v2473_v34 = vpop.permute.xlu0 %2472  ;;  %v1772_v49 = vmul.f32 %v6854_v59, %v76_v41  ;;  %v1773_v40 = vmul.f32 %v6854_v59, %v77_v12  ;;  %v2256_v8 = vld [vmem:[%s10437_s2 + $0x3b0] sm:$0xff]  ;;  %v2259_v15 = vld [vmem:[%s10437_s2 + $0x3c8] sm:$0xff] }
 0x25a   :  { %v3460_v35 = vadd.f32 %v2478_v28, %v1764_v1  ;;  %v3461_v43 = vadd.f32 %v2478_v28, %v1765_v20  ;;  %5180 = vmatpush1.bf16.msra.mxu1 %v4390_v19  ;;  %2927 = vperm.xlu1 %6321, %v2253_v50   ;;  %v3458_v62 = vadd.f32 %v2473_v34, %v1762_v4  ;;  %v80_v1 = vld [vmem:[%s10439_s0 + $0x1f0] sm:$0xff]  ;;  %v81_v20 = vld [vmem:[%s10439_s0 + $0x1f8] sm:$0xff] }
 0x25b   :  { %v3459_v44 = vadd.f32 %v2473_v34, %v1763_v38  ;;  %2922 = vperm.xlu0 %6320, %v2252_v53   ;;  %v4393_v36 = vpack.c.bf16 %v3881_v46, %v3879_v51  ;;  %v4392_v16 = vpack.c.bf16 %v3880_v17, %v3878_v10  ;;  %v1770_v19 = vmul.f32 %v6856_v60, %v74_v26  ;;  %v78_v53 = vld [vmem:[%s10439_s0 + $0x1e0] sm:$0xff] }
 0x25c   :  { %v3884_v25 = vmax.f32 %v3460_v35, 0.0  ;;  %v3885_v57 = vmax.f32 %v3461_v43, 0.0  ;;  %v3882_v24 = vmax.f32 %v3458_v62, 0.0  ;;  %v1771_v50 = vmul.f32 %v6856_v60, %v75_v56  ;;  %v79_v60 = vld [vmem:[%s10439_s0 + $0x1e8] sm:$0xff]  ;;  %v2258_v62 = vld [vmem:[%s10437_s2 + $0x3c0] sm:$0xff] }
 0x25d   :  { %v3883_v55 = vmax.f32 %v3459_v44, 0.0  ;;  %5181 = vmatprep.subr.bf16.mxu1 %v4393_v36  ;;  %v2488_v42 = vpop.permute.xlu1 %2487  ;;  %v2483_v7 = vpop.permute.xlu0 %2482  ;;  %v1776_v52 = vmul.f32 %v6864_v63, %v80_v1  ;;  %v1777_v35 = vmul.f32 %v6864_v63, %v81_v20  ;;  %v1774_v44 = vmul.f32 %v6866_v0, %v78_v53  ;;  %v2263_v20 = vld [vmem:[%s10437_s2 + $0x3e8] sm:$0xff] }
 0x25e   :  { %v3464_v58 = vadd.f32 %v2488_v42, %v1768_v61  ;;  %v3465_v31 = vadd.f32 %v2488_v42, %v1769_v54  ;;  %5182 = vmatpush1.bf16.msra.mxu1 %v4392_v16  ;;  %2937 = vperm.xlu1 %6321, %v2255_v9   ;;  %v3462_v47 = vadd.f32 %v2483_v7, %v1766_v2  ;;  %v84_v16 = vld [vmem:[%s10439_s0 + $0x210] sm:$0xff]  ;;  %v85_v9 = vld [vmem:[%s10439_s0 + $0x218] sm:$0xff] }
 0x25f   :  { %v3463_v18 = vadd.f32 %v2483_v7, %v1767_v23  ;;  %2932 = vperm.xlu0 %6320, %v2254_v11   ;;  %v4395_v39 = vpack.c.bf16 %v3885_v57, %v3883_v55  ;;  %v4394_v48 = vpack.c.bf16 %v3884_v25, %v3882_v24  ;;  %v1775_v36 = vmul.f32 %v6866_v0, %v79_v60  ;;  %v82_v25 = vld [vmem:[%s10439_s0 + $0x200] sm:$0xff]  ;;  %v83_v0 = vld [vmem:[%s10439_s0 + $0x208] sm:$0xff]  ;;  %v2261_v55 = vld [vmem:[%s10437_s2 + $0x3d8] sm:$0xff] }
 0x260   :  { %v3888_v33 = vmax.f32 %v3464_v58, 0.0  ;;  %v3889_v3 = vmax.f32 %v3465_v31, 0.0  ;;  %v3886_v17 = vmax.f32 %v3462_v47, 0.0  ;;  %v1780_v42 = vmul.f32 %v6874_v5, %v84_v16  ;;  %v2260_v31 = vld [vmem:[%s10437_s2 + $0x3d0] sm:$0xff]  ;;  %v2262_v60 = vld [vmem:[%s10437_s2 + $0x3e0] sm:$0xff]  ;;  %v2265_v16 = vld [vmem:[%s10437_s2 + $0x3f8] sm:$0xff] }
 0x261   :  { %v3887_v59 = vmax.f32 %v3463_v18, 0.0  ;;  %5183 = vmatprep.subr.bf16.mxu1 %v4395_v39  ;;  %v2498_v46 = vpop.permute.xlu1 %2497  ;;  %v2493_v27 = vpop.permute.xlu0 %2492  ;;  %v1781_v26 = vmul.f32 %v6874_v5, %v85_v9  ;;  %v1778_v7 = vmul.f32 %v6876_v6, %v82_v25  ;;  %v1779_v47 = vmul.f32 %v6876_v6, %v83_v0  ;;  %v88_v18 = vld [vmem:[%s10439_s0 + $0x230] sm:$0xff]  ;;  %v89_v39 = vld [vmem:[%s10439_s0 + $0x238] sm:$0xff]  ;;  %v87_v6 = vld [vmem:[%s10439_s0 + $0x228] sm:$0xff] }
 0x262   :  { %v3468_v4 = vadd.f32 %v2498_v46, %v1772_v49  ;;  %v3469_v38 = vadd.f32 %v2498_v46, %v1773_v40  ;;  %5184 = vmatpush1.bf16.msra.mxu1 %v4394_v48  ;;  %2947 = vperm.xlu1 %6321, %v2257_v32   ;;  %v3466_v45 = vadd.f32 %v2493_v27, %v1770_v19  ;;  %v86_v49 = vld [vmem:[%s10439_s0 + $0x220] sm:$0xff]  ;;  %v2264_v25 = vld [vmem:[%s10437_s2 + $0x3f0] sm:$0xff] }
 0x263   :  { %v3467_v10 = vadd.f32 %v2493_v27, %v1771_v50  ;;  %2942 = vperm.xlu0 %6320, %v2256_v8   ;;  %v4397_v51 = vpack.c.bf16 %v3889_v3, %v3887_v59  ;;  %v4396_v28 = vpack.c.bf16 %v3888_v33, %v3886_v17  ;;  %v1784_v17 = vmul.f32 %v6884_v13, %v88_v18  ;;  %v92_v27 = vld [vmem:[%s10439_s0 + $0x250] sm:$0xff] }
 0x264   :  { %v3892_v43 = vmax.f32 %v3468_v4, 0.0  ;;  %v3893_v34 = vmax.f32 %v3469_v38, 0.0  ;;  %v3890_v61 = vmax.f32 %v3466_v45, 0.0  ;;  %v1785_v59 = vmul.f32 %v6884_v13, %v89_v39  ;;  %v93_v45 = vld [vmem:[%s10439_s0 + $0x258] sm:$0xff]  ;;  %v6325_v0 = vld [vmem:[%s10438_s3 + $0x74] ss:$56 sps:$4 sm:$0xff]  }
 0x265   :  { %v3891_v63 = vmax.f32 %v3467_v10, 0.0  ;;  %5185 = vmatprep.subr.bf16.mxu1 %v4397_v51  ;;  %v2508_v54 = vpop.permute.xlu1 %2507  ;;  %v2503_v2 = vpop.permute.xlu0 %2502  ;;  %v1782_v4 = vmul.f32 %v6886_v14, %v86_v49  ;;  %v1783_v38 = vmul.f32 %v6886_v14, %v87_v6  ;;  %v90_v14 = vld [vmem:[%s10439_s0 + $0x240] sm:$0xff]  ;;  %v1788_v9 = vmul.f32 %v6894_v21, %v92_v27 }
 0x266   :  { %v3472_v57 = vadd.f32 %v2508_v54, %v1776_v52  ;;  %v3473_v11 = vadd.f32 %v2508_v54, %v1777_v35  ;;  %5186 = vmatpush1.bf16.msra.mxu1 %v4396_v28  ;;  %2957 = vperm.xlu1 %6321, %v2259_v15   ;;  %v3470_v23 = vadd.f32 %v2503_v2, %v1774_v44  ;;  %v6322_v28 = vld [vmem:[%s10438_s3] ss:$56 sps:$4 sm:$0xff]   ;;  %v91_v15 = vld [vmem:[%s10439_s0 + $0x248] sm:$0xff] }
 0x267   :  { %v3471_v41 = vadd.f32 %v2503_v2, %v1775_v36  ;;  %2952 = vperm.xlu0 %6320, %v2258_v62   ;;  %v4399_v12 = vpack.c.bf16 %v3893_v34, %v3891_v63  ;;  %v4398_v24 = vpack.c.bf16 %v3892_v43, %v3890_v61  ;;  %v1789_v61 = vmul.f32 %v6894_v21, %v93_v45  ;;  %v96_v2 = vld [vmem:[%s10439_s0 + $0x270] sm:$0xff]  ;;  %v97_v21 = vld [vmem:[%s10439_s0 + $0x278] sm:$0xff] }
 0x268   :  { %v3896_v56 = vmax.f32 %v3472_v57, 0.0  ;;  %v3897_v58 = vmax.f32 %v3473_v11, 0.0  ;;  %v3894_v48 = vmax.f32 %v3470_v23, 0.0  ;;  %v1786_v57 = vmul.f32 %v6896_v22, %v90_v14 }
 0x269   :  { %v3895_v5 = vmax.f32 %v3471_v41, 0.0  ;;  %5187 = vmatprep.subr.bf16.mxu1 %v4399_v12  ;;  %v2518_v32 = vpop.permute.xlu1 %2517  ;;  %v2513_v3 = vpop.permute.xlu0 %2512  ;;  %v1787_v11 = vmul.f32 %v6896_v22, %v91_v15  ;;  %v95_v22 = vld [vmem:[%s10439_s0 + $0x268] sm:$0xff]  ;;  %v1792_v18 = vmul.f32 %v6904_v29, %v96_v2  ;;  %v1793_v39 = vmul.f32 %v6904_v29, %v97_v21 }
 0x26a   :  { %v3476_v40 = vadd.f32 %v2518_v32, %v1780_v42  ;;  %v3477_v33 = vadd.f32 %v2518_v32, %v1781_v26  ;;  %5188 = vmatpush1.bf16.msra.mxu1 %v4398_v24  ;;  %2967 = vperm.xlu1 %6321, %v2261_v55   ;;  %v3474_v8 = vadd.f32 %v2513_v3, %v1778_v7  ;;  %v94_v24 = vld [vmem:[%s10439_s0 + $0x260] sm:$0xff] }
 0x26b   :  { %v3475_v19 = vadd.f32 %v2513_v3, %v1779_v47  ;;  %2962 = vperm.xlu0 %6320, %v2260_v31   ;;  %v4401_v50 = vpack.c.bf16 %v3897_v58, %v3895_v5  ;;  %v4400_v1 = vpack.c.bf16 %v3896_v56, %v3894_v48  ;;  %v2267_v47 = vld [vmem:[%s10437_s2 + $0x408] sm:$0xff]  ;;  %v2266_v32 = vld [vmem:[%s10437_s2 + $0x400] sm:$0xff]  ;;  %v1790_v49 = vmul.f32 %v6906_v30, %v94_v24  ;;  %v10785_v24 = vld [vmem:[#allocation4_spill] sm:$0xff] }
 0x26c   :  { %v3900_v46 = vmax.f32 %v3476_v40, 0.0  ;;  %v3901_v53 = vmax.f32 %v3477_v33, 0.0  ;;  %v3898_v10 = vmax.f32 %v3474_v8, 0.0  ;;  %v1791_v6 = vmul.f32 %v6906_v30, %v95_v22  ;;  %v100_v40 = vld [vmem:[%s10439_s0 + $0x290] sm:$0xff]  ;;  %v101_v33 = vld [vmem:[%s10439_s0 + $0x298] sm:$0xff]  ;;  %v98_v30 = vld [vmem:[%s10439_s0 + $0x280] sm:$0xff] }
 0x26d   :  { %v3899_v13 = vmax.f32 %v3475_v19, 0.0  ;;  %5189 = vmatprep.subr.bf16.mxu1 %v4401_v50  ;;  %v2528_v51 = vpop.permute.xlu1 %2527  ;;  %v2523_v43 = vpop.permute.xlu0 %2522  ;;  %v6327_v19 = vld [vmem:[%s10438_s3 + $0x70] ss:$56 sps:$4 sm:$0xff]   ;;  %v1797_v27 = vmul.f32 %v6914_v37, %v101_v33  ;;  %v2273_v33 = vld [vmem:[%s10437_s2 + $0x438] sm:$0xff] }
 0x26e   :  { %v3480_v52 = vadd.f32 %v2528_v51, %v1784_v17  ;;  %v3481_v35 = vadd.f32 %v2528_v51, %v1785_v59  ;;  %5190 = vmatpush1.bf16.msra.mxu1 %v4400_v1  ;;  %2977 = vperm.xlu1 %6321, %v2263_v20   ;;  %v4402_v34 = vpack.c.bf16 %v3900_v46, %v3898_v10  ;;  %v99_v50 = vld [vmem:[%s10439_s0 + $0x288] sm:$0xff]  ;;  %v6328_v51 = vld [vmem:[%s10438_s3 + $0xe4] ss:$56 sps:$4 sm:$0xff]  }
 0x26f   :  { %v3478_v62 = vadd.f32 %v2523_v43, %v1782_v4  ;;  %v3479_v44 = vadd.f32 %v2523_v43, %v1783_v38  ;;  %2972 = vperm.xlu0 %6320, %v2262_v60   ;;  %v4403_v36 = vpack.c.bf16 %v3901_v53, %v3899_v13  ;;  %v2269_v4 = vld [vmem:[%s10437_s2 + $0x418] sm:$0xff]  ;;  %v1796_v38 = vmul.f32 %v6914_v37, %v100_v40  ;;  %v2268_v13 = vld [vmem:[%s10437_s2 + $0x410] sm:$0xff] }
 0x270   :  { %v3904_v63 = vmax.f32 %v3480_v52, 0.0  ;;  %v3905_v54 = vmax.f32 %v3481_v35, 0.0  ;;  %v104_v52 = vld [vmem:[%s10439_s0 + $0x2b0] sm:$0xff]  ;;  %v105_v37 = vld [vmem:[%s10439_s0 + $0x2b8] sm:$0xff] }
 0x271   :  { %v3902_v23 = vmax.f32 %v3478_v62, 0.0  ;;  %v3903_v41 = vmax.f32 %v3479_v44, 0.0  ;;  %5272 = vmatprep.subr.bf16.mxu1 %v4403_v36  ;;  %v2538_v12 = vpop.permute.xlu1 %2537  ;;  %5192 = vmatmul.mubr.bf16.vlgmr.msra.gmra.mrb[0].mxu1 %v6322_v28  ;;  %v2533_v26 = vpop.permute.xlu0 %2532  ;;  %v10783_v28 = vld [vmem:[#allocation2_spill] sm:$0xff]  ;;  %v103_v44 = vld [vmem:[%s10439_s0 + $0x2a8] sm:$0xff] }
 0x272   :  { %v3484_v55 = vadd.f32 %v2538_v12, %v1788_v9  ;;  %v3485_v42 = vadd.f32 %v2538_v12, %v1789_v61  ;;  %5273 = vmatpush1.bf16.msra.mxu1 %v4402_v34  ;;  %2987 = vperm.xlu1 %6321, %v2265_v16   ;;  %v3482_v58 = vadd.f32 %v2533_v26, %v1786_v57  ;;  %v102_v62 = vld [vmem:[%s10439_s0 + $0x2a0] sm:$0xff]  ;;  %v6351_v57 = vld [vmem:[%s10438_s3 + $0x1c] ss:$56 sps:$4 sm:$0xff]  }
 0x273   :  { %v4404_v56 = vpack.c.bf16 %v3904_v63, %v3902_v23  ;;  %v3483_v31 = vadd.f32 %v2533_v26, %v1787_v11  ;;  %2982 = vperm.xlu0 %6320, %v2264_v25   ;;  %v4405_v7 = vpack.c.bf16 %v3905_v54, %v3903_v41  ;;  %5201 = vmatprep.mubr.bf16.mxu1 %v6325_v0  ;;  %v2271_v0 = vld [vmem:[%s10437_s2 + $0x428] sm:$0xff]  ;;  %v2270_v12 = vld [vmem:[%s10437_s2 + $0x420] sm:$0xff]  ;;  %v109_v26 = vld [vmem:[%s10439_s0 + $0x2d8] sm:$0xff] }
 0x274   :  { %v3908_v48 = vmax.f32 %v3484_v55, 0.0  ;;  %v3909_v5 = vmax.f32 %v3485_v42, 0.0  ;;  %v3906_v29 = vmax.f32 %v3482_v58, 0.0  ;;  %v1794_v14 = vmul.f32 %v10783_v28, %v98_v30  ;;  %v10784_v11 = vld [vmem:[#allocation3_spill] sm:$0xff]  ;;  %v108_v42 = vld [vmem:[%s10439_s0 + $0x2d0] sm:$0xff]  ;;  %5530 = vmatprep.mubr.bf16.mxu0 %v6351_v57 }
 0x275   :  { %v3907_v3 = vmax.f32 %v3483_v31, 0.0  ;;  %5274 = vmatprep.subr.bf16.mxu1 %v4405_v7  ;;  %v2548_v8 = vpop.permute.xlu1 %2547  ;;  %v2543_v17 = vpop.permute.xlu0 %2542  ;;  %v1795_v15 = vmul.f32 %v10783_v28, %v99_v50  ;;  %v1800_v2 = vmul.f32 %v10784_v11, %v104_v52  ;;  %v1801_v21 = vmul.f32 %v10784_v11, %v105_v37  ;;  %v6330_v7 = vld [vmem:[%s10438_s3 + $0xe0] ss:$56 sps:$4 sm:$0xff]   ;;  %v2272_v50 = vld [vmem:[%s10437_s2 + $0x430] sm:$0xff]  ;;  %v2275_v37 = vld [vmem:[%s10437_s2 + $0x448] sm:$0xff] }
 0x276   :  { %v3488_v1 = vadd.f32 %v2548_v8, %v1792_v18  ;;  %v3489_v20 = vadd.f32 %v2548_v8, %v1793_v39  ;;  %5275 = vmatpush1.bf16.msra.mxu1 %v4404_v56  ;;  %2997 = vperm.xlu1 %6321, %v2267_v47   ;;  %v4406_v59 = vpack.c.bf16 %v3908_v48, %v3906_v29  ;;  %v106_v47 = vld [vmem:[%s10439_s0 + $0x2c0] sm:$0xff]  ;;  %v107_v18 = vld [vmem:[%s10439_s0 + $0x2c8] sm:$0xff]  ;;  %v10786_v29 = vld [vmem:[#allocation5_spill] sm:$0xff] }
 0x277   :  { %v3486_v46 = vadd.f32 %v2543_v17, %v1790_v49  ;;  %v3487_v53 = vadd.f32 %v2543_v17, %v1791_v6  ;;  %2992 = vperm.xlu0 %6320, %v2266_v32   ;;  %v4407_v60 = vpack.c.bf16 %v3909_v5, %v3907_v3  ;;  %v1798_v22 = vmul.f32 %v10785_v24, %v102_v62  ;;  %v6333_v11 = vld [vmem:[%s10438_s3 + $0x150] ss:$56 sps:$4 sm:$0xff]  }
 0x278   :  { %v3912_v45 = vmax.f32 %v3488_v1, 0.0  ;;  %v3913_v10 = vmax.f32 %v3489_v20, 0.0  ;;  %v1799_v55 = vmul.f32 %v10785_v24, %v103_v44  ;;  %v1804_v3 = vmul.f32 %v10786_v29, %v108_v42  ;;  %v6331_v1 = vld [vmem:[%s10438_s3 + $0x154] ss:$56 sps:$4 sm:$0xff]   ;;  %v10787_v20 = vld [vmem:[#allocation6_spill] sm:$0xff] }
 0x279   :  { %v3910_v35 = vmax.f32 %v3486_v46, 0.0  ;;  %v3911_v43 = vmax.f32 %v3487_v53, 0.0  ;;  %5276 = vmatprep.subr.bf16.mxu1 %v4407_v60  ;;  %v2558_v34 = vpop.permute.xlu1 %2557  ;;  %5202 = vmatmul.mubr.bf16.gmra.mrb[4].mxu1 %v6327_v19  ;;  %v2553_v9 = vpop.permute.xlu0 %2552  ;;  %v1805_v8 = vmul.f32 %v10786_v29, %v109_v26  ;;  %v1802_v17 = vmul.f32 %v10787_v20, %v106_v47  ;;  %v112_v46 = vld [vmem:[%s10439_s0 + $0x2f0] sm:$0xff]  ;;  %v113_v53 = vld [vmem:[%s10439_s0 + $0x2f8] sm:$0xff] }
 0x27a   :  { %v3492_v36 = vadd.f32 %v2558_v34, %v1796_v38  ;;  %v3493_v16 = vadd.f32 %v2558_v34, %v1797_v27  ;;  %5277 = vmatpush1.bf16.msra.mxu1 %v4406_v59  ;;  %3007 = vperm.xlu1 %6321, %v2269_v4   ;;  %v3490_v63 = vadd.f32 %v2553_v9, %v1794_v14  ;;  %v110_v27 = vld [vmem:[%s10439_s0 + $0x2e0] sm:$0xff]  ;;  %v2277_v26 = vld [vmem:[%s10437_s2 + $0x458] sm:$0xff] }
 0x27b   :  { %v4408_v61 = vpack.c.bf16 %v3912_v45, %v3910_v35  ;;  %v3491_v54 = vadd.f32 %v2553_v9, %v1795_v15  ;;  %3002 = vperm.xlu0 %6320, %v2268_v13   ;;  %v4409_v25 = vpack.c.bf16 %v3913_v10, %v3911_v43  ;;  %5211 = vmatprep.mubr.bf16.mxu1 %v6328_v51  ;;  %v111_v45 = vld [vmem:[%s10439_s0 + $0x2e8] sm:$0xff] }
 0x27c   :  { %v3916_v23 = vmax.f32 %v3492_v36, 0.0  ;;  %v3917_v41 = vmax.f32 %v3493_v16, 0.0  ;;  %v3914_v56 = vmax.f32 %v3490_v63, 0.0  ;;  %v1803_v59 = vmul.f32 %v10787_v20, %v107_v18  ;;  %v10788_v35 = vld [vmem:[#allocation7_spill] sm:$0xff]  ;;  %v2274_v36 = vld [vmem:[%s10437_s2 + $0x440] sm:$0xff]  ;;  %v10789_v16 = vld [vmem:[#allocation8_spill] sm:$0xff] }
 0x27d   :  { %v3915_v58 = vmax.f32 %v3491_v54, 0.0  ;;  %5278 = vmatprep.subr.bf16.mxu1 %v4409_v25  ;;  %v2568_v31 = vpop.permute.xlu1 %2567  ;;  %v2563_v5 = vpop.permute.xlu0 %2562  ;;  %v1808_v43 = vmul.f32 %v10788_v35, %v112_v46  ;;  %v1809_v34 = vmul.f32 %v10788_v35, %v113_v53  ;;  %v1806_v9 = vmul.f32 %v10789_v16, %v110_v27  ;;  %v116_v63 = vld [vmem:[%s10439_s0 + $0x310] sm:$0xff]  ;;  %v117_v54 = vld [vmem:[%s10439_s0 + $0x318] sm:$0xff]  ;;  %v2279_v46 = vld [vmem:[%s10437_s2 + $0x468] sm:$0xff] }
 0x27e   :  { %v3496_v39 = vadd.f32 %v2568_v31, %v1800_v2  ;;  %v3497_v48 = vadd.f32 %v2568_v31, %v1801_v21  ;;  %5279 = vmatpush1.bf16.msra.mxu1 %v4408_v61  ;;  %3017 = vperm.xlu1 %6321, %v2271_v0   ;;  %v4410_v32 = vpack.c.bf16 %v3916_v23, %v3914_v56  ;;  %v114_v2 = vld [vmem:[%s10439_s0 + $0x300] sm:$0xff]  ;;  %v115_v21 = vld [vmem:[%s10439_s0 + $0x308] sm:$0xff]  ;;  %v10790_v56 = vld [vmem:[#allocation9_spill] sm:$0xff] }
 0x27f   :  { %v3494_v49 = vadd.f32 %v2563_v5, %v1798_v22  ;;  %v3495_v6 = vadd.f32 %v2563_v5, %v1799_v55  ;;  %3012 = vperm.xlu0 %6320, %v2270_v12   ;;  %v4411_v40 = vpack.c.bf16 %v3917_v41, %v3915_v58  ;;  %v1807_v61 = vmul.f32 %v10789_v16, %v111_v45  ;;  %v2276_v18 = vld [vmem:[%s10437_s2 + $0x450] sm:$0xff]  ;;  %v10792_v53 = vld [vmem:[#allocation11_spill] sm:$0xff]  ;;  %v2278_v45 = vld [vmem:[%s10437_s2 + $0x460] sm:$0xff] }
 0x280   :  { %v3920_v19 = vmax.f32 %v3496_v39, 0.0  ;;  %v3921_v30 = vmax.f32 %v3497_v48, 0.0  ;;  %v1812_v58 = vmul.f32 %v10790_v56, %v116_v63  ;;  %v1813_v31 = vmul.f32 %v10790_v56, %v117_v54  ;;  %v6334_v39 = vld [vmem:[%s10438_s3 + $0x1c4] ss:$56 sps:$4 sm:$0xff]   ;;  %v6336_v35 = vld [vmem:[%s10438_s3 + $0x1c0] ss:$56 sps:$4 sm:$0xff]  }
 0x281   :  { %v3918_v60 = vmax.f32 %v3494_v49, 0.0  ;;  %v3919_v4 = vmax.f32 %v3495_v6, 0.0  ;;  %5280 = vmatprep.subr.bf16.mxu1 %v4411_v40  ;;  %v2578_v38 = vpop.permute.xlu1 %2577  ;;  %5212 = vmatmul.mubr.bf16.gmra.mrb[8].mxu1 %v6330_v7  ;;  %v2573_v51 = vpop.permute.xlu0 %2572  ;;  %v10791_v48 = vld [vmem:[#allocation10_spill] sm:$0xff]  ;;  %v120_v49 = vld [vmem:[%s10439_s0 + $0x330] sm:$0xff]  ;;  %v121_v6 = vld [vmem:[%s10439_s0 + $0x338] sm:$0xff] }
 0x282   :  { %v3500_v10 = vadd.f32 %v2578_v38, %v1804_v3  ;;  %v3501_v13 = vadd.f32 %v2578_v38, %v1805_v8  ;;  %5281 = vmatpush1.bf16.msra.mxu1 %v4410_v32  ;;  %3027 = vperm.xlu1 %6321, %v2273_v33   ;;  %v3498_v14 = vadd.f32 %v2573_v51, %v1802_v17  ;;  %v118_v3 = vld [vmem:[%s10439_s0 + $0x320] sm:$0xff]  ;;  %v119_v8 = vld [vmem:[%s10439_s0 + $0x328] sm:$0xff]  ;;  %v2281_v54 = vld [vmem:[%s10437_s2 + $0x478] sm:$0xff] }
 0x283   :  { %v4412_v28 = vpack.c.bf16 %v3920_v19, %v3918_v60  ;;  %v3499_v15 = vadd.f32 %v2573_v51, %v1803_v59  ;;  %3022 = vperm.xlu0 %6320, %v2272_v50   ;;  %v4413_v52 = vpack.c.bf16 %v3921_v30, %v3919_v4  ;;  %5221 = vmatprep.mubr.bf16.mxu1 %v6331_v1 }
 0x284   :  { %v3924_v62 = vmax.f32 %v3500_v10, 0.0  ;;  %v3925_v44 = vmax.f32 %v3501_v13, 0.0  ;;  %v3922_v25 = vmax.f32 %v3498_v14, 0.0  ;;  %v1810_v5 = vmul.f32 %v10791_v48, %v114_v2  ;;  %v10793_v10 = vld [vmem:[#allocation12_spill] sm:$0xff]  ;;  %v125_v14 = vld [vmem:[%s10439_s0 + $0x358] sm:$0xff] }
 0x285   :  { %v3923_v0 = vmax.f32 %v3499_v15, 0.0  ;;  %5282 = vmatprep.subr.bf16.mxu1 %v4413_v52  ;;  %v2588_v57 = vpop.permute.xlu1 %2587  ;;  %v2583_v12 = vpop.permute.xlu0 %2582  ;;  %v1811_v32 = vmul.f32 %v10791_v48, %v115_v21  ;;  %v1816_v60 = vmul.f32 %v10792_v53, %v120_v49  ;;  %v1817_v4 = vmul.f32 %v10792_v53, %v121_v6  ;;  %v2280_v21 = vld [vmem:[%s10437_s2 + $0x470] sm:$0xff]  ;;  %v2283_v49 = vld [vmem:[%s10437_s2 + $0x488] sm:$0xff] }
 0x286   :  { %v3504_v23 = vadd.f32 %v2588_v57, %v1808_v43  ;;  %v3505_v41 = vadd.f32 %v2588_v57, %v1809_v34  ;;  %5283 = vmatpush1.bf16.msra.mxu1 %v4412_v28  ;;  %3037 = vperm.xlu1 %6321, %v2275_v37   ;;  %v4414_v24 = vpack.c.bf16 %v3924_v62, %v3922_v25  ;;  %v124_v28 = vld [vmem:[%s10439_s0 + $0x350] sm:$0xff]  ;;  %v122_v43 = vld [vmem:[%s10439_s0 + $0x340] sm:$0xff]  ;;  %v123_v34 = vld [vmem:[%s10439_s0 + $0x348] sm:$0xff] }
 0x287   :  { %v3502_v22 = vadd.f32 %v2583_v12, %v1806_v9  ;;  %v3503_v55 = vadd.f32 %v2583_v12, %v1807_v61  ;;  %3032 = vperm.xlu0 %6320, %v2274_v36   ;;  %v4415_v42 = vpack.c.bf16 %v3925_v44, %v3923_v0  ;;  %v1814_v13 = vmul.f32 %v10793_v10, %v118_v3  ;;  %v10794_v25 = vld [vmem:[#allocation13_spill] sm:$0xff]  ;;  %v10796_v6 = vld [vmem:[#allocation15_spill] sm:$0xff] }
 0x288   :  { %v3928_v7 = vmax.f32 %v3504_v23, 0.0  ;;  %v3929_v47 = vmax.f32 %v3505_v41, 0.0  ;;  %v1815_v51 = vmul.f32 %v10793_v10, %v119_v8  ;;  %v1820_v0 = vmul.f32 %v10794_v25, %v124_v28  ;;  %v6337_v23 = vld [vmem:[%s10438_s3 + $0x234] ss:$56 sps:$4 sm:$0xff]   ;;  %v10795_v41 = vld [vmem:[#allocation14_spill] sm:$0xff] }
 0x289   :  { %v3926_v40 = vmax.f32 %v3502_v22, 0.0  ;;  %v3927_v33 = vmax.f32 %v3503_v55, 0.0  ;;  %5284 = vmatprep.subr.bf16.mxu1 %v4415_v42  ;;  %v2598_v29 = vpop.permute.xlu1 %2597  ;;  %5222 = vmatmul.mubr.bf16.gmra.mrb[12].mxu1 %v6333_v11  ;;  %v2593_v50 = vpop.permute.xlu0 %2592  ;;  %v1821_v57 = vmul.f32 %v10794_v25, %v125_v14  ;;  %v1818_v12 = vmul.f32 %v10795_v41, %v122_v43  ;;  %v128_v22 = vld [vmem:[%s10439_s0 + $0x370] sm:$0xff]  ;;  %v129_v55 = vld [vmem:[%s10439_s0 + $0x378] sm:$0xff]  ;;  %v2282_v8 = vld [vmem:[%s10437_s2 + $0x480] sm:$0xff] }
 0x28a   :  { %v3508_v19 = vadd.f32 %v2598_v29, %v1812_v58  ;;  %v3509_v30 = vadd.f32 %v2598_v29, %v1813_v31  ;;  %5285 = vmatpush1.bf16.msra.mxu1 %v4414_v24  ;;  %3047 = vperm.xlu1 %6321, %v2277_v26   ;;  %v3506_v20 = vadd.f32 %v2593_v50, %v1810_v5  ;;  %v126_v58 = vld [vmem:[%s10439_s0 + $0x360] sm:$0xff]  ;;  %v127_v31 = vld [vmem:[%s10439_s0 + $0x368] sm:$0xff]  ;;  %v2285_v14 = vld [vmem:[%s10437_s2 + $0x498] sm:$0xff] }
 0x28b   :  { %v4416_v1 = vpack.c.bf16 %v3928_v7, %v3926_v40  ;;  %v3507_v17 = vadd.f32 %v2593_v50, %v1811_v32  ;;  %3042 = vperm.xlu0 %6320, %v2276_v18   ;;  %v4417_v59 = vpack.c.bf16 %v3929_v47, %v3927_v33  ;;  %5231 = vmatprep.mubr.bf16.mxu1 %v6334_v39  ;;  %v6339_v53 = vld [vmem:[%s10438_s3 + $0x230] ss:$56 sps:$4 sm:$0xff]  }
 0x28c   :  { %v3932_v38 = vmax.f32 %v3508_v19, 0.0  ;;  %v3933_v27 = vmax.f32 %v3509_v30, 0.0  ;;  %v3930_v15 = vmax.f32 %v3506_v20, 0.0  ;;  %v1819_v24 = vmul.f32 %v10795_v41, %v123_v34  ;;  %v10797_v19 = vld [vmem:[#allocation16_spill] sm:$0xff]  ;;  %v133_v20 = vld [vmem:[%s10439_s0 + $0x398] sm:$0xff] }
 0x28d   :  { %v3931_v52 = vmax.f32 %v3507_v17, 0.0  ;;  %5286 = vmatprep.subr.bf16.mxu1 %v4417_v59  ;;  %v2608_v37 = vpop.permute.xlu1 %2607  ;;  %v2603_v36 = vpop.permute.xlu0 %2602  ;;  %v1824_v40 = vmul.f32 %v10796_v6, %v128_v22  ;;  %v1825_v33 = vmul.f32 %v10796_v6, %v129_v55  ;;  %v1822_v30 = vmul.f32 %v10797_v19, %v126_v58  ;;  %v2284_v34 = vld [vmem:[%s10437_s2 + $0x490] sm:$0xff]  ;;  %v2287_v22 = vld [vmem:[%s10437_s2 + $0x4a8] sm:$0xff]  ;;  %v6342_v6 = vld [vmem:[%s10438_s3 + $0x2a0] ss:$56 sps:$4 sm:$0xff]  }
 0x28e   :  { %v3512_v62 = vadd.f32 %v2608_v37, %v1816_v60  ;;  %v3513_v44 = vadd.f32 %v2608_v37, %v1817_v4  ;;  %5287 = vmatpush1.bf16.msra.mxu1 %v4416_v1  ;;  %3057 = vperm.xlu1 %6321, %v2279_v46   ;;  %v4418_v16 = vpack.c.bf16 %v3932_v38, %v3930_v15  ;;  %v132_v1 = vld [vmem:[%s10439_s0 + $0x390] sm:$0xff]  ;;  %v130_v60 = vld [vmem:[%s10439_s0 + $0x380] sm:$0xff]  ;;  %v131_v4 = vld [vmem:[%s10439_s0 + $0x388] sm:$0xff] }
 0x28f   :  { %v3510_v9 = vadd.f32 %v2603_v36, %v1814_v13  ;;  %v3511_v61 = vadd.f32 %v2603_v36, %v1815_v51  ;;  %3052 = vperm.xlu0 %6320, %v2278_v45   ;;  %v4419_v63 = vpack.c.bf16 %v3933_v27, %v3931_v52  ;;  %v1823_v50 = vmul.f32 %v10797_v19, %v127_v31  ;;  %v10798_v15 = vld [vmem:[#allocation17_spill] sm:$0xff]  ;;  %v10800_v55 = vld [vmem:[#allocation19_spill] sm:$0xff]  ;;  %v2286_v31 = vld [vmem:[%s10437_s2 + $0x4a0] sm:$0xff] }
 0x290   :  { %v3936_v11 = vmax.f32 %v3512_v62, 0.0  ;;  %v3937_v2 = vmax.f32 %v3513_v44, 0.0  ;;  %v1828_v52 = vmul.f32 %v10798_v15, %v132_v1  ;;  %v1829_v37 = vmul.f32 %v10798_v15, %v133_v20  ;;  %v6340_v62 = vld [vmem:[%s10438_s3 + $0x2a4] ss:$56 sps:$4 sm:$0xff]  }
 0x291   :  { %v3934_v42 = vmax.f32 %v3510_v9, 0.0  ;;  %v3935_v26 = vmax.f32 %v3511_v61, 0.0  ;;  %5288 = vmatprep.subr.bf16.mxu1 %v4419_v63  ;;  %v2618_v56 = vpop.permute.xlu1 %2617  ;;  %5232 = vmatmul.mubr.bf16.gmra.mrb[16].mxu1 %v6336_v35  ;;  %v2613_v18 = vpop.permute.xlu0 %2612  ;;  %v10799_v44 = vld [vmem:[#allocation18_spill] sm:$0xff]  ;;  %v136_v9 = vld [vmem:[%s10439_s0 + $0x3b0] sm:$0xff]  ;;  %v137_v61 = vld [vmem:[%s10439_s0 + $0x3b8] sm:$0xff] }
 0x292   :  { %v3516_v7 = vadd.f32 %v2618_v56, %v1820_v0  ;;  %v3517_v47 = vadd.f32 %v2618_v56, %v1821_v57  ;;  %5289 = vmatpush1.bf16.msra.mxu1 %v4418_v16  ;;  %3067 = vperm.xlu1 %6321, %v2281_v54   ;;  %v3514_v48 = vadd.f32 %v2613_v18, %v1818_v12  ;;  %v134_v0 = vld [vmem:[%s10439_s0 + $0x3a0] sm:$0xff]  ;;  %v135_v57 = vld [vmem:[%s10439_s0 + $0x3a8] sm:$0xff]  ;;  %v2289_v20 = vld [vmem:[%s10437_s2 + $0x4b8] sm:$0xff] }
 0x293   :  { %v4420_v39 = vpack.c.bf16 %v3936_v11, %v3934_v42  ;;  %v3515_v5 = vadd.f32 %v2613_v18, %v1819_v24  ;;  %3062 = vperm.xlu0 %6320, %v2280_v21   ;;  %v4421_v32 = vpack.c.bf16 %v3937_v2, %v3935_v26  ;;  %5241 = vmatprep.mubr.bf16.mxu1 %v6337_v23 }
 0x294   :  { %v3940_v29 = vmax.f32 %v3516_v7, 0.0  ;;  %v3941_v3 = vmax.f32 %v3517_v47, 0.0  ;;  %v3938_v17 = vmax.f32 %v3514_v48, 0.0  ;;  %v1826_v36 = vmul.f32 %v10799_v44, %v130_v60  ;;  %v10801_v7 = vld [vmem:[#allocation20_spill] sm:$0xff]  ;;  %v141_v48 = vld [vmem:[%s10439_s0 + $0x3d8] sm:$0xff] }
 0x295   :  { %v3939_v59 = vmax.f32 %v3515_v5, 0.0  ;;  %5290 = vmatprep.subr.bf16.mxu1 %v4421_v32  ;;  %v2628_v46 = vpop.permute.xlu1 %2627  ;;  %v2623_v45 = vpop.permute.xlu0 %2622  ;;  %v1827_v16 = vmul.f32 %v10799_v44, %v131_v4  ;;  %v1832_v42 = vmul.f32 %v10800_v55, %v136_v9  ;;  %v1833_v26 = vmul.f32 %v10800_v55, %v137_v61  ;;  %v2288_v4 = vld [vmem:[%s10437_s2 + $0x4b0] sm:$0xff]  ;;  %v2291_v9 = vld [vmem:[%s10437_s2 + $0x4c8] sm:$0xff] }
 0x296   :  { %v3520_v38 = vadd.f32 %v2628_v46, %v1824_v40  ;;  %v3521_v27 = vadd.f32 %v2628_v46, %v1825_v33  ;;  %5291 = vmatpush1.bf16.msra.mxu1 %v4420_v39  ;;  %3077 = vperm.xlu1 %6321, %v2283_v49   ;;  %v4422_v10 = vpack.c.bf16 %v3940_v29, %v3938_v17  ;;  %v140_v39 = vld [vmem:[%s10439_s0 + $0x3d0] sm:$0xff]  ;;  %v138_v40 = vld [vmem:[%s10439_s0 + $0x3c0] sm:$0xff]  ;;  %v139_v33 = vld [vmem:[%s10439_s0 + $0x3c8] sm:$0xff] }
 0x297   :  { %v3518_v13 = vadd.f32 %v2623_v45, %v1822_v30  ;;  %v3519_v51 = vadd.f32 %v2623_v45, %v1823_v50  ;;  %3072 = vperm.xlu0 %6320, %v2282_v8   ;;  %v4423_v28 = vpack.c.bf16 %v3941_v3, %v3939_v59  ;;  %v1830_v47 = vmul.f32 %v10801_v7, %v134_v0  ;;  %v10802_v17 = vld [vmem:[#allocation21_spill] sm:$0xff]  ;;  %v10804_v61 = vld [vmem:[#allocation23_spill] sm:$0xff] }
 0x298   :  { %v3944_v35 = vmax.f32 %v3520_v38, 0.0  ;;  %v3945_v43 = vmax.f32 %v3521_v27, 0.0  ;;  %v1831_v18 = vmul.f32 %v10801_v7, %v135_v57  ;;  %v1836_v59 = vmul.f32 %v10802_v17, %v140_v39  ;;  %v6343_v38 = vld [vmem:[%s10438_s3 + $0x314] ss:$56 sps:$4 sm:$0xff]   ;;  %v10803_v27 = vld [vmem:[#allocation22_spill] sm:$0xff] }
 0x299   :  { %v3942_v63 = vmax.f32 %v3518_v13, 0.0  ;;  %v3943_v54 = vmax.f32 %v3519_v51, 0.0  ;;  %5292 = vmatprep.subr.bf16.mxu1 %v4423_v28  ;;  %v2638_v25 = vpop.permute.xlu1 %2637  ;;  %5242 = vmatmul.mubr.bf16.gmra.mrb[20].mxu1 %v6339_v53  ;;  %v2633_v21 = vpop.permute.xlu0 %2632  ;;  %v1837_v46 = vmul.f32 %v10802_v17, %v141_v48  ;;  %v1834_v45 = vmul.f32 %v10803_v27, %v138_v40  ;;  %v144_v13 = vld [vmem:[%s10439_s0 + $0x3f0] sm:$0xff]  ;;  %v145_v51 = vld [vmem:[%s10439_s0 + $0x3f8] sm:$0xff]  ;;  %v2290_v57 = vld [vmem:[%s10437_s2 + $0x4c0] sm:$0xff] }
 0x29a   :  { %v3524_v11 = vadd.f32 %v2638_v25, %v1828_v52  ;;  %v3525_v2 = vadd.f32 %v2638_v25, %v1829_v37  ;;  %5293 = vmatpush1.bf16.msra.mxu1 %v4422_v10  ;;  %3087 = vperm.xlu1 %6321, %v2285_v14   ;;  %v3522_v41 = vadd.f32 %v2633_v21, %v1826_v36  ;;  %v142_v52 = vld [vmem:[%s10439_s0 + $0x3e0] sm:$0xff]  ;;  %v143_v37 = vld [vmem:[%s10439_s0 + $0x3e8] sm:$0xff]  ;;  %v2293_v48 = vld [vmem:[%s10437_s2 + $0x4d8] sm:$0xff] }
 0x29b   :  { %v4424_v23 = vpack.c.bf16 %v3944_v35, %v3942_v63  ;;  %v3523_v12 = vadd.f32 %v2633_v21, %v1827_v16  ;;  %3082 = vperm.xlu0 %6320, %v2284_v34   ;;  %v4425_v24 = vpack.c.bf16 %v3945_v43, %v3943_v54  ;;  %5251 = vmatprep.mubr.bf16.mxu1 %v6340_v62  ;;  %v6345_v55 = vld [vmem:[%s10438_s3 + $0x310] ss:$56 sps:$4 sm:$0xff]  }
 0x29c   :  { %v3948_v56 = vmax.f32 %v3524_v11, 0.0  ;;  %v3949_v58 = vmax.f32 %v3525_v2, 0.0  ;;  %v3946_v5 = vmax.f32 %v3522_v41, 0.0  ;;  %v1835_v10 = vmul.f32 %v10803_v27, %v139_v33  ;;  %v10805_v11 = vld [vmem:[#allocation24_spill] sm:$0xff]  ;;  %v149_v41 = vld [vmem:[%s10439_s0 + $0x418] sm:$0xff] }
 0x29d   :  { %v3947_v32 = vmax.f32 %v3523_v12, 0.0  ;;  %5294 = vmatprep.subr.bf16.mxu1 %v4425_v24  ;;  %v2648_v49 = vpop.permute.xlu1 %2647  ;;  %v2643_v8 = vpop.permute.xlu0 %2642  ;;  %v1840_v63 = vmul.f32 %v10804_v61, %v144_v13  ;;  %v1841_v54 = vmul.f32 %v10804_v61, %v145_v51  ;;  %v1838_v2 = vmul.f32 %v10805_v11, %v142_v52  ;;  %v2292_v33 = vld [vmem:[%s10437_s2 + $0x4d0] sm:$0xff]  ;;  %v2295_v13 = vld [vmem:[%s10437_s2 + $0x4e8] sm:$0xff] }
 0x29e   :  { %v3528_v29 = vadd.f32 %v2648_v49, %v1832_v42  ;;  %v3529_v3 = vadd.f32 %v2648_v49, %v1833_v26  ;;  %5295 = vmatpush1.bf16.msra.mxu1 %v4424_v23  ;;  %3097 = vperm.xlu1 %6321, %v2287_v22   ;;  %v4426_v19 = vpack.c.bf16 %v3948_v56, %v3946_v5  ;;  %v148_v23 = vld [vmem:[%s10439_s0 + $0x410] sm:$0xff]  ;;  %v146_v42 = vld [vmem:[%s10439_s0 + $0x400] sm:$0xff]  ;;  %v147_v26 = vld [vmem:[%s10439_s0 + $0x408] sm:$0xff] }
 0x29f   :  { %v3526_v30 = vadd.f32 %v2643_v8, %v1830_v47  ;;  %v3527_v50 = vadd.f32 %v2643_v8, %v1831_v18  ;;  %3092 = vperm.xlu0 %6320, %v2286_v31   ;;  %v4427_v1 = vpack.c.bf16 %v3949_v58, %v3947_v32  ;;  %v1839_v21 = vmul.f32 %v10805_v11, %v143_v37  ;;  %v10806_v5 = vld [vmem:[#allocation25_spill] sm:$0xff]  ;;  %v10808_v51 = vld [vmem:[#allocation27_spill] sm:$0xff]  ;;  %v2294_v37 = vld [vmem:[%s10437_s2 + $0x4e0] sm:$0xff] }
 0x2a0   :  { %v3952_v53 = vmax.f32 %v3528_v29, 0.0  ;;  %v3953_v60 = vmax.f32 %v3529_v3, 0.0  ;;  %v1844_v32 = vmul.f32 %v10806_v5, %v148_v23  ;;  %v1845_v49 = vmul.f32 %v10806_v5, %v149_v41  ;;  %v6348_v29 = vld [vmem:[%s10438_s3 + $0xc] ss:$56 sps:$4 sm:$0xff]   ;;  %v6346_v61 = vld [vmem:[%s10438_s3 + $0x8] ss:$56 sps:$4 sm:$0xff]  }
 0x2a1   :  { %v3950_v28 = vmax.f32 %v3526_v30, 0.0  ;;  %v3951_v14 = vmax.f32 %v3527_v50, 0.0  ;;  %5296 = vmatprep.subr.bf16.mxu1 %v4427_v1  ;;  %v2658_v15 = vpop.permute.xlu1 %2657  ;;  %5252 = vmatmul.mubr.bf16.gmra.mrb[24].mxu1 %v6342_v6  ;;  %v2653_v34 = vpop.permute.xlu0 %2652  ;;  %v10807_v3 = vld [vmem:[#allocation26_spill] sm:$0xff]  ;;  %v152_v30 = vld [vmem:[%s10439_s0 + $0x430] sm:$0xff]  ;;  %v153_v50 = vld [vmem:[%s10439_s0 + $0x438] sm:$0xff] }
 0x2a2   :  { %v3532_v35 = vadd.f32 %v2658_v15, %v1836_v59  ;;  %v3533_v43 = vadd.f32 %v2658_v15, %v1837_v46  ;;  %5297 = vmatpush1.bf16.msra.mxu1 %v4426_v19  ;;  %3107 = vperm.xlu1 %6321, %v2289_v20   ;;  %v3530_v44 = vadd.f32 %v2653_v34, %v1834_v45  ;;  %v150_v59 = vld [vmem:[%s10439_s0 + $0x420] sm:$0xff]  ;;  %v151_v46 = vld [vmem:[%s10439_s0 + $0x428] sm:$0xff]  ;;  %v2297_v41 = vld [vmem:[%s10437_s2 + $0x4f8] sm:$0xff] }
 0x2a3   :  { %v4428_v62 = vpack.c.bf16 %v3952_v53, %v3950_v28  ;;  %v3531_v36 = vadd.f32 %v2653_v34, %v1835_v10  ;;  %3102 = vperm.xlu0 %6320, %v2288_v4   ;;  %v4429_v16 = vpack.c.bf16 %v3953_v60, %v3951_v14  ;;  %5261 = vmatprep.mubr.bf16.mxu1 %v6343_v38  ;;  %v210_v5 = vld [vmem:[%s10439_s0 + $0x600] sm:$0xff] }
 0x2a4   :  { %v3956_v25 = vmax.f32 %v3532_v35, 0.0  ;;  %v3957_v0 = vmax.f32 %v3533_v43, 0.0  ;;  %v3954_v12 = vmax.f32 %v3530_v44, 0.0  ;;  %v1842_v8 = vmul.f32 %v10807_v3, %v146_v42  ;;  %v10809_v35 = vld [vmem:[#allocation28_spill] sm:$0xff]  ;;  %v157_v44 = vld [vmem:[%s10439_s0 + $0x458] sm:$0xff] }
 0x2a5   :  { %v3955_v24 = vmax.f32 %v3531_v36, 0.0  ;;  %5298 = vmatprep.subr.bf16.mxu1 %v4429_v16  ;;  %v2668_v22 = vpop.permute.xlu1 %2667  ;;  %v2663_v31 = vpop.permute.xlu0 %2662  ;;  %v1843_v19 = vmul.f32 %v10807_v3, %v147_v26  ;;  %v1848_v28 = vmul.f32 %v10808_v51, %v152_v30  ;;  %v1849_v14 = vmul.f32 %v10808_v51, %v153_v50  ;;  %v2296_v26 = vld [vmem:[%s10437_s2 + $0x4f0] sm:$0xff]  ;;  %v10812_v30 = vld [vmem:[#allocation57_spill] sm:$0xff]  ;;  %v215_v51 = vld [vmem:[%s10439_s0 + $0x628] sm:$0xff] }
 0x2a6   :  { %v3536_v56 = vadd.f32 %v2668_v22, %v1840_v63  ;;  %v3537_v58 = vadd.f32 %v2668_v22, %v1841_v54  ;;  %5299 = vmatpush1.bf16.msra.mxu1 %v4428_v62  ;;  %3117 = vperm.xlu1 %6321, %v2291_v9   ;;  %v4430_v7 = vpack.c.bf16 %v3956_v25, %v3954_v12  ;;  %v156_v62 = vld [vmem:[%s10439_s0 + $0x450] sm:$0xff]  ;;  %v154_v63 = vld [vmem:[%s10439_s0 + $0x440] sm:$0xff]  ;;  %v155_v54 = vld [vmem:[%s10439_s0 + $0x448] sm:$0xff] }
 0x2a7   :  { %v3534_v47 = vadd.f32 %v2663_v31, %v1838_v2  ;;  %v3535_v18 = vadd.f32 %v2663_v31, %v1839_v21  ;;  %3112 = vperm.xlu0 %6320, %v2290_v57   ;;  %v4431_v39 = vpack.c.bf16 %v3957_v0, %v3955_v24  ;;  %v1846_v43 = vmul.f32 %v10809_v35, %v150_v59  ;;  %v10810_v12 = vld [vmem:[#allocation29_spill] sm:$0xff]  ;;  %v2298_v59 = vld [vmem:[%s10437_s2 + $0x500] sm:$0xff] }
 0x2a8   :  { %v3960_v6 = vmax.f32 %v3536_v56, 0.0  ;;  %v3961_v40 = vmax.f32 %v3537_v58, 0.0  ;;  %v1847_v34 = vmul.f32 %v10809_v35, %v151_v46  ;;  %v1852_v24 = vmul.f32 %v10810_v12, %v156_v62  ;;  %v10811_v56 = vld [vmem:[#allocation30_spill] sm:$0xff]  ;;  %v10814_v62 = vld [vmem:[#allocation59_spill] sm:$0xff] }
 0x2a9   :  { %v3958_v1 = vmax.f32 %v3534_v47, 0.0  ;;  %v3959_v20 = vmax.f32 %v3535_v18, 0.0  ;;  %5300 = vmatprep.subr.bf16.mxu1 %v4431_v39  ;;  %v2678_v17 = vpop.permute.xlu1 %2677  ;;  %5262 = vmatmul.mubr.bf16.gmra.mrb[28].mxu1 %v6345_v55  ;;  %v2673_v4 = vpop.permute.xlu0 %2672  ;;  %v1853_v22 = vmul.f32 %v10810_v12, %v157_v44  ;;  %v1850_v58 = vmul.f32 %v10811_v56, %v154_v63  ;;  %v213_v47 = vld [vmem:[%s10439_s0 + $0x618] sm:$0xff]  ;;  %v10813_v46 = vld [vmem:[#allocation58_spill] sm:$0xff]  ;;  %v10815_v63 = vld [vmem:[#allocation60_spill] sm:$0xff] }
 0x2aa   :  { %v3540_v53 = vadd.f32 %v2678_v17, %v1844_v32  ;;  %v3541_v60 = vadd.f32 %v2678_v17, %v1845_v49  ;;  %5301 = vmatpush1.bf16.msra.mxu1 %v4430_v7  ;;  %3127 = vperm.xlu1 %6321, %v2293_v48   ;;  %v3538_v27 = vadd.f32 %v2673_v4, %v1842_v8  ;;  %v212_v7 = vld [vmem:[%s10439_s0 + $0x610] sm:$0xff]  ;;  %v211_v32 = vld [vmem:[%s10439_s0 + $0x608] sm:$0xff] }
 0x2ab   :  { %v4432_v38 = vpack.c.bf16 %v3960_v6, %v3958_v1  ;;  %v3539_v45 = vadd.f32 %v2673_v4, %v1843_v19  ;;  %3122 = vperm.xlu0 %6320, %v2292_v33   ;;  %v4433_v10 = vpack.c.bf16 %v3961_v40, %v3959_v20  ;;  %5304 = vmatprep.mubr.bf16.mxu1 %v6348_v29  ;;  %v2299_v19 = vld [vmem:[%s10437_s2 + $0x508] sm:$0xff]  ;;  %v216_v4 = vld [vmem:[%s10439_s0 + $0x630] sm:$0xff] }
 0x2ac   :  { %v3964_v15 = vmax.f32 %v3540_v53, 0.0  ;;  %v3965_v52 = vmax.f32 %v3541_v60, 0.0  ;;  %v3962_v36 = vmax.f32 %v3538_v27, 0.0  ;;  %v1851_v31 = vmul.f32 %v10811_v56, %v155_v54 }
 0x2ad   :  { %v3963_v16 = vmax.f32 %v3539_v45, 0.0  ;;  %5302 = vmatprep.subr.bf16.mxu1 %v4433_v10  ;;  %v2688_v9 = vpop.permute.xlu1 %2687  ;;  %v1908_v50 = vmul.f32 %v10812_v30, %v212_v7  ;;  %v1909_v1 = vmul.f32 %v10812_v30, %v213_v47  ;;  %v1906_v53 = vmul.f32 %v10813_v46, %v210_v5  ;;  %v10817_v5 = vld [vmem:[#allocation62_spill] sm:$0xff] }
 0x2ae   :  { %v3544_v25 = vadd.f32 %v2688_v9, %v1848_v28  ;;  %v3545_v0 = vadd.f32 %v2688_v9, %v1849_v14  ;;  %v2683_v57 = vpop.permute.xlu0 %2682  ;;  %5303 = vmatpush1.bf16.msra.mxu1 %v4432_v38  ;;  %3137 = vperm.xlu1 %6321, %v2295_v13   ;;  %v4434_v11 = vpack.c.bf16 %v3964_v15, %v3962_v36  ;;  %v217_v38 = vld [vmem:[%s10439_s0 + $0x638] sm:$0xff]  ;;  %v214_v13 = vld [vmem:[%s10439_s0 + $0x620] sm:$0xff] }
 0x2af   :  { %v3542_v2 = vadd.f32 %v2683_v57, %v1846_v43  ;;  %v3543_v21 = vadd.f32 %v2683_v57, %v1847_v34  ;;  %3132 = vperm.xlu0 %6320, %v2294_v37   ;;  %v4435_v23 = vpack.c.bf16 %v3965_v52, %v3963_v16  ;;  %v1907_v60 = vmul.f32 %v10813_v46, %v211_v32  ;;  %v2301_v43 = vld [vmem:[%s10437_s2 + $0x518] sm:$0xff]  ;;  %v2300_v16 = vld [vmem:[%s10437_s2 + $0x510] sm:$0xff] }
 0x2b0   :  { %v3968_v55 = vmax.f32 %v3544_v25, 0.0  ;;  %v3969_v42 = vmax.f32 %v3545_v0, 0.0  ;;  %v1912_v44 = vmul.f32 %v10814_v62, %v216_v4  ;;  %v1913_v36 = vmul.f32 %v10814_v62, %v217_v38  ;;  %v220_v0 = vld [vmem:[%s10439_s0 + $0x650] sm:$0xff]  ;;  %v221_v57 = vld [vmem:[%s10439_s0 + $0x658] sm:$0xff] }
 0x2b1   :  { %v3966_v18 = vmax.f32 %v3542_v2, 0.0  ;;  %v3967_v39 = vmax.f32 %v3543_v21, 0.0  ;;  %5385 = vmatprep.subr.bf16.mxu1 %v4435_v23  ;;  %v2698_v48 = vpop.permute.xlu1 %2697  ;;  %5305 = vmatmul.mubr.bf16.vlgmr.msra.gmra.mrb[0].mxu1 %v6346_v61  ;;  %v1910_v54 = vmul.f32 %v10815_v63, %v214_v13  ;;  %v1911_v25 = vmul.f32 %v10815_v63, %v215_v51  ;;  %v218_v23 = vld [vmem:[%s10439_s0 + $0x640] sm:$0xff]  ;;  %v10819_v13 = vld [vmem:[#allocation64_spill] sm:$0xff] }
 0x2b2   :  { %v3548_v49 = vadd.f32 %v2698_v48, %v1852_v24  ;;  %v3549_v6 = vadd.f32 %v2698_v48, %v1853_v22  ;;  %v2693_v40 = vpop.permute.xlu0 %2692  ;;  %5386 = vmatpush1.bf16.msra.mxu1 %v4434_v11  ;;  %3147 = vperm.xlu1 %6321, %v2297_v41   ;;  %v219_v41 = vld [vmem:[%s10439_s0 + $0x648] sm:$0xff]  ;;  %v2302_v48 = vld [vmem:[%s10437_s2 + $0x520] sm:$0xff]  ;;  %v1914_v32 = vmul.f32 %v10817_v5, %v218_v23 }
 0x2b3   :  { %v4436_v33 = vpack.c.bf16 %v3968_v55, %v3966_v18  ;;  %v3546_v29 = vadd.f32 %v2693_v40, %v1850_v58  ;;  %v3547_v3 = vadd.f32 %v2693_v40, %v1851_v31  ;;  %3142 = vperm.xlu0 %6320, %v2296_v26   ;;  %v4437_v8 = vpack.c.bf16 %v3969_v42, %v3967_v39  ;;  %v2303_v58 = vld [vmem:[%s10437_s2 + $0x528] sm:$0xff]  ;;  %v10816_v31 = vld [vmem:[#allocation61_spill] sm:$0xff]  ;;  %v10821_v23 = vld [vmem:[#allocation66_spill] sm:$0xff] }
 0x2b4   :  { %v3972_v20 = vmax.f32 %v3548_v49, 0.0  ;;  %v3973_v17 = vmax.f32 %v3549_v6, 0.0  ;;  %v1916_v7 = vmul.f32 %v10816_v31, %v220_v0  ;;  %v1917_v47 = vmul.f32 %v10816_v31, %v221_v57  ;;  %v224_v6 = vld [vmem:[%s10439_s0 + $0x670] sm:$0xff]  ;;  %v225_v40 = vld [vmem:[%s10439_s0 + $0x678] sm:$0xff] }
 0x2b5   :  { %v3970_v27 = vmax.f32 %v3546_v29, 0.0  ;;  %v3971_v45 = vmax.f32 %v3547_v3, 0.0  ;;  %5387 = vmatprep.subr.bf16.mxu1 %v4437_v8  ;;  %v2838_v10 = vpop.permute.xlu1 %2837  ;;  %v1915_v49 = vmul.f32 %v10817_v5, %v219_v41  ;;  %v222_v8 = vld [vmem:[%s10439_s0 + $0x660] sm:$0xff] }
 0x2b6   :  { %v3604_v28 = vadd.f32 %v2838_v10, %v1908_v50  ;;  %v2833_v14 = vpop.permute.xlu0 %2832  ;;  %5388 = vmatpush1.bf16.msra.mxu1 %v4436_v33  ;;  %3157 = vperm.xlu1 %6321, %v2299_v19   ;;  %v3605_v15 = vadd.f32 %v2838_v10, %v1909_v1  ;;  %v223_v19 = vld [vmem:[%s10439_s0 + $0x668] sm:$0xff]  ;;  %v2208_v10 = vld [vmem:[%s10437_s2 + $0x230] sm:$0xff]  ;;  %v1918_v51 = vmul.f32 %v10819_v13, %v222_v8 }
 0x2b7   :  { %v4438_v52 = vpack.c.bf16 %v3972_v20, %v3970_v27  ;;  %v3602_v37 = vadd.f32 %v2833_v14, %v1906_v53  ;;  %3152 = vperm.xlu0 %6320, %v2298_v59   ;;  %v4439_v35 = vpack.c.bf16 %v3973_v17, %v3971_v45  ;;  %v3603_v34 = vadd.f32 %v2833_v14, %v1907_v60  ;;  %v2209_v53 = vld [vmem:[%s10437_s2 + $0x238] sm:$0xff]  ;;  %v10818_v60 = vld [vmem:[#allocation63_spill] sm:$0xff]  ;;  %v228_v14 = vld [vmem:[%s10439_s0 + $0x690] sm:$0xff] }
 0x2b8   :  { %v4029_v9 = vmax.f32 %v3605_v15, 0.0  ;;  %v4028_v61 = vmax.f32 %v3604_v28, 0.0  ;;  %v1920_v4 = vmul.f32 %v10818_v60, %v224_v6  ;;  %v1921_v38 = vmul.f32 %v10818_v60, %v225_v40  ;;  %v229_v15 = vld [vmem:[%s10439_s0 + $0x698] sm:$0xff]  ;;  %v10823_v8 = vld [vmem:[#allocation68_spill] sm:$0xff] }
 0x2b9   :  { %5389 = vmatprep.subr.bf16.mxu1 %v4439_v35  ;;  %v2848_v11 = vpop.permute.xlu1 %2847  ;;  %v4027_v2 = vmax.f32 %v3603_v34, 0.0  ;;  %v4026_v21 = vmax.f32 %v3602_v37, 0.0  ;;  %v1919_v28 = vmul.f32 %v10819_v13, %v223_v19  ;;  %v227_v34 = vld [vmem:[%s10439_s0 + $0x688] sm:$0xff] }
 0x2ba   :  { %v3608_v12 = vadd.f32 %v2848_v11, %v1912_v44  ;;  %v3609_v24 = vadd.f32 %v2848_v11, %v1913_v36  ;;  %v2843_v22 = vpop.permute.xlu0 %2842  ;;  %5390 = vmatpush1.bf16.msra.mxu1 %v4438_v52  ;;  %3167 = vperm.xlu1 %6321, %v2301_v43   ;;  %v226_v43 = vld [vmem:[%s10439_s0 + $0x680] sm:$0xff] }
 0x2bb   :  { %v3606_v55 = vadd.f32 %v2843_v22, %v1910_v54  ;;  %v3607_v42 = vadd.f32 %v2843_v22, %v1911_v25  ;;  %3162 = vperm.xlu0 %6320, %v2300_v16   ;;  %v4467_v26 = vpack.c.bf16 %v4029_v9, %v4027_v2  ;;  %v4466_v56 = vpack.c.bf16 %v4028_v61, %v4026_v21  ;;  %v2305_v54 = vld [vmem:[%s10437_s2 + $0x538] sm:$0xff]  ;;  %v2304_v21 = vld [vmem:[%s10437_s2 + $0x530] sm:$0xff] }
 0x2bc   :  { %v4032_v18 = vmax.f32 %v3608_v12, 0.0  ;;  %v4033_v39 = vmax.f32 %v3609_v24, 0.0  ;;  %v10820_v25 = vld [vmem:[#allocation65_spill] sm:$0xff]  ;;  %v1922_v41 = vmul.f32 %v10821_v23, %v226_v43  ;;  %v1923_v12 = vmul.f32 %v10821_v23, %v227_v34  ;;  %v232_v24 = vld [vmem:[%s10439_s0 + $0x6b0] sm:$0xff]  ;;  %v10825_v43 = vld [vmem:[#allocation70_spill] sm:$0xff] }
 0x2bd   :  { %v4030_v33 = vmax.f32 %v3606_v55, 0.0  ;;  %v4031_v29 = vmax.f32 %v3607_v42, 0.0  ;;  %5498 = vmatprep.subr.bf16.mxu0 %v4467_v26  ;;  %v2858_v3 = vpop.permute.xlu1 %2857  ;;  %v1924_v0 = vmul.f32 %v10820_v25, %v228_v14  ;;  %v1925_v57 = vmul.f32 %v10820_v25, %v229_v15  ;;  %v233_v22 = vld [vmem:[%s10439_s0 + $0x6b8] sm:$0xff] }
 0x2be   :  { %v3612_v30 = vadd.f32 %v2858_v3, %v1916_v7  ;;  %v3613_v50 = vadd.f32 %v2858_v3, %v1917_v47  ;;  %v2853_v1 = vpop.permute.xlu0 %2852  ;;  %5499 = vmatpush1.bf16.msra.mxu0 %v4466_v56  ;;  %3177 = vperm.xlu1 %6321, %v2303_v58   ;;  %v230_v56 = vld [vmem:[%s10439_s0 + $0x6a0] sm:$0xff]  ;;  %v231_v58 = vld [vmem:[%s10439_s0 + $0x6a8] sm:$0xff] }
 0x2bf   :  { %v3610_v20 = vadd.f32 %v2853_v1, %v1914_v32  ;;  %v3611_v17 = vadd.f32 %v2853_v1, %v1915_v49  ;;  %3172 = vperm.xlu0 %6320, %v2302_v48   ;;  %v4469_v59 = vpack.c.bf16 %v4033_v39, %v4031_v29  ;;  %v4468_v46 = vpack.c.bf16 %v4032_v18, %v4030_v33  ;;  %v2211_v32 = vld [vmem:[%s10437_s2 + $0x248] sm:$0xff]  ;;  %v2210_v3 = vld [vmem:[%s10437_s2 + $0x240] sm:$0xff]  ;;  %v237_v1 = vld [vmem:[%s10439_s0 + $0x6d8] sm:$0xff] }
 0x2c0   :  { %v4036_v27 = vmax.f32 %v3612_v30, 0.0  ;;  %v4037_v45 = vmax.f32 %v3613_v50, 0.0  ;;  %v10822_v49 = vld [vmem:[#allocation67_spill] sm:$0xff]  ;;  %v1926_v19 = vmul.f32 %v10823_v8, %v230_v56  ;;  %v1927_v30 = vmul.f32 %v10823_v8, %v231_v58  ;;  %v236_v50 = vld [vmem:[%s10439_s0 + $0x6d0] sm:$0xff] }
 0x2c1   :  { %v4034_v52 = vmax.f32 %v3610_v20, 0.0  ;;  %v4035_v37 = vmax.f32 %v3611_v17, 0.0  ;;  %5500 = vmatprep.subr.bf16.mxu0 %v4469_v59  ;;  %v2868_v35 = vpop.permute.xlu1 %2867  ;;  %v1928_v6 = vmul.f32 %v10822_v49, %v232_v24  ;;  %v1929_v40 = vmul.f32 %v10822_v49, %v233_v22  ;;  %v10827_v56 = vld [vmem:[#allocation72_spill] sm:$0xff] }
 0x2c2   :  { %v3616_v62 = vadd.f32 %v2868_v35, %v1920_v4  ;;  %v3617_v44 = vadd.f32 %v2868_v35, %v1921_v38  ;;  %v2863_v36 = vpop.permute.xlu0 %2862  ;;  %5501 = vmatpush1.bf16.msra.mxu0 %v4468_v46  ;;  %2707 = vperm.xlu1 %6321, %v2209_v53   ;;  %v234_v46 = vld [vmem:[%s10439_s0 + $0x6c0] sm:$0xff]  ;;  %v235_v53 = vld [vmem:[%s10439_s0 + $0x6c8] sm:$0xff] }
 0x2c3   :  { %v3614_v16 = vadd.f32 %v2863_v36, %v1918_v51  ;;  %v3615_v9 = vadd.f32 %v2863_v36, %v1919_v28  ;;  %2702 = vperm.xlu0 %6320, %v2208_v10   ;;  %v4471_v61 = vpack.c.bf16 %v4037_v45, %v4035_v37  ;;  %v4470_v63 = vpack.c.bf16 %v4036_v27, %v4034_v52  ;;  %v2307_v51 = vld [vmem:[%s10437_s2 + $0x548] sm:$0xff]  ;;  %v10824_v28 = vld [vmem:[#allocation69_spill] sm:$0xff]  ;;  %v2306_v35 = vld [vmem:[%s10437_s2 + $0x540] sm:$0xff] }
 0x2c4   :  { %v4040_v11 = vmax.f32 %v3616_v62, 0.0  ;;  %v4041_v2 = vmax.f32 %v3617_v44, 0.0  ;;  %v1932_v14 = vmul.f32 %v10824_v28, %v236_v50  ;;  %v1933_v15 = vmul.f32 %v10824_v28, %v237_v1  ;;  %v240_v44 = vld [vmem:[%s10439_s0 + $0x6f0] sm:$0xff]  ;;  %v241_v36 = vld [vmem:[%s10439_s0 + $0x6f8] sm:$0xff] }
 0x2c5   :  { %v4038_v55 = vmax.f32 %v3614_v16, 0.0  ;;  %v4039_v42 = vmax.f32 %v3615_v9, 0.0  ;;  %5502 = vmatprep.subr.bf16.mxu0 %v4471_v61  ;;  %v2878_v26 = vpop.permute.xlu1 %2877  ;;  %v1930_v34 = vmul.f32 %v10825_v43, %v234_v46  ;;  %v1931_v62 = vmul.f32 %v10825_v43, %v235_v53  ;;  %v10829_v46 = vld [vmem:[#allocation74_spill] sm:$0xff] }
 0x2c6   :  { %v3620_v31 = vadd.f32 %v2878_v26, %v1924_v0  ;;  %v3621_v7 = vadd.f32 %v2878_v26, %v1925_v57  ;;  %v2873_v47 = vpop.permute.xlu0 %2872  ;;  %5503 = vmatpush1.bf16.msra.mxu0 %v4470_v63  ;;  %3187 = vperm.xlu1 %6321, %v2305_v54   ;;  %v238_v63 = vld [vmem:[%s10439_s0 + $0x6e0] sm:$0xff]  ;;  %v239_v54 = vld [vmem:[%s10439_s0 + $0x6e8] sm:$0xff]  ;;  %v2212_v26 = vld [vmem:[%s10437_s2 + $0x250] sm:$0xff] }
 0x2c7   :  { %v3618_v18 = vadd.f32 %v2873_v47, %v1922_v41  ;;  %v3619_v39 = vadd.f32 %v2873_v47, %v1923_v12  ;;  %3182 = vperm.xlu0 %6320, %v2304_v21   ;;  %v4473_v48 = vpack.c.bf16 %v4041_v2, %v4039_v42  ;;  %v4472_v5 = vpack.c.bf16 %v4040_v11, %v4038_v55  ;;  %v2213_v41 = vld [vmem:[%s10437_s2 + $0x258] sm:$0xff]  ;;  %v10826_v12 = vld [vmem:[#allocation71_spill] sm:$0xff] }
 0x2c8   :  { %v4044_v33 = vmax.f32 %v3620_v31, 0.0  ;;  %v4045_v29 = vmax.f32 %v3621_v7, 0.0  ;;  %v1936_v24 = vmul.f32 %v10826_v12, %v240_v44  ;;  %v1937_v22 = vmul.f32 %v10826_v12, %v241_v36  ;;  %v244_v7 = vld [vmem:[%s10439_s0 + $0x710] sm:$0xff]  ;;  %v245_v47 = vld [vmem:[%s10439_s0 + $0x718] sm:$0xff] }
 0x2c9   :  { %v4042_v20 = vmax.f32 %v3618_v18, 0.0  ;;  %v4043_v17 = vmax.f32 %v3619_v39, 0.0  ;;  %5504 = vmatprep.subr.bf16.mxu0 %v4473_v48  ;;  %v2888_v59 = vpop.permute.xlu1 %2887  ;;  %v1934_v58 = vmul.f32 %v10827_v56, %v238_v63  ;;  %v1935_v31 = vmul.f32 %v10827_v56, %v239_v54  ;;  %v10831_v63 = vld [vmem:[#allocation76_spill] sm:$0xff] }
 0x2ca   :  { %v3624_v60 = vadd.f32 %v2888_v59, %v1928_v6  ;;  %v3625_v4 = vadd.f32 %v2888_v59, %v1929_v40  ;;  %v2883_v38 = vpop.permute.xlu0 %2882  ;;  %5505 = vmatpush1.bf16.msra.mxu0 %v4472_v5  ;;  %2717 = vperm.xlu1 %6321, %v2211_v32   ;;  %v242_v5 = vld [vmem:[%s10439_s0 + $0x700] sm:$0xff]  ;;  %v243_v32 = vld [vmem:[%s10439_s0 + $0x708] sm:$0xff]  ;;  %v2308_v59 = vld [vmem:[%s10437_s2 + $0x550] sm:$0xff] }
 0x2cb   :  { %v3622_v27 = vadd.f32 %v2883_v38, %v1926_v19  ;;  %v3623_v45 = vadd.f32 %v2883_v38, %v1927_v30  ;;  %2712 = vperm.xlu0 %6320, %v2210_v3   ;;  %v4475_v10 = vpack.c.bf16 %v4045_v29, %v4043_v17  ;;  %v4474_v13 = vpack.c.bf16 %v4044_v33, %v4042_v20  ;;  %v2309_v19 = vld [vmem:[%s10437_s2 + $0x558] sm:$0xff] }
 0x2cc   :  { %v4048_v52 = vmax.f32 %v3624_v60, 0.0  ;;  %v4049_v37 = vmax.f32 %v3625_v4, 0.0  ;;  %v10828_v30 = vld [vmem:[#allocation73_spill] sm:$0xff]  ;;  %v1938_v53 = vmul.f32 %v10829_v46, %v242_v5  ;;  %v1939_v60 = vmul.f32 %v10829_v46, %v243_v32  ;;  %v248_v4 = vld [vmem:[%s10439_s0 + $0x730] sm:$0xff]  ;;  %v10833_v5 = vld [vmem:[#allocation78_spill] sm:$0xff] }
 0x2cd   :  { %v4046_v16 = vmax.f32 %v3622_v27, 0.0  ;;  %v4047_v9 = vmax.f32 %v3623_v45, 0.0  ;;  %5506 = vmatprep.subr.bf16.mxu0 %v4475_v10  ;;  %v2898_v61 = vpop.permute.xlu1 %2897  ;;  %v1940_v50 = vmul.f32 %v10828_v30, %v244_v7  ;;  %v1941_v1 = vmul.f32 %v10828_v30, %v245_v47  ;;  %v249_v38 = vld [vmem:[%s10439_s0 + $0x738] sm:$0xff] }
 0x2ce   :  { %v3628_v25 = vadd.f32 %v2898_v61, %v1932_v14  ;;  %v3629_v0 = vadd.f32 %v2898_v61, %v1933_v15  ;;  %v2893_v57 = vpop.permute.xlu0 %2892  ;;  %5507 = vmatpush1.bf16.msra.mxu0 %v4474_v13  ;;  %3197 = vperm.xlu1 %6321, %v2307_v51   ;;  %v246_v13 = vld [vmem:[%s10439_s0 + $0x720] sm:$0xff]  ;;  %v247_v51 = vld [vmem:[%s10439_s0 + $0x728] sm:$0xff] }
 0x2cf   :  { %v3626_v11 = vadd.f32 %v2893_v57, %v1930_v34  ;;  %v3627_v2 = vadd.f32 %v2893_v57, %v1931_v62  ;;  %3192 = vperm.xlu0 %6320, %v2306_v35   ;;  %v4477_v21 = vpack.c.bf16 %v4049_v37, %v4047_v9  ;;  %v4476_v23 = vpack.c.bf16 %v4048_v52, %v4046_v16  ;;  %v2215_v34 = vld [vmem:[%s10437_s2 + $0x268] sm:$0xff]  ;;  %v2214_v61 = vld [vmem:[%s10437_s2 + $0x260] sm:$0xff]  ;;  %v253_v57 = vld [vmem:[%s10439_s0 + $0x758] sm:$0xff] }
 0x2d0   :  { %v4052_v55 = vmax.f32 %v3628_v25, 0.0  ;;  %v4053_v42 = vmax.f32 %v3629_v0, 0.0  ;;  %v10830_v62 = vld [vmem:[#allocation75_spill] sm:$0xff]  ;;  %v1942_v54 = vmul.f32 %v10831_v63, %v246_v13  ;;  %v1943_v25 = vmul.f32 %v10831_v63, %v247_v51  ;;  %v252_v0 = vld [vmem:[%s10439_s0 + $0x750] sm:$0xff] }
 0x2d1   :  { %v4050_v18 = vmax.f32 %v3626_v11, 0.0  ;;  %v4051_v39 = vmax.f32 %v3627_v2, 0.0  ;;  %5508 = vmatprep.subr.bf16.mxu0 %v4477_v21  ;;  %v2908_v48 = vpop.permute.xlu1 %2907  ;;  %v1944_v44 = vmul.f32 %v10830_v62, %v248_v4  ;;  %v1945_v36 = vmul.f32 %v10830_v62, %v249_v38  ;;  %v10835_v13 = vld [vmem:[#allocation80_spill] sm:$0xff] }
 0x2d2   :  { %v3632_v49 = vadd.f32 %v2908_v48, %v1936_v24  ;;  %v3633_v6 = vadd.f32 %v2908_v48, %v1937_v22  ;;  %v2903_v40 = vpop.permute.xlu0 %2902  ;;  %5509 = vmatpush1.bf16.msra.mxu0 %v4476_v23  ;;  %2727 = vperm.xlu1 %6321, %v2213_v41   ;;  %v250_v23 = vld [vmem:[%s10439_s0 + $0x740] sm:$0xff]  ;;  %v251_v41 = vld [vmem:[%s10439_s0 + $0x748] sm:$0xff] }
 0x2d3   :  { %v3630_v33 = vadd.f32 %v2903_v40, %v1934_v58  ;;  %v3631_v29 = vadd.f32 %v2903_v40, %v1935_v31  ;;  %2722 = vperm.xlu0 %6320, %v2212_v26   ;;  %v4479_v3 = vpack.c.bf16 %v4053_v42, %v4051_v39  ;;  %v4478_v8 = vpack.c.bf16 %v4052_v55, %v4050_v18  ;;  %v2311_v58 = vld [vmem:[%s10437_s2 + $0x568] sm:$0xff]  ;;  %v10832_v31 = vld [vmem:[#allocation77_spill] sm:$0xff]  ;;  %v2310_v48 = vld [vmem:[%s10437_s2 + $0x560] sm:$0xff] }
 0x2d4   :  { %v4056_v20 = vmax.f32 %v3632_v49, 0.0  ;;  %v4057_v17 = vmax.f32 %v3633_v6, 0.0  ;;  %v1948_v7 = vmul.f32 %v10832_v31, %v252_v0  ;;  %v1949_v47 = vmul.f32 %v10832_v31, %v253_v57  ;;  %v256_v6 = vld [vmem:[%s10439_s0 + $0x770] sm:$0xff]  ;;  %v257_v40 = vld [vmem:[%s10439_s0 + $0x778] sm:$0xff] }
 0x2d5   :  { %v4054_v27 = vmax.f32 %v3630_v33, 0.0  ;;  %v4055_v45 = vmax.f32 %v3631_v29, 0.0  ;;  %5510 = vmatprep.subr.bf16.mxu0 %v4479_v3  ;;  %v2918_v10 = vpop.permute.xlu1 %2917  ;;  %v1946_v32 = vmul.f32 %v10833_v5, %v250_v23  ;;  %v1947_v49 = vmul.f32 %v10833_v5, %v251_v41  ;;  %v10837_v23 = vld [vmem:[#allocation82_spill] sm:$0xff] }
 0x2d6   :  { %v3636_v28 = vadd.f32 %v2918_v10, %v1940_v50  ;;  %v3637_v14 = vadd.f32 %v2918_v10, %v1941_v1  ;;  %v2913_v15 = vpop.permute.xlu0 %2912  ;;  %5511 = vmatpush1.bf16.msra.mxu0 %v4478_v8  ;;  %3207 = vperm.xlu1 %6321, %v2309_v19   ;;  %v254_v8 = vld [vmem:[%s10439_s0 + $0x760] sm:$0xff]  ;;  %v255_v19 = vld [vmem:[%s10439_s0 + $0x768] sm:$0xff]  ;;  %v2216_v10 = vld [vmem:[%s10437_s2 + $0x270] sm:$0xff] }
 0x2d7   :  { %v3634_v52 = vadd.f32 %v2913_v15, %v1938_v53  ;;  %v3635_v37 = vadd.f32 %v2913_v15, %v1939_v60  ;;  %3202 = vperm.xlu0 %6320, %v2308_v59   ;;  %v4481_v35 = vpack.c.bf16 %v4057_v17, %v4055_v45  ;;  %v4480_v43 = vpack.c.bf16 %v4056_v20, %v4054_v27  ;;  %v2217_v53 = vld [vmem:[%s10437_s2 + $0x278] sm:$0xff]  ;;  %v10834_v60 = vld [vmem:[#allocation79_spill] sm:$0xff] }
 0x2d8   :  { %v4060_v16 = vmax.f32 %v3636_v28, 0.0  ;;  %v4061_v9 = vmax.f32 %v3637_v14, 0.0  ;;  %v1952_v4 = vmul.f32 %v10834_v60, %v256_v6  ;;  %v1953_v38 = vmul.f32 %v10834_v60, %v257_v40  ;;  %v260_v14 = vld [vmem:[%s10439_s0 + $0x790] sm:$0xff]  ;;  %v261_v15 = vld [vmem:[%s10439_s0 + $0x798] sm:$0xff] }
 0x2d9   :  { %v4058_v11 = vmax.f32 %v3634_v52, 0.0  ;;  %v4059_v2 = vmax.f32 %v3635_v37, 0.0  ;;  %5512 = vmatprep.subr.bf16.mxu0 %v4481_v35  ;;  %v2928_v21 = vpop.permute.xlu1 %2927  ;;  %v1950_v51 = vmul.f32 %v10835_v13, %v254_v8  ;;  %v1951_v28 = vmul.f32 %v10835_v13, %v255_v19  ;;  %v10839_v8 = vld [vmem:[#allocation84_spill] sm:$0xff] }
 0x2da   :  { %v3640_v12 = vadd.f32 %v2928_v21, %v1944_v44  ;;  %v3641_v24 = vadd.f32 %v2928_v21, %v1945_v36  ;;  %v2923_v22 = vpop.permute.xlu0 %2922  ;;  %5513 = vmatpush1.bf16.msra.mxu0 %v4480_v43  ;;  %2737 = vperm.xlu1 %6321, %v2215_v34   ;;  %v258_v43 = vld [vmem:[%s10439_s0 + $0x780] sm:$0xff]  ;;  %v259_v34 = vld [vmem:[%s10439_s0 + $0x788] sm:$0xff]  ;;  %v2312_v21 = vld [vmem:[%s10437_s2 + $0x570] sm:$0xff] }
 0x2db   :  { %v3638_v55 = vadd.f32 %v2923_v22, %v1942_v54  ;;  %v3639_v42 = vadd.f32 %v2923_v22, %v1943_v25  ;;  %2732 = vperm.xlu0 %6320, %v2214_v61   ;;  %v4483_v26 = vpack.c.bf16 %v4061_v9, %v4059_v2  ;;  %v4482_v56 = vpack.c.bf16 %v4060_v16, %v4058_v11  ;;  %v2313_v54 = vld [vmem:[%s10437_s2 + $0x578] sm:$0xff] }
 0x2dc   :  { %v4064_v18 = vmax.f32 %v3640_v12, 0.0  ;;  %v4065_v39 = vmax.f32 %v3641_v24, 0.0  ;;  %v10836_v25 = vld [vmem:[#allocation81_spill] sm:$0xff]  ;;  %v1954_v41 = vmul.f32 %v10837_v23, %v258_v43  ;;  %v1955_v12 = vmul.f32 %v10837_v23, %v259_v34  ;;  %v264_v24 = vld [vmem:[%s10439_s0 + $0x7b0] sm:$0xff]  ;;  %v10841_v43 = vld [vmem:[#allocation86_spill] sm:$0xff] }
 0x2dd   :  { %v4062_v33 = vmax.f32 %v3638_v55, 0.0  ;;  %v4063_v29 = vmax.f32 %v3639_v42, 0.0  ;;  %5514 = vmatprep.subr.bf16.mxu0 %v4483_v26  ;;  %v2938_v3 = vpop.permute.xlu1 %2937  ;;  %v1956_v0 = vmul.f32 %v10836_v25, %v260_v14  ;;  %v1957_v57 = vmul.f32 %v10836_v25, %v261_v15  ;;  %v265_v22 = vld [vmem:[%s10439_s0 + $0x7b8] sm:$0xff] }
 0x2de   :  { %v3644_v30 = vadd.f32 %v2938_v3, %v1948_v7  ;;  %v3645_v50 = vadd.f32 %v2938_v3, %v1949_v47  ;;  %v2933_v1 = vpop.permute.xlu0 %2932  ;;  %5515 = vmatpush1.bf16.msra.mxu0 %v4482_v56  ;;  %3217 = vperm.xlu1 %6321, %v2311_v58   ;;  %v262_v56 = vld [vmem:[%s10439_s0 + $0x7a0] sm:$0xff]  ;;  %v263_v58 = vld [vmem:[%s10439_s0 + $0x7a8] sm:$0xff] }
 0x2df   :  { %v3642_v20 = vadd.f32 %v2933_v1, %v1946_v32  ;;  %v3643_v17 = vadd.f32 %v2933_v1, %v1947_v49  ;;  %3212 = vperm.xlu0 %6320, %v2310_v48   ;;  %v4485_v59 = vpack.c.bf16 %v4065_v39, %v4063_v29  ;;  %v4484_v46 = vpack.c.bf16 %v4064_v18, %v4062_v33  ;;  %v2219_v32 = vld [vmem:[%s10437_s2 + $0x288] sm:$0xff]  ;;  %v2218_v3 = vld [vmem:[%s10437_s2 + $0x280] sm:$0xff]  ;;  %v269_v1 = vld [vmem:[%s10439_s0 + $0x7d8] sm:$0xff] }
 0x2e0   :  { %v4068_v27 = vmax.f32 %v3644_v30, 0.0  ;;  %v4069_v45 = vmax.f32 %v3645_v50, 0.0  ;;  %v10838_v49 = vld [vmem:[#allocation83_spill] sm:$0xff]  ;;  %v1958_v19 = vmul.f32 %v10839_v8, %v262_v56  ;;  %v1959_v30 = vmul.f32 %v10839_v8, %v263_v58  ;;  %v268_v50 = vld [vmem:[%s10439_s0 + $0x7d0] sm:$0xff] }
 0x2e1   :  { %v4066_v52 = vmax.f32 %v3642_v20, 0.0  ;;  %v4067_v37 = vmax.f32 %v3643_v17, 0.0  ;;  %5516 = vmatprep.subr.bf16.mxu0 %v4485_v59  ;;  %v2948_v35 = vpop.permute.xlu1 %2947  ;;  %v1960_v6 = vmul.f32 %v10838_v49, %v264_v24  ;;  %v1961_v40 = vmul.f32 %v10838_v49, %v265_v22  ;;  %v10843_v56 = vld [vmem:[#allocation88_spill] sm:$0xff] }
 0x2e2   :  { %v3648_v62 = vadd.f32 %v2948_v35, %v1952_v4  ;;  %v3649_v44 = vadd.f32 %v2948_v35, %v1953_v38  ;;  %v2943_v36 = vpop.permute.xlu0 %2942  ;;  %5517 = vmatpush1.bf16.msra.mxu0 %v4484_v46  ;;  %2747 = vperm.xlu1 %6321, %v2217_v53   ;;  %v266_v46 = vld [vmem:[%s10439_s0 + $0x7c0] sm:$0xff]  ;;  %v267_v53 = vld [vmem:[%s10439_s0 + $0x7c8] sm:$0xff] }
 0x2e3   :  { %v3646_v16 = vadd.f32 %v2943_v36, %v1950_v51  ;;  %v3647_v9 = vadd.f32 %v2943_v36, %v1951_v28  ;;  %2742 = vperm.xlu0 %6320, %v2216_v10   ;;  %v4487_v61 = vpack.c.bf16 %v4069_v45, %v4067_v37  ;;  %v4486_v63 = vpack.c.bf16 %v4068_v27, %v4066_v52  ;;  %v2315_v51 = vld [vmem:[%s10437_s2 + $0x588] sm:$0xff]  ;;  %v10840_v28 = vld [vmem:[#allocation85_spill] sm:$0xff]  ;;  %v2314_v35 = vld [vmem:[%s10437_s2 + $0x580] sm:$0xff] }
 0x2e4   :  { %v4072_v11 = vmax.f32 %v3648_v62, 0.0  ;;  %v4073_v2 = vmax.f32 %v3649_v44, 0.0  ;;  %v1964_v14 = vmul.f32 %v10840_v28, %v268_v50  ;;  %v1965_v15 = vmul.f32 %v10840_v28, %v269_v1  ;;  %v272_v44 = vld [vmem:[%s10439_s0 + $0x7f0] sm:$0xff]  ;;  %v273_v36 = vld [vmem:[%s10439_s0 + $0x7f8] sm:$0xff]  ;;  %v278_v28 = vld [vmem:[%s10439_s0 + $0x820] sm:$0xff] }
 0x2e5   :  { %v4070_v55 = vmax.f32 %v3646_v16, 0.0  ;;  %v4071_v42 = vmax.f32 %v3647_v9, 0.0  ;;  %5518 = vmatprep.subr.bf16.mxu0 %v4487_v61  ;;  %v2958_v26 = vpop.permute.xlu1 %2957  ;;  %v1962_v34 = vmul.f32 %v10841_v43, %v266_v46  ;;  %v1963_v62 = vmul.f32 %v10841_v43, %v267_v53  ;;  %v6378_v50 = vld [vmem:[%s10438_s3 + $0x78] ss:$56 sps:$4 sm:$0xff]  }
 0x2e6   :  { %v3652_v31 = vadd.f32 %v2958_v26, %v1956_v0  ;;  %v3653_v7 = vadd.f32 %v2958_v26, %v1957_v57  ;;  %v2953_v47 = vpop.permute.xlu0 %2952  ;;  %5519 = vmatpush1.bf16.msra.mxu0 %v4486_v63  ;;  %3227 = vperm.xlu1 %6321, %v2313_v54   ;;  %v270_v63 = vld [vmem:[%s10439_s0 + $0x7e0] sm:$0xff]  ;;  %v271_v54 = vld [vmem:[%s10439_s0 + $0x7e8] sm:$0xff]  ;;  %v2220_v26 = vld [vmem:[%s10437_s2 + $0x290] sm:$0xff] }
 0x2e7   :  { %v3650_v18 = vadd.f32 %v2953_v47, %v1954_v41  ;;  %v3651_v39 = vadd.f32 %v2953_v47, %v1955_v12  ;;  %3222 = vperm.xlu0 %6320, %v2312_v21   ;;  %v4489_v48 = vpack.c.bf16 %v4073_v2, %v4071_v42  ;;  %v4488_v5 = vpack.c.bf16 %v4072_v11, %v4070_v55  ;;  %v2221_v41 = vld [vmem:[%s10437_s2 + $0x298] sm:$0xff]  ;;  %v10842_v12 = vld [vmem:[#allocation87_spill] sm:$0xff]  ;;  %v2316_v53 = vld [vmem:[%s10437_s2 + $0x590] sm:$0xff] }
 0x2e8   :  { %v4076_v33 = vmax.f32 %v3652_v31, 0.0  ;;  %v4077_v29 = vmax.f32 %v3653_v7, 0.0  ;;  %v1968_v24 = vmul.f32 %v10842_v12, %v272_v44  ;;  %v1969_v22 = vmul.f32 %v10842_v12, %v273_v36  ;;  %v276_v7 = vld [vmem:[%s10439_s0 + $0x810] sm:$0xff]  ;;  %v277_v47 = vld [vmem:[%s10439_s0 + $0x818] sm:$0xff]  ;;  %v2223_v44 = vld [vmem:[%s10437_s2 + $0x2a8] sm:$0xff] }
 0x2e9   :  { %v4074_v20 = vmax.f32 %v3650_v18, 0.0  ;;  %v4075_v17 = vmax.f32 %v3651_v39, 0.0  ;;  %5520 = vmatprep.subr.bf16.mxu0 %v4489_v48  ;;  %v2968_v59 = vpop.permute.xlu1 %2967  ;;  %v1966_v58 = vmul.f32 %v10843_v56, %v270_v63  ;;  %v1967_v31 = vmul.f32 %v10843_v56, %v271_v54  ;;  %v10844_v1 = vld [vmem:[#allocation89_spill] sm:$0xff]  ;;  %v10846_v36 = vld [vmem:[#allocation91_spill] sm:$0xff]  ;;  %v2222_v54 = vld [vmem:[%s10437_s2 + $0x2a0] sm:$0xff] }
 0x2ea   :  { %v3656_v60 = vadd.f32 %v2968_v59, %v1960_v6  ;;  %v3657_v4 = vadd.f32 %v2968_v59, %v1961_v40  ;;  %v2963_v38 = vpop.permute.xlu0 %2962  ;;  %5521 = vmatpush1.bf16.msra.mxu0 %v4488_v5  ;;  %2757 = vperm.xlu1 %6321, %v2219_v32   ;;  %v274_v5 = vld [vmem:[%s10439_s0 + $0x800] sm:$0xff]  ;;  %v275_v32 = vld [vmem:[%s10439_s0 + $0x808] sm:$0xff]  ;;  %v6349_v12 = vld [vmem:[%s10438_s3 + $0x18] ss:$56 sps:$4 sm:$0xff]  }
 0x2eb   :  { %v3654_v27 = vadd.f32 %v2963_v38, %v1958_v19  ;;  %v3655_v45 = vadd.f32 %v2963_v38, %v1959_v30  ;;  %2752 = vperm.xlu0 %6320, %v2218_v3   ;;  %v4491_v10 = vpack.c.bf16 %v4077_v29, %v4075_v17  ;;  %v4490_v13 = vpack.c.bf16 %v4076_v33, %v4074_v20  ;;  %v6376_v33 = vld [vmem:[%s10438_s3 + $0x7c] ss:$56 sps:$4 sm:$0xff]   ;;  %v6382_v56 = vld [vmem:[%s10438_s3 + $0xec] ss:$56 sps:$4 sm:$0xff]  }
 0x2ec   :  { %v4080_v52 = vmax.f32 %v3656_v60, 0.0  ;;  %v4081_v37 = vmax.f32 %v3657_v4, 0.0  ;;  %v2317_v30 = vld [vmem:[%s10437_s2 + $0x598] sm:$0xff]  ;;  %v1972_v20 = vmul.f32 %v10844_v1, %v276_v7  ;;  %v1973_v17 = vmul.f32 %v10844_v1, %v277_v47  ;;  %5314 = vmatprep.mubr.bf16.mxu1 %v6376_v33  ;;  %v10845_v60 = vld [vmem:[#allocation90_spill] sm:$0xff] }
 0x2ed   :  { %v4078_v16 = vmax.f32 %v3654_v27, 0.0  ;;  %v4079_v9 = vmax.f32 %v3655_v45, 0.0  ;;  %5522 = vmatprep.subr.bf16.mxu0 %v4491_v10  ;;  %v2978_v61 = vpop.permute.xlu1 %2977  ;;  %v1970_v4 = vmul.f32 %v10845_v60, %v274_v5  ;;  %v1971_v38 = vmul.f32 %v10845_v60, %v275_v32  ;;  %v280_v27 = vld [vmem:[%s10439_s0 + $0x830] sm:$0xff]  ;;  %v281_v45 = vld [vmem:[%s10439_s0 + $0x838] sm:$0xff]  ;;  %5315 = vmatmul.mubr.bf16.gmra.mrb[4].mxu1 %v6378_v50  ;;  %v6384_v33 = vld [vmem:[%s10438_s3 + $0xe8] ss:$56 sps:$4 sm:$0xff]  }
 0x2ee   :  { %v3660_v25 = vadd.f32 %v2978_v61, %v1964_v14  ;;  %v3661_v0 = vadd.f32 %v2978_v61, %v1965_v15  ;;  %v2973_v57 = vpop.permute.xlu0 %2972  ;;  %5523 = vmatpush1.bf16.msra.mxu0 %v4490_v13  ;;  %3237 = vperm.xlu1 %6321, %v2315_v51   ;;  %v279_v14 = vld [vmem:[%s10439_s0 + $0x828] sm:$0xff] }
 0x2ef   :  { %v3658_v11 = vadd.f32 %v2973_v57, %v1962_v34  ;;  %v3659_v2 = vadd.f32 %v2973_v57, %v1963_v62  ;;  %3232 = vperm.xlu0 %6320, %v2314_v35   ;;  %v4493_v21 = vpack.c.bf16 %v4081_v37, %v4079_v9  ;;  %v4492_v23 = vpack.c.bf16 %v4080_v52, %v4078_v16 }
 0x2f0   :  { %v4084_v55 = vmax.f32 %v3660_v25, 0.0  ;;  %v4085_v42 = vmax.f32 %v3661_v0, 0.0  ;;  %v1976_v16 = vmul.f32 %v10846_v36, %v280_v27  ;;  %v1977_v9 = vmul.f32 %v10846_v36, %v281_v45  ;;  %v10847_v25 = vld [vmem:[#allocation92_spill] sm:$0xff]  ;;  %5324 = vmatprep.mubr.bf16.mxu1 %v6382_v56 }
 0x2f1   :  { %v4082_v18 = vmax.f32 %v3658_v11, 0.0  ;;  %v4083_v39 = vmax.f32 %v3659_v2, 0.0  ;;  %5524 = vmatprep.subr.bf16.mxu0 %v4493_v21  ;;  %v2988_v48 = vpop.permute.xlu1 %2987  ;;  %v1974_v0 = vmul.f32 %v10847_v25, %v278_v28  ;;  %v1975_v57 = vmul.f32 %v10847_v25, %v279_v14  ;;  %v284_v11 = vld [vmem:[%s10439_s0 + $0x850] sm:$0xff]  ;;  %v285_v2 = vld [vmem:[%s10439_s0 + $0x858] sm:$0xff] }
 0x2f2   :  { %v3664_v49 = vadd.f32 %v2988_v48, %v1968_v24  ;;  %v3665_v6 = vadd.f32 %v2988_v48, %v1969_v22  ;;  %v2983_v40 = vpop.permute.xlu0 %2982  ;;  %5525 = vmatpush1.bf16.msra.mxu0 %v4492_v23  ;;  %2767 = vperm.xlu1 %6321, %v2221_v41   ;;  %v282_v24 = vld [vmem:[%s10439_s0 + $0x840] sm:$0xff]  ;;  %v283_v22 = vld [vmem:[%s10439_s0 + $0x848] sm:$0xff]  ;;  %v10848_v48 = vld [vmem:[#allocation93_spill] sm:$0xff] }
 0x2f3   :  { %v3662_v29 = vadd.f32 %v2983_v40, %v1966_v58  ;;  %v3663_v3 = vadd.f32 %v2983_v40, %v1967_v31  ;;  %2762 = vperm.xlu0 %6320, %v2220_v26   ;;  %v4495_v8 = vpack.c.bf16 %v4085_v42, %v4083_v39  ;;  %v4494_v19 = vpack.c.bf16 %v4084_v55, %v4082_v18  ;;  %v2319_v18 = vld [vmem:[%s10437_s2 + $0x5a8] sm:$0xff]  ;;  %v2318_v39 = vld [vmem:[%s10437_s2 + $0x5a0] sm:$0xff]  ;;  %v6355_v56 = vld [vmem:[%s10438_s3 + $0xfc] ss:$56 sps:$4 sm:$0xff]  }
 0x2f4   :  { %v4088_v59 = vmax.f32 %v3664_v49, 0.0  ;;  %v4089_v46 = vmax.f32 %v3665_v6, 0.0  ;;  %v1980_v5 = vmul.f32 %v10848_v48, %v284_v11  ;;  %v1981_v32 = vmul.f32 %v10848_v48, %v285_v2  ;;  %v6352_v40 = vld [vmem:[%s10438_s3 + $0x8c] ss:$56 sps:$4 sm:$0xff]  }
 0x2f5   :  { %v4086_v10 = vmax.f32 %v3662_v29, 0.0  ;;  %v4087_v13 = vmax.f32 %v3663_v3, 0.0  ;;  %5526 = vmatprep.subr.bf16.mxu0 %v4495_v8  ;;  %v2998_v51 = vpop.permute.xlu1 %2997  ;;  %v10849_v29 = vld [vmem:[#allocation94_spill] sm:$0xff]  ;;  %5325 = vmatmul.mubr.bf16.gmra.mrb[8].mxu1 %v6384_v33 }
 0x2f6   :  { %v3668_v15 = vadd.f32 %v2998_v51, %v1972_v20  ;;  %v3669_v52 = vadd.f32 %v2998_v51, %v1973_v17  ;;  %v2993_v37 = vpop.permute.xlu0 %2992  ;;  %5527 = vmatpush1.bf16.msra.mxu0 %v4494_v19  ;;  %3247 = vperm.xlu1 %6321, %v2317_v30   ;;  %v1978_v3 = vmul.f32 %v10849_v29, %v282_v24  ;;  %v288_v19 = vld [vmem:[%s10439_s0 + $0x870] sm:$0xff]  ;;  %v289_v30 = vld [vmem:[%s10439_s0 + $0x878] sm:$0xff]  ;;  %v286_v17 = vld [vmem:[%s10439_s0 + $0x860] sm:$0xff] }
 0x2f7   :  { %v3666_v35 = vadd.f32 %v2993_v37, %v1970_v4  ;;  %v3667_v43 = vadd.f32 %v2993_v37, %v1971_v38  ;;  %3242 = vperm.xlu0 %6320, %v2316_v53   ;;  %v4497_v34 = vpack.c.bf16 %v4089_v46, %v4087_v13  ;;  %v4496_v62 = vpack.c.bf16 %v4088_v59, %v4086_v10  ;;  %v287_v59 = vld [vmem:[%s10439_s0 + $0x868] sm:$0xff]  ;;  %v2225_v10 = vld [vmem:[%s10437_s2 + $0x2b8] sm:$0xff]  ;;  %v10851_v37 = vld [vmem:[#allocation96_spill] sm:$0xff] }
 0x2f8   :  { %v4092_v61 = vmax.f32 %v3668_v15, 0.0  ;;  %v4093_v63 = vmax.f32 %v3669_v52, 0.0  ;;  %v1979_v8 = vmul.f32 %v10849_v29, %v283_v22  ;;  %v10850_v13 = vld [vmem:[#allocation95_spill] sm:$0xff]  ;;  %v2224_v52 = vld [vmem:[%s10437_s2 + $0x2b0] sm:$0xff]  ;;  %v10852_v24 = vld [vmem:[#allocation97_spill] sm:$0xff] }
 0x2f9   :  { %v4090_v21 = vmax.f32 %v3666_v35, 0.0  ;;  %v4091_v23 = vmax.f32 %v3667_v43, 0.0  ;;  %5528 = vmatprep.subr.bf16.mxu0 %v4497_v34  ;;  %v3008_v41 = vpop.permute.xlu1 %3007  ;;  %v1984_v51 = vmul.f32 %v10850_v13, %v288_v19  ;;  %v1985_v28 = vmul.f32 %v10850_v13, %v289_v30  ;;  %v292_v34 = vld [vmem:[%s10439_s0 + $0x890] sm:$0xff] }
 0x2fa   :  { %v3672_v55 = vadd.f32 %v3008_v41, %v1976_v16  ;;  %v3673_v42 = vadd.f32 %v3008_v41, %v1977_v9  ;;  %v3003_v26 = vpop.permute.xlu0 %3002  ;;  %5529 = vmatpush1.bf16.msra.mxu0 %v4496_v62  ;;  %2777 = vperm.xlu1 %6321, %v2223_v44   ;;  %v1982_v35 = vmul.f32 %v10851_v37, %v286_v17  ;;  %v293_v62 = vld [vmem:[%s10439_s0 + $0x898] sm:$0xff]  ;;  %v6354_v9 = vld [vmem:[%s10438_s3 + $0x88] ss:$56 sps:$4 sm:$0xff]  }
 0x2fb   :  { %v4498_v58 = vpack.c.bf16 %v4092_v61, %v4090_v21  ;;  %v3670_v31 = vadd.f32 %v3003_v26, %v1974_v0  ;;  %v3671_v7 = vadd.f32 %v3003_v26, %v1975_v57  ;;  %2772 = vperm.xlu0 %6320, %v2222_v54   ;;  %v4499_v47 = vpack.c.bf16 %v4093_v63, %v4091_v23  ;;  %v290_v61 = vld [vmem:[%s10439_s0 + $0x880] sm:$0xff]  ;;  %v291_v63 = vld [vmem:[%s10439_s0 + $0x888] sm:$0xff]  ;;  %v6388_v57 = vld [vmem:[%s10438_s3 + $0x15c] ss:$56 sps:$4 sm:$0xff]  }
 0x2fc   :  { %v4096_v49 = vmax.f32 %v3672_v55, 0.0  ;;  %v4097_v6 = vmax.f32 %v3673_v42, 0.0  ;;  %v1983_v43 = vmul.f32 %v10851_v37, %v287_v59  ;;  %v2321_v41 = vld [vmem:[%s10437_s2 + $0x5b8] sm:$0xff]  ;;  %v1988_v22 = vmul.f32 %v10852_v24, %v292_v34  ;;  %5334 = vmatprep.mubr.bf16.mxu1 %v6388_v57  ;;  %v6358_v57 = vld [vmem:[%s10438_s3 + $0x16c] ss:$56 sps:$4 sm:$0xff]  }
 0x2fd   :  { %v4094_v50 = vmax.f32 %v3670_v31, 0.0  ;;  %v4095_v1 = vmax.f32 %v3671_v7, 0.0  ;;  %5611 = vmatprep.subr.bf16.mxu0 %v4499_v47  ;;  %v3018_v20 = vpop.permute.xlu1 %3017  ;;  %5531 = vmatmul.mubr.bf16.vlgmr.msra.gmra.mrb[0].mxu0 %v6349_v12  ;;  %v2320_v12 = vld [vmem:[%s10437_s2 + $0x5b0] sm:$0xff]  ;;  %v1989_v55 = vmul.f32 %v10852_v24, %v293_v62  ;;  %v10853_v31 = vld [vmem:[#allocation98_spill] sm:$0xff] }
 0x2fe   :  { %v3676_v46 = vadd.f32 %v3018_v20, %v1980_v5  ;;  %v3677_v53 = vadd.f32 %v3018_v20, %v1981_v32  ;;  %v3013_v60 = vpop.permute.xlu0 %3012  ;;  %5612 = vmatpush1.bf16.msra.mxu0 %v4498_v58  ;;  %3257 = vperm.xlu1 %6321, %v2319_v18   ;;  %v6390_v58 = vld [vmem:[%s10438_s3 + $0x158] ss:$56 sps:$4 sm:$0xff]   ;;  %v1986_v7 = vmul.f32 %v10853_v31, %v290_v61 }
 0x2ff   :  { %v4500_v4 = vpack.c.bf16 %v4096_v49, %v4094_v50  ;;  %v3674_v38 = vadd.f32 %v3013_v60, %v1978_v3  ;;  %v3675_v27 = vadd.f32 %v3013_v60, %v1979_v8  ;;  %3252 = vperm.xlu0 %6320, %v2318_v39   ;;  %v4501_v45 = vpack.c.bf16 %v4097_v6, %v4095_v1  ;;  %v296_v18 = vld [vmem:[%s10439_s0 + $0x8b0] sm:$0xff]  ;;  %v297_v39 = vld [vmem:[%s10439_s0 + $0x8b8] sm:$0xff]  ;;  %v294_v49 = vld [vmem:[%s10439_s0 + $0x8a0] sm:$0xff] }
 0x300   :  { %v4100_v14 = vmax.f32 %v3676_v46, 0.0  ;;  %v4101_v15 = vmax.f32 %v3677_v53, 0.0  ;;  %5540 = vmatprep.mubr.bf16.mxu0 %v6352_v40  ;;  %v1987_v47 = vmul.f32 %v10853_v31, %v291_v63  ;;  %v295_v6 = vld [vmem:[%s10439_s0 + $0x8a8] sm:$0xff]  ;;  %v2226_v53 = vld [vmem:[%s10437_s2 + $0x2c0] sm:$0xff]  ;;  %5335 = vmatmul.mubr.bf16.gmra.mrb[12].mxu1 %v6390_v58  ;;  %v10855_v60 = vld [vmem:[#allocation100_spill] sm:$0xff] }
 0x301   :  { %v4098_v44 = vmax.f32 %v3674_v38, 0.0  ;;  %v4099_v36 = vmax.f32 %v3675_v27, 0.0  ;;  %5613 = vmatprep.subr.bf16.mxu0 %v4501_v45  ;;  %v3028_v16 = vpop.permute.xlu1 %3027  ;;  %v2227_v50 = vld [vmem:[%s10437_s2 + $0x2c8] sm:$0xff]  ;;  %v1991_v38 = vmul.f32 %v10855_v60, %v295_v6  ;;  %v300_v27 = vld [vmem:[%s10439_s0 + $0x8d0] sm:$0xff]  ;;  %v301_v45 = vld [vmem:[%s10439_s0 + $0x8d8] sm:$0xff] }
 0x302   :  { %v3680_v54 = vadd.f32 %v3028_v16, %v1984_v51  ;;  %v3681_v25 = vadd.f32 %v3028_v16, %v1985_v28  ;;  %v3023_v0 = vpop.permute.xlu0 %3022  ;;  %5614 = vmatpush1.bf16.msra.mxu0 %v4500_v4  ;;  %2787 = vperm.xlu1 %6321, %v2225_v10   ;;  %v10854_v1 = vld [vmem:[#allocation99_spill] sm:$0xff]  ;;  %v1990_v4 = vmul.f32 %v10855_v60, %v294_v49  ;;  %v6357_v28 = vld [vmem:[%s10438_s3 + $0xf8] ss:$56 sps:$4 sm:$0xff]  }
 0x303   :  { %v4502_v11 = vpack.c.bf16 %v4100_v14, %v4098_v44  ;;  %v3678_v2 = vadd.f32 %v3023_v0, %v1982_v35  ;;  %v3679_v21 = vadd.f32 %v3023_v0, %v1983_v43  ;;  %2782 = vperm.xlu0 %6320, %v2224_v52   ;;  %v4503_v23 = vpack.c.bf16 %v4101_v15, %v4099_v36  ;;  %v298_v14 = vld [vmem:[%s10439_s0 + $0x8c0] sm:$0xff]  ;;  %v299_v15 = vld [vmem:[%s10439_s0 + $0x8c8] sm:$0xff]  ;;  %v10856_v61 = vld [vmem:[#allocation101_spill] sm:$0xff] }
 0x304   :  { %v4104_v42 = vmax.f32 %v3680_v54, 0.0  ;;  %v4105_v26 = vmax.f32 %v3681_v25, 0.0  ;;  %v1992_v20 = vmul.f32 %v10854_v1, %v296_v18  ;;  %v1993_v17 = vmul.f32 %v10854_v1, %v297_v39  ;;  %v6394_v43 = vld [vmem:[%s10438_s3 + $0x1cc] ss:$56 sps:$4 sm:$0xff]  }
 0x305   :  { %v4102_v48 = vmax.f32 %v3678_v2, 0.0  ;;  %v4103_v5 = vmax.f32 %v3679_v21, 0.0  ;;  %5615 = vmatprep.subr.bf16.mxu0 %v4503_v23  ;;  %v3038_v32 = vpop.permute.xlu1 %3037  ;;  %5541 = vmatmul.mubr.bf16.gmra.mrb[4].mxu0 %v6354_v9  ;;  %v2323_v16 = vld [vmem:[%s10437_s2 + $0x5c8] sm:$0xff]  ;;  %v2322_v9 = vld [vmem:[%s10437_s2 + $0x5c0] sm:$0xff]  ;;  %v1996_v63 = vmul.f32 %v10856_v61, %v300_v27  ;;  %v1997_v54 = vmul.f32 %v10856_v61, %v301_v45 }
 0x306   :  { %v3684_v40 = vadd.f32 %v3038_v32, %v1988_v22  ;;  %v3685_v33 = vadd.f32 %v3038_v32, %v1989_v55  ;;  %v3033_v29 = vpop.permute.xlu0 %3032  ;;  %5616 = vmatpush1.bf16.msra.mxu0 %v4502_v11  ;;  %3267 = vperm.xlu1 %6321, %v2321_v41   ;;  %v6396_v11 = vld [vmem:[%s10438_s3 + $0x1c8] ss:$56 sps:$4 sm:$0xff]   ;;  %v304_v41 = vld [vmem:[%s10439_s0 + $0x8f0] sm:$0xff] }
 0x307   :  { %v4504_v3 = vpack.c.bf16 %v4104_v42, %v4102_v48  ;;  %v3682_v8 = vadd.f32 %v3033_v29, %v1986_v7  ;;  %v3683_v19 = vadd.f32 %v3033_v29, %v1987_v47  ;;  %3262 = vperm.xlu0 %6320, %v2320_v12   ;;  %v4505_v30 = vpack.c.bf16 %v4105_v26, %v4103_v5  ;;  %v10857_v2 = vld [vmem:[#allocation102_spill] sm:$0xff]  ;;  %v305_v12 = vld [vmem:[%s10439_s0 + $0x8f8] sm:$0xff]  ;;  %v303_v26 = vld [vmem:[%s10439_s0 + $0x8e8] sm:$0xff] }
 0x308   :  { %v4108_v59 = vmax.f32 %v3684_v40, 0.0  ;;  %v4109_v46 = vmax.f32 %v3685_v33, 0.0  ;;  %5550 = vmatprep.mubr.bf16.mxu0 %v6355_v56  ;;  %5344 = vmatprep.mubr.bf16.mxu1 %v6394_v43  ;;  %v1994_v21 = vmul.f32 %v10857_v2, %v298_v14  ;;  %v1995_v23 = vmul.f32 %v10857_v2, %v299_v15  ;;  %v302_v42 = vld [vmem:[%s10439_s0 + $0x8e0] sm:$0xff]  ;;  %v2229_v48 = vld [vmem:[%s10437_s2 + $0x2d8] sm:$0xff]  ;;  %v10858_v5 = vld [vmem:[#allocation103_spill] sm:$0xff] }
 0x309   :  { %v4106_v10 = vmax.f32 %v3682_v8, 0.0  ;;  %v4107_v13 = vmax.f32 %v3683_v19, 0.0  ;;  %5617 = vmatprep.subr.bf16.mxu0 %v4505_v30  ;;  %v3048_v51 = vpop.permute.xlu1 %3047  ;;  %v2000_v32 = vmul.f32 %v10858_v5, %v304_v41  ;;  %v2001_v49 = vmul.f32 %v10858_v5, %v305_v12  ;;  %v2228_v33 = vld [vmem:[%s10437_s2 + $0x2d0] sm:$0xff]  ;;  %5345 = vmatmul.mubr.bf16.gmra.mrb[16].mxu1 %v6396_v11  ;;  %v309_v30 = vld [vmem:[%s10439_s0 + $0x918] sm:$0xff] }
 0x30a   :  { %v3688_v52 = vadd.f32 %v3048_v51, %v1992_v20  ;;  %v3689_v37 = vadd.f32 %v3048_v51, %v1993_v17  ;;  %v3043_v35 = vpop.permute.xlu0 %3042  ;;  %5618 = vmatpush1.bf16.msra.mxu0 %v4504_v3  ;;  %2797 = vperm.xlu1 %6321, %v2227_v50   ;;  %v10859_v29 = vld [vmem:[#allocation104_spill] sm:$0xff]  ;;  %v6360_v17 = vld [vmem:[%s10438_s3 + $0x168] ss:$56 sps:$4 sm:$0xff]   ;;  %v2325_v51 = vld [vmem:[%s10437_s2 + $0x5d8] sm:$0xff] }
 0x30b   :  { %v4506_v34 = vpack.c.bf16 %v4108_v59, %v4106_v10  ;;  %v3686_v62 = vadd.f32 %v3043_v35, %v1990_v4  ;;  %v3687_v44 = vadd.f32 %v3043_v35, %v1991_v38  ;;  %2792 = vperm.xlu0 %6320, %v2226_v53   ;;  %v4507_v36 = vpack.c.bf16 %v4109_v46, %v4107_v13  ;;  %v308_v19 = vld [vmem:[%s10439_s0 + $0x910] sm:$0xff]  ;;  %v306_v59 = vld [vmem:[%s10439_s0 + $0x900] sm:$0xff]  ;;  %v307_v46 = vld [vmem:[%s10439_s0 + $0x908] sm:$0xff] }
 0x30c   :  { %v4112_v25 = vmax.f32 %v3688_v52, 0.0  ;;  %v4113_v0 = vmax.f32 %v3689_v37, 0.0  ;;  %v1998_v3 = vmul.f32 %v10859_v29, %v302_v42  ;;  %v1999_v8 = vmul.f32 %v10859_v29, %v303_v26  ;;  %v6400_v38 = vld [vmem:[%s10438_s3 + $0x23c] ss:$56 sps:$4 sm:$0xff]  }
 0x30d   :  { %v4110_v24 = vmax.f32 %v3686_v62, 0.0  ;;  %v4111_v22 = vmax.f32 %v3687_v44, 0.0  ;;  %5619 = vmatprep.subr.bf16.mxu0 %v4507_v36  ;;  %v3058_v55 = vpop.permute.xlu1 %3057  ;;  %5551 = vmatmul.mubr.bf16.gmra.mrb[8].mxu0 %v6357_v28  ;;  %v2324_v28 = vld [vmem:[%s10437_s2 + $0x5d0] sm:$0xff]  ;;  %v10860_v14 = vld [vmem:[#allocation105_spill] sm:$0xff]  ;;  %v10861_v62 = vld [vmem:[#allocation106_spill] sm:$0xff] }
 0x30e   :  { %v3692_v56 = vadd.f32 %v3058_v55, %v1996_v63  ;;  %v3693_v58 = vadd.f32 %v3058_v55, %v1997_v54  ;;  %v3053_v31 = vpop.permute.xlu0 %3052  ;;  %5620 = vmatpush1.bf16.msra.mxu0 %v4506_v34  ;;  %3277 = vperm.xlu1 %6321, %v2323_v16   ;;  %v2004_v15 = vmul.f32 %v10860_v14, %v308_v19  ;;  %v6361_v43 = vld [vmem:[%s10438_s3 + $0x1dc] ss:$56 sps:$4 sm:$0xff]   ;;  %v6402_v34 = vld [vmem:[%s10438_s3 + $0x238] ss:$56 sps:$4 sm:$0xff]  }
 0x30f   :  { %v4508_v7 = vpack.c.bf16 %v4112_v25, %v4110_v24  ;;  %v3690_v47 = vadd.f32 %v3053_v31, %v1994_v21  ;;  %v3691_v18 = vadd.f32 %v3053_v31, %v1995_v23  ;;  %3272 = vperm.xlu0 %6320, %v2322_v9   ;;  %v4509_v39 = vpack.c.bf16 %v4113_v0, %v4111_v22  ;;  %v312_v16 = vld [vmem:[%s10439_s0 + $0x930] sm:$0xff]  ;;  %v313_v9 = vld [vmem:[%s10439_s0 + $0x938] sm:$0xff]  ;;  %v310_v25 = vld [vmem:[%s10439_s0 + $0x920] sm:$0xff] }
 0x310   :  { %v4116_v6 = vmax.f32 %v3692_v56, 0.0  ;;  %v4117_v40 = vmax.f32 %v3693_v58, 0.0  ;;  %5560 = vmatprep.mubr.bf16.mxu0 %v6358_v57  ;;  %v2005_v52 = vmul.f32 %v10860_v14, %v309_v30  ;;  %5354 = vmatprep.mubr.bf16.mxu1 %v6400_v38  ;;  %v2002_v44 = vmul.f32 %v10861_v62, %v306_v59  ;;  %v311_v0 = vld [vmem:[%s10439_s0 + $0x928] sm:$0xff]  ;;  %v2230_v58 = vld [vmem:[%s10437_s2 + $0x2e0] sm:$0xff]  ;;  %v10863_v31 = vld [vmem:[#allocation108_spill] sm:$0xff] }
 0x311   :  { %v4114_v50 = vmax.f32 %v3690_v47, 0.0  ;;  %v4115_v1 = vmax.f32 %v3691_v18, 0.0  ;;  %5621 = vmatprep.subr.bf16.mxu0 %v4509_v39  ;;  %v3068_v20 = vpop.permute.xlu1 %3067  ;;  %v2003_v36 = vmul.f32 %v10861_v62, %v307_v46  ;;  %v2231_v24 = vld [vmem:[%s10437_s2 + $0x2e8] sm:$0xff]  ;;  %5355 = vmatmul.mubr.bf16.gmra.mrb[20].mxu1 %v6402_v34  ;;  %v2007_v47 = vmul.f32 %v10863_v31, %v311_v0  ;;  %v316_v18 = vld [vmem:[%s10439_s0 + $0x950] sm:$0xff]  ;;  %v317_v39 = vld [vmem:[%s10439_s0 + $0x958] sm:$0xff] }
 0x312   :  { %v3696_v53 = vadd.f32 %v3068_v20, %v2000_v32  ;;  %v3697_v60 = vadd.f32 %v3068_v20, %v2001_v49  ;;  %v3063_v4 = vpop.permute.xlu0 %3062  ;;  %5622 = vmatpush1.bf16.msra.mxu0 %v4508_v7  ;;  %2807 = vperm.xlu1 %6321, %v2229_v48   ;;  %v10862_v22 = vld [vmem:[#allocation107_spill] sm:$0xff]  ;;  %v2006_v7 = vmul.f32 %v10863_v31, %v310_v25  ;;  %v6363_v49 = vld [vmem:[%s10438_s3 + $0x1d8] ss:$56 sps:$4 sm:$0xff]  }
 0x313   :  { %v4510_v27 = vpack.c.bf16 %v4116_v6, %v4114_v50  ;;  %v3694_v45 = vadd.f32 %v3063_v4, %v1998_v3  ;;  %v3695_v10 = vadd.f32 %v3063_v4, %v1999_v8  ;;  %2802 = vperm.xlu0 %6320, %v2228_v33   ;;  %v4511_v13 = vpack.c.bf16 %v4117_v40, %v4115_v1  ;;  %v314_v6 = vld [vmem:[%s10439_s0 + $0x940] sm:$0xff]  ;;  %v315_v40 = vld [vmem:[%s10439_s0 + $0x948] sm:$0xff]  ;;  %v10864_v59 = vld [vmem:[#allocation109_spill] sm:$0xff] }
 0x314   :  { %v4120_v37 = vmax.f32 %v3696_v53, 0.0  ;;  %v4121_v35 = vmax.f32 %v3697_v60, 0.0  ;;  %v2008_v55 = vmul.f32 %v10862_v22, %v312_v16  ;;  %v2009_v42 = vmul.f32 %v10862_v22, %v313_v9  ;;  %v6406_v8 = vld [vmem:[%s10438_s3 + $0x2ac] ss:$56 sps:$4 sm:$0xff]  }
 0x315   :  { %v4118_v61 = vmax.f32 %v3694_v45, 0.0  ;;  %v4119_v63 = vmax.f32 %v3695_v10, 0.0  ;;  %5623 = vmatprep.subr.bf16.mxu0 %v4511_v13  ;;  %v3078_v54 = vpop.permute.xlu1 %3077  ;;  %5561 = vmatmul.mubr.bf16.gmra.mrb[12].mxu0 %v6360_v17  ;;  %v2327_v20 = vld [vmem:[%s10437_s2 + $0x5e8] sm:$0xff]  ;;  %v2326_v17 = vld [vmem:[%s10437_s2 + $0x5e0] sm:$0xff]  ;;  %v2012_v46 = vmul.f32 %v10864_v59, %v316_v18  ;;  %v2013_v53 = vmul.f32 %v10864_v59, %v317_v39 }
 0x316   :  { %v3700_v57 = vadd.f32 %v3078_v54, %v2004_v15  ;;  %v3701_v11 = vadd.f32 %v3078_v54, %v2005_v52  ;;  %v3073_v2 = vpop.permute.xlu0 %3072  ;;  %5624 = vmatpush1.bf16.msra.mxu0 %v4510_v27  ;;  %3287 = vperm.xlu1 %6321, %v2325_v51   ;;  %v6364_v38 = vld [vmem:[%s10438_s3 + $0x24c] ss:$56 sps:$4 sm:$0xff]   ;;  %v6408_v27 = vld [vmem:[%s10438_s3 + $0x2a8] ss:$56 sps:$4 sm:$0xff]   ;;  %v320_v51 = vld [vmem:[%s10439_s0 + $0x970] sm:$0xff] }
 0x317   :  { %v4512_v21 = vpack.c.bf16 %v4120_v37, %v4118_v61  ;;  %v3698_v23 = vadd.f32 %v3073_v2, %v2002_v44  ;;  %v3699_v41 = vadd.f32 %v3073_v2, %v2003_v36  ;;  %3282 = vperm.xlu0 %6320, %v2324_v28   ;;  %v4513_v12 = vpack.c.bf16 %v4121_v35, %v4119_v63  ;;  %v10865_v45 = vld [vmem:[#allocation110_spill] sm:$0xff]  ;;  %v321_v28 = vld [vmem:[%s10439_s0 + $0x978] sm:$0xff]  ;;  %v319_v35 = vld [vmem:[%s10439_s0 + $0x968] sm:$0xff] }
 0x318   :  { %v4124_v26 = vmax.f32 %v3700_v57, 0.0  ;;  %v4125_v56 = vmax.f32 %v3701_v11, 0.0  ;;  %5570 = vmatprep.mubr.bf16.mxu0 %v6361_v43  ;;  %5364 = vmatprep.mubr.bf16.mxu1 %v6406_v8  ;;  %v2010_v10 = vmul.f32 %v10865_v45, %v314_v6  ;;  %v2011_v13 = vmul.f32 %v10865_v45, %v315_v40  ;;  %v318_v37 = vld [vmem:[%s10439_s0 + $0x960] sm:$0xff]  ;;  %v2233_v61 = vld [vmem:[%s10437_s2 + $0x2f8] sm:$0xff]  ;;  %v10866_v63 = vld [vmem:[#allocation111_spill] sm:$0xff] }
 0x319   :  { %v4122_v48 = vmax.f32 %v3698_v23, 0.0  ;;  %v4123_v5 = vmax.f32 %v3699_v41, 0.0  ;;  %5625 = vmatprep.subr.bf16.mxu0 %v4513_v12  ;;  %v3088_v32 = vpop.permute.xlu1 %3087  ;;  %v2016_v54 = vmul.f32 %v10866_v63, %v320_v51  ;;  %v2017_v25 = vmul.f32 %v10866_v63, %v321_v28  ;;  %v2232_v11 = vld [vmem:[%s10437_s2 + $0x2f0] sm:$0xff]  ;;  %5365 = vmatmul.mubr.bf16.gmra.mrb[24].mxu1 %v6408_v27  ;;  %v325_v12 = vld [vmem:[%s10439_s0 + $0x998] sm:$0xff] }
 0x31a   :  { %v3704_v33 = vadd.f32 %v3088_v32, %v2008_v55  ;;  %v3705_v29 = vadd.f32 %v3088_v32, %v2009_v42  ;;  %v3083_v3 = vpop.permute.xlu0 %3082  ;;  %5626 = vmatpush1.bf16.msra.mxu0 %v4512_v21  ;;  %2817 = vperm.xlu1 %6321, %v2231_v24   ;;  %v10867_v2 = vld [vmem:[#allocation112_spill] sm:$0xff]  ;;  %v6366_v42 = vld [vmem:[%s10438_s3 + $0x248] ss:$56 sps:$4 sm:$0xff]   ;;  %v2329_v32 = vld [vmem:[%s10437_s2 + $0x5f8] sm:$0xff] }
 0x31b   :  { %v4514_v19 = vpack.c.bf16 %v4124_v26, %v4122_v48  ;;  %v3702_v30 = vadd.f32 %v3083_v3, %v2006_v7  ;;  %v3703_v50 = vadd.f32 %v3083_v3, %v2007_v47  ;;  %2812 = vperm.xlu0 %6320, %v2230_v58   ;;  %v4515_v1 = vpack.c.bf16 %v4125_v56, %v4123_v5  ;;  %v324_v41 = vld [vmem:[%s10439_s0 + $0x990] sm:$0xff]  ;;  %v322_v26 = vld [vmem:[%s10439_s0 + $0x980] sm:$0xff]  ;;  %v323_v56 = vld [vmem:[%s10439_s0 + $0x988] sm:$0xff] }
 0x31c   :  { %v4128_v60 = vmax.f32 %v3704_v33, 0.0  ;;  %v4129_v4 = vmax.f32 %v3705_v29, 0.0  ;;  %v2014_v21 = vmul.f32 %v10867_v2, %v318_v37  ;;  %v2015_v23 = vmul.f32 %v10867_v2, %v319_v35  ;;  %v6412_v47 = vld [vmem:[%s10438_s3 + $0x31c] ss:$56 sps:$4 sm:$0xff]  }
 0x31d   :  { %v4126_v14 = vmax.f32 %v3702_v30, 0.0  ;;  %v4127_v15 = vmax.f32 %v3703_v50, 0.0  ;;  %5627 = vmatprep.subr.bf16.mxu0 %v4515_v1  ;;  %v3098_v52 = vpop.permute.xlu1 %3097  ;;  %5571 = vmatmul.mubr.bf16.gmra.mrb[16].mxu0 %v6363_v49  ;;  %v2328_v49 = vld [vmem:[%s10437_s2 + $0x5f0] sm:$0xff]  ;;  %v10868_v6 = vld [vmem:[#allocation113_spill] sm:$0xff]  ;;  %v10869_v30 = vld [vmem:[#allocation114_spill] sm:$0xff] }
 0x31e   :  { %v3708_v43 = vadd.f32 %v3098_v52, %v2012_v46  ;;  %v3709_v34 = vadd.f32 %v3098_v52, %v2013_v53  ;;  %v3093_v62 = vpop.permute.xlu0 %3092  ;;  %5628 = vmatpush1.bf16.msra.mxu0 %v4514_v19  ;;  %3297 = vperm.xlu1 %6321, %v2327_v20   ;;  %v2020_v40 = vmul.f32 %v10868_v6, %v324_v41  ;;  %v6367_v8 = vld [vmem:[%s10438_s3 + $0x2bc] ss:$56 sps:$4 sm:$0xff]   ;;  %v6414_v19 = vld [vmem:[%s10438_s3 + $0x318] ss:$56 sps:$4 sm:$0xff]  }
 0x31f   :  { %v4516_v44 = vpack.c.bf16 %v4128_v60, %v4126_v14  ;;  %v3706_v36 = vadd.f32 %v3093_v62, %v2010_v10  ;;  %v3707_v16 = vadd.f32 %v3093_v62, %v2011_v13  ;;  %3292 = vperm.xlu0 %6320, %v2326_v17   ;;  %v4517_v9 = vpack.c.bf16 %v4129_v4, %v4127_v15  ;;  %v328_v20 = vld [vmem:[%s10439_s0 + $0x9b0] sm:$0xff]  ;;  %v329_v17 = vld [vmem:[%s10439_s0 + $0x9b8] sm:$0xff]  ;;  %v326_v60 = vld [vmem:[%s10439_s0 + $0x9a0] sm:$0xff] }
 0x320   :  { %v4132_v0 = vmax.f32 %v3708_v43, 0.0  ;;  %v4133_v57 = vmax.f32 %v3709_v34, 0.0  ;;  %5580 = vmatprep.mubr.bf16.mxu0 %v6364_v38  ;;  %v2021_v33 = vmul.f32 %v10868_v6, %v325_v12  ;;  %5374 = vmatprep.mubr.bf16.mxu1 %v6412_v47  ;;  %v2018_v50 = vmul.f32 %v10869_v30, %v322_v26  ;;  %v327_v4 = vld [vmem:[%s10439_s0 + $0x9a8] sm:$0xff]  ;;  %v2330_v34 = vld [vmem:[%s10437_s2 + $0x600] sm:$0xff]  ;;  %v10871_v62 = vld [vmem:[#allocation116_spill] sm:$0xff] }
 0x321   :  { %v4130_v24 = vmax.f32 %v3706_v36, 0.0  ;;  %v4131_v22 = vmax.f32 %v3707_v16, 0.0  ;;  %5629 = vmatprep.subr.bf16.mxu0 %v4517_v9  ;;  %v3108_v55 = vpop.permute.xlu1 %3107  ;;  %v2019_v1 = vmul.f32 %v10869_v30, %v323_v56  ;;  %v2331_v14 = vld [vmem:[%s10437_s2 + $0x608] sm:$0xff]  ;;  %5375 = vmatmul.mubr.bf16.gmra.mrb[28].mxu1 %v6414_v19  ;;  %v2023_v36 = vmul.f32 %v10871_v62, %v327_v4  ;;  %v332_v16 = vld [vmem:[%s10439_s0 + $0x9d0] sm:$0xff]  ;;  %v333_v9 = vld [vmem:[%s10439_s0 + $0x9d8] sm:$0xff] }
 0x322   :  { %v3712_v58 = vadd.f32 %v3108_v55, %v2016_v54  ;;  %v3713_v31 = vadd.f32 %v3108_v55, %v2017_v25  ;;  %v3103_v7 = vpop.permute.xlu0 %3102  ;;  %5630 = vmatpush1.bf16.msra.mxu0 %v4516_v44  ;;  %2827 = vperm.xlu1 %6321, %v2233_v61   ;;  %v10870_v15 = vld [vmem:[#allocation115_spill] sm:$0xff]  ;;  %v2022_v44 = vmul.f32 %v10871_v62, %v326_v60  ;;  %v6369_v25 = vld [vmem:[%s10438_s3 + $0x2b8] ss:$56 sps:$4 sm:$0xff]  }
 0x323   :  { %v4518_v18 = vpack.c.bf16 %v4132_v0, %v4130_v24  ;;  %v3710_v39 = vadd.f32 %v3103_v7, %v2014_v21  ;;  %v3711_v48 = vadd.f32 %v3103_v7, %v2015_v23  ;;  %2822 = vperm.xlu0 %6320, %v2232_v11   ;;  %v4519_v5 = vpack.c.bf16 %v4133_v57, %v4131_v22  ;;  %v330_v0 = vld [vmem:[%s10439_s0 + $0x9c0] sm:$0xff]  ;;  %v331_v57 = vld [vmem:[%s10439_s0 + $0x9c8] sm:$0xff]  ;;  %v2333_v55 = vld [vmem:[%s10437_s2 + $0x618] sm:$0xff] }
 0x324   :  { %v4136_v29 = vmax.f32 %v3712_v58, 0.0  ;;  %v4137_v3 = vmax.f32 %v3713_v31, 0.0  ;;  %v2024_v52 = vmul.f32 %v10870_v15, %v328_v20  ;;  %v2025_v37 = vmul.f32 %v10870_v15, %v329_v17  ;;  %v6420_v23 = vld [vmem:[%s10438_s3 + $0x14] ss:$56 sps:$4 sm:$0xff]  }
 0x325   :  { %v4134_v59 = vmax.f32 %v3710_v39, 0.0  ;;  %v4135_v46 = vmax.f32 %v3711_v48, 0.0  ;;  %5631 = vmatprep.subr.bf16.mxu0 %v4519_v5  ;;  %v3118_v53 = vpop.permute.xlu1 %3117  ;;  %5581 = vmatmul.mubr.bf16.gmra.mrb[20].mxu0 %v6366_v42  ;;  %v10872_v42 = vld [vmem:[#allocation117_spill] sm:$0xff]  ;;  %v2332_v7 = vld [vmem:[%s10437_s2 + $0x610] sm:$0xff]  ;;  %v6370_v47 = vld [vmem:[%s10438_s3 + $0x32c] ss:$56 sps:$4 sm:$0xff]  }
 0x326   :  { %v3716_v38 = vadd.f32 %v3118_v53, %v2020_v40  ;;  %v3717_v27 = vadd.f32 %v3118_v53, %v2021_v33  ;;  %v3113_v45 = vpop.permute.xlu0 %3112  ;;  %5632 = vmatpush1.bf16.msra.mxu0 %v4518_v18  ;;  %3307 = vperm.xlu1 %6321, %v2329_v32   ;;  %v2028_v26 = vmul.f32 %v10872_v42, %v332_v16  ;;  %v10873_v18 = vld [vmem:[#allocation118_spill] sm:$0xff]  ;;  %v336_v5 = vld [vmem:[%s10439_s0 + $0x9f0] sm:$0xff]  ;;  %v337_v32 = vld [vmem:[%s10439_s0 + $0x9f8] sm:$0xff] }
 0x327   :  { %v4520_v10 = vpack.c.bf16 %v4136_v29, %v4134_v59  ;;  %v3714_v13 = vadd.f32 %v3113_v45, %v2018_v50  ;;  %v3715_v51 = vadd.f32 %v3113_v45, %v2019_v1  ;;  %3302 = vperm.xlu0 %6320, %v2328_v49   ;;  %v4521_v28 = vpack.c.bf16 %v4137_v3, %v4135_v46  ;;  %v334_v33 = vld [vmem:[%s10439_s0 + $0x9e0] sm:$0xff]  ;;  %v335_v29 = vld [vmem:[%s10439_s0 + $0x9e8] sm:$0xff] }
 0x328   :  { %v4140_v35 = vmax.f32 %v3716_v38, 0.0  ;;  %v4141_v43 = vmax.f32 %v3717_v27, 0.0  ;;  %5590 = vmatprep.mubr.bf16.mxu0 %v6367_v8  ;;  %v2029_v56 = vmul.f32 %v10872_v42, %v333_v9  ;;  %5417 = vmatprep.mubr.bf16.mxu1 %v6420_v23  ;;  %v2026_v39 = vmul.f32 %v10873_v18, %v330_v0  ;;  %v2335_v17 = vld [vmem:[%s10437_s2 + $0x628] sm:$0xff]  ;;  %v2334_v38 = vld [vmem:[%s10437_s2 + $0x620] sm:$0xff]  ;;  %v10875_v27 = vld [vmem:[#allocation120_spill] sm:$0xff] }
 0x329   :  { %v4138_v61 = vmax.f32 %v3714_v13, 0.0  ;;  %v4139_v63 = vmax.f32 %v3715_v51, 0.0  ;;  %5633 = vmatprep.subr.bf16.mxu0 %v4521_v28  ;;  %v3128_v54 = vpop.permute.xlu1 %3127  ;;  %v2027_v48 = vmul.f32 %v10873_v18, %v331_v57  ;;  %v10874_v59 = vld [vmem:[#allocation119_spill] sm:$0xff]  ;;  %v2030_v45 = vmul.f32 %v10875_v27, %v334_v33  ;;  %v340_v13 = vld [vmem:[%s10439_s0 + $0xa10] sm:$0xff]  ;;  %v341_v51 = vld [vmem:[%s10439_s0 + $0xa18] sm:$0xff] }
 0x32a   :  { %v3720_v11 = vadd.f32 %v3128_v54, %v2024_v52  ;;  %v3721_v2 = vadd.f32 %v3128_v54, %v2025_v37  ;;  %v3123_v21 = vpop.permute.xlu0 %3122  ;;  %5634 = vmatpush1.bf16.msra.mxu0 %v4520_v10  ;;  %3317 = vperm.xlu1 %6321, %v2331_v14   ;;  %v2032_v46 = vmul.f32 %v10874_v59, %v336_v5  ;;  %v6372_v52 = vld [vmem:[%s10438_s3 + $0x328] ss:$56 sps:$4 sm:$0xff]  }
 0x32b   :  { %v4522_v41 = vpack.c.bf16 %v4140_v35, %v4138_v61  ;;  %v3718_v12 = vadd.f32 %v3123_v21, %v2022_v44  ;;  %v3719_v24 = vadd.f32 %v3123_v21, %v2023_v36  ;;  %3312 = vperm.xlu0 %6320, %v2330_v34   ;;  %v4523_v22 = vpack.c.bf16 %v4141_v43, %v4139_v63  ;;  %v338_v37 = vld [vmem:[%s10439_s0 + $0xa00] sm:$0xff]  ;;  %v339_v35 = vld [vmem:[%s10439_s0 + $0xa08] sm:$0xff]  ;;  %v2337_v61 = vld [vmem:[%s10437_s2 + $0x638] sm:$0xff] }
 0x32c   :  { %v4144_v58 = vmax.f32 %v3720_v11, 0.0  ;;  %v4145_v31 = vmax.f32 %v3721_v2, 0.0  ;;  %v2033_v53 = vmul.f32 %v10874_v59, %v337_v32  ;;  %v2031_v10 = vmul.f32 %v10875_v27, %v335_v29  ;;  %v10876_v63 = vld [vmem:[#allocation121_spill] sm:$0xff]  ;;  %v2336_v11 = vld [vmem:[%s10437_s2 + $0x630] sm:$0xff]  ;;  %v10877_v21 = vld [vmem:[#allocation122_spill] sm:$0xff] }
 0x32d   :  { %v4142_v49 = vmax.f32 %v3718_v12, 0.0  ;;  %v4143_v6 = vmax.f32 %v3719_v24, 0.0  ;;  %5635 = vmatprep.subr.bf16.mxu0 %v4523_v22  ;;  %v3138_v40 = vpop.permute.xlu1 %3137  ;;  %5591 = vmatmul.mubr.bf16.gmra.mrb[24].mxu0 %v6369_v25  ;;  %v2036_v54 = vmul.f32 %v10876_v63, %v340_v13  ;;  %v2037_v25 = vmul.f32 %v10876_v63, %v341_v51  ;;  %v6375_v2 = vld [vmem:[%s10438_s3 + $0x24] ss:$56 sps:$4 sm:$0xff]   ;;  %v344_v12 = vld [vmem:[%s10439_s0 + $0xa30] sm:$0xff]  ;;  %v2339_v5 = vld [vmem:[%s10437_s2 + $0x648] sm:$0xff] }
 0x32e   :  { %v3724_v3 = vadd.f32 %v3138_v40, %v2028_v26  ;;  %v3725_v8 = vadd.f32 %v3138_v40, %v2029_v56  ;;  %v3133_v19 = vpop.permute.xlu0 %3132  ;;  %5636 = vmatpush1.bf16.msra.mxu0 %v4522_v41  ;;  %3327 = vperm.xlu1 %6321, %v2333_v55   ;;  %v2034_v23 = vmul.f32 %v10877_v21, %v338_v37  ;;  %v345_v24 = vld [vmem:[%s10439_s0 + $0xa38] sm:$0xff]  ;;  %v342_v26 = vld [vmem:[%s10439_s0 + $0xa20] sm:$0xff]  ;;  %v343_v56 = vld [vmem:[%s10439_s0 + $0xa28] sm:$0xff] }
 0x32f   :  { %v4524_v30 = vpack.c.bf16 %v4144_v58, %v4142_v49  ;;  %v3722_v50 = vadd.f32 %v3133_v19, %v2026_v39  ;;  %v3723_v1 = vadd.f32 %v3133_v19, %v2027_v48  ;;  %3322 = vperm.xlu0 %6320, %v2332_v7   ;;  %v4525_v20 = vpack.c.bf16 %v4145_v31, %v4143_v6  ;;  %v10878_v32 = vld [vmem:[#allocation123_spill] sm:$0xff]  ;;  %v2338_v29 = vld [vmem:[%s10437_s2 + $0x640] sm:$0xff]  ;;  %v2341_v51 = vld [vmem:[%s10437_s2 + $0x658] sm:$0xff] }
 0x330   :  { %v4148_v60 = vmax.f32 %v3724_v3, 0.0  ;;  %v4149_v4 = vmax.f32 %v3725_v8, 0.0  ;;  %5600 = vmatprep.mubr.bf16.mxu0 %v6370_v47  ;;  %v2035_v41 = vmul.f32 %v10877_v21, %v339_v35  ;;  %v2040_v49 = vmul.f32 %v10878_v32, %v344_v12  ;;  %v10879_v3 = vld [vmem:[#allocation124_spill] sm:$0xff]  ;;  %v6373_v59 = vld [vmem:[%s10438_s3 + $0x20] ss:$56 sps:$4 sm:$0xff]   ;;  %v2343_v12 = vld [vmem:[%s10437_s2 + $0x668] sm:$0xff] }
 0x331   :  { %v4146_v28 = vmax.f32 %v3722_v50, 0.0  ;;  %v4147_v14 = vmax.f32 %v3723_v1, 0.0  ;;  %5637 = vmatprep.subr.bf16.mxu0 %v4525_v20  ;;  %v3148_v15 = vpop.permute.xlu1 %3147  ;;  %v2041_v6 = vmul.f32 %v10878_v32, %v345_v24  ;;  %v2038_v8 = vmul.f32 %v10879_v3, %v342_v26  ;;  %v349_v50 = vld [vmem:[%s10439_s0 + $0xa58] sm:$0xff]  ;;  %v2340_v35 = vld [vmem:[%s10437_s2 + $0x650] sm:$0xff]  ;;  %v10882_v24 = vld [vmem:[#allocation31_spill] sm:$0xff] }
 0x332   :  { %v3728_v43 = vadd.f32 %v3148_v15, %v2032_v46  ;;  %v3729_v34 = vadd.f32 %v3148_v15, %v2033_v53  ;;  %v3143_v62 = vpop.permute.xlu0 %3142  ;;  %5638 = vmatpush1.bf16.msra.mxu0 %v4524_v30  ;;  %3337 = vperm.xlu1 %6321, %v2335_v17   ;;  %v2039_v19 = vmul.f32 %v10879_v3, %v343_v56  ;;  %v348_v30 = vld [vmem:[%s10439_s0 + $0xa50] sm:$0xff]  ;;  %v346_v46 = vld [vmem:[%s10439_s0 + $0xa40] sm:$0xff]  ;;  %v347_v53 = vld [vmem:[%s10439_s0 + $0xa48] sm:$0xff] }
 0x333   :  { %v4526_v44 = vpack.c.bf16 %v4148_v60, %v4146_v28  ;;  %v3726_v36 = vadd.f32 %v3143_v62, %v2030_v45  ;;  %v3727_v16 = vadd.f32 %v3143_v62, %v2031_v10  ;;  %3332 = vperm.xlu0 %6320, %v2334_v38   ;;  %v4527_v9 = vpack.c.bf16 %v4149_v4, %v4147_v14  ;;  %v10880_v28 = vld [vmem:[#allocation125_spill] sm:$0xff]  ;;  %v2342_v56 = vld [vmem:[%s10437_s2 + $0x660] sm:$0xff]  ;;  %v6381_v32 = vld [vmem:[%s10438_s3 + $0x90] ss:$56 sps:$4 sm:$0xff]  }
 0x334   :  { %v4152_v0 = vmax.f32 %v3728_v43, 0.0  ;;  %v4153_v57 = vmax.f32 %v3729_v34, 0.0  ;;  %v2044_v14 = vmul.f32 %v10880_v28, %v348_v30  ;;  %v2045_v15 = vmul.f32 %v10880_v28, %v349_v50  ;;  %v6379_v43 = vld [vmem:[%s10438_s3 + $0x94] ss:$56 sps:$4 sm:$0xff]   ;;  %v161_v62 = vld [vmem:[%s10439_s0 + $0x478] sm:$0xff] }
 0x335   :  { %v4150_v22 = vmax.f32 %v3726_v36, 0.0  ;;  %v4151_v55 = vmax.f32 %v3727_v16, 0.0  ;;  %5639 = vmatprep.subr.bf16.mxu0 %v4527_v9  ;;  %v3158_v42 = vpop.permute.xlu1 %3157  ;;  %5601 = vmatmul.mubr.bf16.gmra.mrb[28].mxu0 %v6372_v52  ;;  %v160_v34 = vld [vmem:[%s10439_s0 + $0x470] sm:$0xff]  ;;  %v2345_v50 = vld [vmem:[%s10437_s2 + $0x678] sm:$0xff] }
 0x336   :  { %v3732_v58 = vadd.f32 %v3158_v42, %v2036_v54  ;;  %v3733_v31 = vadd.f32 %v3158_v42, %v2037_v25  ;;  %v3153_v7 = vpop.permute.xlu0 %3152  ;;  %5640 = vmatpush1.bf16.msra.mxu0 %v4526_v44  ;;  %3347 = vperm.xlu1 %6321, %v2337_v61   ;;  %v10881_v44 = vld [vmem:[#allocation126_spill] sm:$0xff]  ;;  %v159_v25 = vld [vmem:[%s10439_s0 + $0x468] sm:$0xff] }
 0x337   :  { %v4528_v47 = vpack.c.bf16 %v4152_v0, %v4150_v22  ;;  %v3730_v18 = vadd.f32 %v3153_v7, %v2034_v23  ;;  %v3731_v39 = vadd.f32 %v3153_v7, %v2035_v41  ;;  %3342 = vperm.xlu0 %6320, %v2336_v11   ;;  %v4529_v48 = vpack.c.bf16 %v4153_v57, %v4151_v55  ;;  %v158_v54 = vld [vmem:[%s10439_s0 + $0x460] sm:$0xff] }
 0x338   :  { %v4156_v40 = vmax.f32 %v3732_v58, 0.0  ;;  %v4157_v33 = vmax.f32 %v3733_v31, 0.0  ;;  %5643 = vmatprep.mubr.bf16.mxu0 %v6375_v2  ;;  %v2042_v36 = vmul.f32 %v10881_v44, %v346_v46  ;;  %v2043_v16 = vmul.f32 %v10881_v44, %v347_v53  ;;  %v10883_v58 = vld [vmem:[#allocation32_spill] sm:$0xff] }
 0x339   :  { %v4154_v1 = vmax.f32 %v3730_v18, 0.0  ;;  %v4155_v20 = vmax.f32 %v3731_v39, 0.0  ;;  %5641 = vmatprep.subr.bf16.mxu0 %v4529_v48  ;;  %v3168_v17 = vpop.permute.xlu1 %3167  ;;  %v1856_v22 = vmul.f32 %v10882_v24, %v160_v34  ;;  %v1857_v55 = vmul.f32 %v10882_v24, %v161_v62  ;;  %v353_v18 = vld [vmem:[%s10439_s0 + $0xa78] sm:$0xff]  ;;  %v2344_v53 = vld [vmem:[%s10437_s2 + $0x670] sm:$0xff] }
 0x33a   :  { %v3736_v60 = vadd.f32 %v3168_v17, %v2040_v49  ;;  %v3737_v4 = vadd.f32 %v3168_v17, %v2041_v6  ;;  %v3163_v38 = vpop.permute.xlu0 %3162  ;;  %5642 = vmatpush1.bf16.msra.mxu0 %v4528_v47  ;;  %3357 = vperm.xlu1 %6321, %v2339_v5   ;;  %v1854_v31 = vmul.f32 %v10883_v58, %v158_v54  ;;  %v352_v47 = vld [vmem:[%s10439_s0 + $0xa70] sm:$0xff]  ;;  %v350_v49 = vld [vmem:[%s10439_s0 + $0xa60] sm:$0xff]  ;;  %v351_v6 = vld [vmem:[%s10439_s0 + $0xa68] sm:$0xff] }
 0x33b   :  { %v4530_v27 = vpack.c.bf16 %v4156_v40, %v4154_v1  ;;  %v3734_v45 = vadd.f32 %v3163_v38, %v2038_v8  ;;  %v3735_v10 = vadd.f32 %v3163_v38, %v2039_v19  ;;  %3352 = vperm.xlu0 %6320, %v2338_v29   ;;  %v4531_v13 = vpack.c.bf16 %v4157_v33, %v4155_v20  ;;  %v10884_v1 = vld [vmem:[#allocation127_spill] sm:$0xff]  ;;  %v165_v38 = vld [vmem:[%s10439_s0 + $0x498] sm:$0xff] }
 0x33c   :  { %v4160_v52 = vmax.f32 %v3736_v60, 0.0  ;;  %v4161_v37 = vmax.f32 %v3737_v4, 0.0  ;;  %v1855_v7 = vmul.f32 %v10883_v58, %v159_v25  ;;  %v2048_v20 = vmul.f32 %v10884_v1, %v352_v47  ;;  %v6385_v60 = vld [vmem:[%s10438_s3 + $0x104] ss:$56 sps:$4 sm:$0xff]   ;;  %v164_v4 = vld [vmem:[%s10439_s0 + $0x490] sm:$0xff] }
 0x33d   :  { %v4158_v9 = vmax.f32 %v3734_v45, 0.0  ;;  %v4159_v61 = vmax.f32 %v3735_v10, 0.0  ;;  %5724 = vmatprep.subr.bf16.mxu0 %v4531_v13  ;;  %v3178_v63 = vpop.permute.xlu1 %3177  ;;  %5644 = vmatmul.mubr.bf16.vlgmr.msra.gmra.mrb[0].mxu0 %v6373_v59  ;;  %v2049_v17 = vmul.f32 %v10884_v1, %v353_v18  ;;  %v2346_v25 = vld [vmem:[%s10437_s2 + $0x680] sm:$0xff]  ;;  %v2349_v18 = vld [vmem:[%s10437_s2 + $0x698] sm:$0xff] }
 0x33e   :  { %v3740_v0 = vadd.f32 %v3178_v63, %v2044_v14  ;;  %v3741_v57 = vadd.f32 %v3178_v63, %v2045_v15  ;;  %v3173_v11 = vpop.permute.xlu0 %3172  ;;  %5725 = vmatpush1.bf16.msra.mxu0 %v4530_v27  ;;  %3367 = vperm.xlu1 %6321, %v2341_v51   ;;  %v10885_v27 = vld [vmem:[#allocation128_spill] sm:$0xff]  ;;  %v162_v14 = vld [vmem:[%s10439_s0 + $0x480] sm:$0xff]  ;;  %v163_v15 = vld [vmem:[%s10439_s0 + $0x488] sm:$0xff] }
 0x33f   :  { %v4532_v2 = vpack.c.bf16 %v4160_v52, %v4158_v9  ;;  %v3738_v21 = vadd.f32 %v3173_v11, %v2042_v36  ;;  %v3739_v23 = vadd.f32 %v3173_v11, %v2043_v16  ;;  %3362 = vperm.xlu0 %6320, %v2340_v35   ;;  %v4533_v41 = vpack.c.bf16 %v4161_v37, %v4159_v61  ;;  %v2347_v36 = vld [vmem:[%s10437_s2 + $0x688] sm:$0xff]  ;;  %v10886_v16 = vld [vmem:[#allocation33_spill] sm:$0xff] }
 0x340   :  { %v4164_v42 = vmax.f32 %v3740_v0, 0.0  ;;  %v4165_v26 = vmax.f32 %v3741_v57, 0.0  ;;  %5653 = vmatprep.mubr.bf16.mxu0 %v6379_v43  ;;  %v2046_v45 = vmul.f32 %v10885_v27, %v350_v49  ;;  %v2047_v10 = vmul.f32 %v10885_v27, %v351_v6  ;;  %v10887_v0 = vld [vmem:[#allocation34_spill] sm:$0xff]  ;;  %v2348_v6 = vld [vmem:[%s10437_s2 + $0x690] sm:$0xff] }
 0x341   :  { %v4162_v39 = vmax.f32 %v3738_v21, 0.0  ;;  %v4163_v48 = vmax.f32 %v3739_v23, 0.0  ;;  %5726 = vmatprep.subr.bf16.mxu0 %v4533_v41  ;;  %v2708_v5 = vpop.permute.xlu1 %2707  ;;  %v1860_v9 = vmul.f32 %v10886_v16, %v164_v4  ;;  %v1861_v61 = vmul.f32 %v10886_v16, %v165_v38  ;;  %v357_v21 = vld [vmem:[%s10439_s0 + $0xa98] sm:$0xff]  ;;  %v359_v16 = vld [vmem:[%s10439_s0 + $0xaa8] sm:$0xff] }
 0x342   :  { %v3552_v40 = vadd.f32 %v2708_v5, %v1856_v22  ;;  %v3553_v33 = vadd.f32 %v2708_v5, %v1857_v55  ;;  %v2703_v29 = vpop.permute.xlu0 %2702  ;;  %5727 = vmatpush1.bf16.msra.mxu0 %v4532_v2  ;;  %3377 = vperm.xlu1 %6321, %v2343_v12   ;;  %v1858_v57 = vmul.f32 %v10887_v0, %v162_v14  ;;  %v356_v2 = vld [vmem:[%s10439_s0 + $0xa90] sm:$0xff]  ;;  %v6387_v24 = vld [vmem:[%s10438_s3 + $0x100] ss:$56 sps:$4 sm:$0xff]   ;;  %v355_v55 = vld [vmem:[%s10439_s0 + $0xa88] sm:$0xff] }
 0x343   :  { %v4534_v3 = vpack.c.bf16 %v4164_v42, %v4162_v39  ;;  %v3550_v8 = vadd.f32 %v2703_v29, %v1854_v31  ;;  %v3551_v19 = vadd.f32 %v2703_v29, %v1855_v7  ;;  %3372 = vperm.xlu0 %6320, %v2342_v56   ;;  %v4535_v30 = vpack.c.bf16 %v4165_v26, %v4163_v48  ;;  %v354_v22 = vld [vmem:[%s10439_s0 + $0xa80] sm:$0xff]  ;;  %v10888_v39 = vld [vmem:[#allocation129_spill] sm:$0xff]  ;;  %v10891_v14 = vld [vmem:[#allocation36_spill] sm:$0xff] }
 0x344   :  { %v3976_v59 = vmax.f32 %v3552_v40, 0.0  ;;  %v3977_v46 = vmax.f32 %v3553_v33, 0.0  ;;  %v1859_v11 = vmul.f32 %v10887_v0, %v163_v15  ;;  %v2052_v48 = vmul.f32 %v10888_v39, %v356_v2  ;;  %v6391_v40 = vld [vmem:[%s10438_s3 + $0x174] ss:$56 sps:$4 sm:$0xff]   ;;  %v169_v29 = vld [vmem:[%s10439_s0 + $0x4b8] sm:$0xff] }
 0x345   :  { %v3974_v13 = vmax.f32 %v3550_v8, 0.0  ;;  %v3975_v51 = vmax.f32 %v3551_v19, 0.0  ;;  %5728 = vmatprep.subr.bf16.mxu0 %v4535_v30  ;;  %v3188_v28 = vpop.permute.xlu1 %3187  ;;  %5654 = vmatmul.mubr.bf16.gmra.mrb[4].mxu0 %v6381_v32  ;;  %v2053_v5 = vmul.f32 %v10888_v39, %v357_v21  ;;  %v168_v33 = vld [vmem:[%s10439_s0 + $0x4b0] sm:$0xff]  ;;  %v10892_v2 = vld [vmem:[#allocation131_spill] sm:$0xff] }
 0x346   :  { %v3744_v52 = vadd.f32 %v3188_v28, %v2048_v20  ;;  %v3745_v37 = vadd.f32 %v3188_v28, %v2049_v17  ;;  %v3183_v35 = vpop.permute.xlu0 %3182  ;;  %5729 = vmatpush1.bf16.msra.mxu0 %v4534_v3  ;;  %3387 = vperm.xlu1 %6321, %v2345_v50   ;;  %v10889_v3 = vld [vmem:[#allocation130_spill] sm:$0xff]  ;;  %v167_v17 = vld [vmem:[%s10439_s0 + $0x4a8] sm:$0xff] }
 0x347   :  { %v4440_v43 = vpack.c.bf16 %v3976_v59, %v3974_v13  ;;  %v3742_v34 = vadd.f32 %v3183_v35, %v2046_v45  ;;  %v3743_v62 = vadd.f32 %v3183_v35, %v2047_v10  ;;  %3382 = vperm.xlu0 %6320, %v2344_v53   ;;  %v4441_v44 = vpack.c.bf16 %v3977_v46, %v3975_v51  ;;  %v166_v20 = vld [vmem:[%s10439_s0 + $0x4a0] sm:$0xff]  ;;  %v10890_v45 = vld [vmem:[#allocation35_spill] sm:$0xff]  ;;  %v361_v35 = vld [vmem:[%s10439_s0 + $0xab8] sm:$0xff] }
 0x348   :  { %v4168_v63 = vmax.f32 %v3744_v52, 0.0  ;;  %v4169_v54 = vmax.f32 %v3745_v37, 0.0  ;;  %5663 = vmatprep.mubr.bf16.mxu0 %v6385_v60  ;;  %v2050_v8 = vmul.f32 %v10889_v3, %v354_v22  ;;  %v2051_v19 = vmul.f32 %v10889_v3, %v355_v55  ;;  %v360_v37 = vld [vmem:[%s10439_s0 + $0xab0] sm:$0xff]  ;;  %v173_v22 = vld [vmem:[%s10439_s0 + $0x4d8] sm:$0xff] }
 0x349   :  { %v4166_v23 = vmax.f32 %v3742_v34, 0.0  ;;  %v4167_v41 = vmax.f32 %v3743_v62, 0.0  ;;  %5391 = vmatprep.subr.bf16.mxu1 %v4441_v44  ;;  %v2718_v12 = vpop.permute.xlu1 %2717  ;;  %v1864_v10 = vmul.f32 %v10890_v45, %v168_v33  ;;  %v1865_v13 = vmul.f32 %v10890_v45, %v169_v29  ;;  %v6393_v44 = vld [vmem:[%s10438_s3 + $0x170] ss:$56 sps:$4 sm:$0xff]  }
 0x34a   :  { %v3556_v42 = vadd.f32 %v2718_v12, %v1860_v9  ;;  %v3557_v26 = vadd.f32 %v2718_v12, %v1861_v61  ;;  %v2713_v56 = vpop.permute.xlu0 %2712  ;;  %5392 = vmatpush1.bf16.msra.mxu1 %v4440_v43  ;;  %3397 = vperm.xlu1 %6321, %v2347_v36   ;;  %v1862_v15 = vmul.f32 %v10891_v14, %v166_v20  ;;  %v358_v36 = vld [vmem:[%s10439_s0 + $0xaa0] sm:$0xff]  ;;  %v10893_v55 = vld [vmem:[#allocation132_spill] sm:$0xff]  ;;  %v365_v20 = vld [vmem:[%s10439_s0 + $0xad8] sm:$0xff] }
 0x34b   :  { %v4536_v58 = vpack.c.bf16 %v4168_v63, %v4166_v23  ;;  %v3554_v31 = vadd.f32 %v2713_v56, %v1858_v57  ;;  %v3555_v7 = vadd.f32 %v2713_v56, %v1859_v11  ;;  %3392 = vperm.xlu0 %6320, %v2346_v25   ;;  %v4537_v47 = vpack.c.bf16 %v4169_v54, %v4167_v41  ;;  %v6397_v54 = vld [vmem:[%s10438_s3 + $0x1e4] ss:$56 sps:$4 sm:$0xff]  }
 0x34c   :  { %v3980_v32 = vmax.f32 %v3556_v42, 0.0  ;;  %v3981_v49 = vmax.f32 %v3557_v26, 0.0  ;;  %v1863_v52 = vmul.f32 %v10891_v14, %v167_v17  ;;  %v2056_v21 = vmul.f32 %v10892_v2, %v360_v37 }
 0x34d   :  { %v3978_v30 = vmax.f32 %v3554_v31, 0.0  ;;  %v3979_v50 = vmax.f32 %v3555_v7, 0.0  ;;  %5730 = vmatprep.subr.bf16.mxu0 %v4537_v47  ;;  %v3198_v1 = vpop.permute.xlu1 %3197  ;;  %5664 = vmatmul.mubr.bf16.gmra.mrb[8].mxu0 %v6387_v24  ;;  %v2057_v23 = vmul.f32 %v10892_v2, %v361_v35  ;;  %v172_v24 = vld [vmem:[%s10439_s0 + $0x4d0] sm:$0xff]  ;;  %v2054_v42 = vmul.f32 %v10893_v55, %v358_v36  ;;  %v170_v7 = vld [vmem:[%s10439_s0 + $0x4c0] sm:$0xff]  ;;  %v171_v47 = vld [vmem:[%s10439_s0 + $0x4c8] sm:$0xff] }
 0x34e   :  { %v3748_v59 = vadd.f32 %v3198_v1, %v2052_v48  ;;  %v3749_v46 = vadd.f32 %v3198_v1, %v2053_v5  ;;  %v3193_v53 = vpop.permute.xlu0 %3192  ;;  %5731 = vmatpush1.bf16.msra.mxu0 %v4536_v58  ;;  %3407 = vperm.xlu1 %6321, %v2349_v18   ;;  %v2055_v26 = vmul.f32 %v10893_v55, %v359_v16  ;;  %v364_v1 = vld [vmem:[%s10439_s0 + $0xad0] sm:$0xff] }
 0x34f   :  { %v4442_v60 = vpack.c.bf16 %v3980_v32, %v3978_v30  ;;  %v3746_v4 = vadd.f32 %v3193_v53, %v2050_v8  ;;  %v3747_v38 = vadd.f32 %v3193_v53, %v2051_v19  ;;  %3402 = vperm.xlu0 %6320, %v2348_v6   ;;  %v4443_v27 = vpack.c.bf16 %v3981_v49, %v3979_v50  ;;  %v10895_v19 = vld [vmem:[#allocation38_spill] sm:$0xff] }
 0x350   :  { %v4172_v51 = vmax.f32 %v3748_v59, 0.0  ;;  %v4173_v28 = vmax.f32 %v3749_v46, 0.0  ;;  %5673 = vmatprep.mubr.bf16.mxu0 %v6391_v40  ;;  %v10894_v40 = vld [vmem:[#allocation37_spill] sm:$0xff]  ;;  %v1866_v30 = vmul.f32 %v10895_v19, %v170_v7  ;;  %v1867_v50 = vmul.f32 %v10895_v19, %v171_v47 }
 0x351   :  { %v4170_v43 = vmax.f32 %v3746_v4, 0.0  ;;  %v4171_v34 = vmax.f32 %v3747_v38, 0.0  ;;  %5393 = vmatprep.subr.bf16.mxu1 %v4443_v27  ;;  %v2728_v62 = vpop.permute.xlu1 %2727  ;;  %v1868_v33 = vmul.f32 %v10894_v40, %v172_v24  ;;  %v1869_v29 = vmul.f32 %v10894_v40, %v173_v22  ;;  %v6399_v53 = vld [vmem:[%s10438_s3 + $0x1e0] ss:$56 sps:$4 sm:$0xff]   ;;  %v363_v4 = vld [vmem:[%s10439_s0 + $0xac8] sm:$0xff] }
 0x352   :  { %v3560_v9 = vadd.f32 %v2728_v62, %v1864_v10  ;;  %v3561_v61 = vadd.f32 %v2728_v62, %v1865_v13  ;;  %v2723_v63 = vpop.permute.xlu0 %2722  ;;  %5394 = vmatpush1.bf16.msra.mxu1 %v4442_v60  ;;  %v362_v60 = vld [vmem:[%s10439_s0 + $0xac0] sm:$0xff]  ;;  %v6403_v10 = vld [vmem:[%s10438_s3 + $0x254] ss:$56 sps:$4 sm:$0xff]   ;;  %v177_v62 = vld [vmem:[%s10439_s0 + $0x4f8] sm:$0xff] }
 0x353   :  { %v4538_v25 = vpack.c.bf16 %v4172_v51, %v4170_v43  ;;  %v3558_v0 = vadd.f32 %v2723_v63, %v1862_v15  ;;  %v3559_v57 = vadd.f32 %v2723_v63, %v1863_v52  ;;  %v4539_v11 = vpack.c.bf16 %v4173_v28, %v4171_v34  ;;  %v10896_v15 = vld [vmem:[#allocation133_spill] sm:$0xff]  ;;  %v176_v34 = vld [vmem:[%s10439_s0 + $0x4f0] sm:$0xff] }
 0x354   :  { %v3984_v41 = vmax.f32 %v3560_v9, 0.0  ;;  %v3985_v12 = vmax.f32 %v3561_v61, 0.0  ;;  %v2060_v52 = vmul.f32 %v10896_v15, %v364_v1  ;;  %v2061_v37 = vmul.f32 %v10896_v15, %v365_v20  ;;  %v369_v7 = vld [vmem:[%s10439_s0 + $0xaf8] sm:$0xff] }
 0x355   :  { %v3982_v56 = vmax.f32 %v3558_v0, 0.0  ;;  %v3983_v58 = vmax.f32 %v3559_v57, 0.0  ;;  %5732 = vmatprep.subr.bf16.mxu0 %v4539_v11  ;;  %v3208_v31 = vpop.permute.xlu1 %3207  ;;  %5674 = vmatmul.mubr.bf16.gmra.mrb[12].mxu0 %v6393_v44  ;;  %v10897_v44 = vld [vmem:[#allocation134_spill] sm:$0xff] }
 0x356   :  { %v3752_v18 = vadd.f32 %v3208_v31, %v2056_v21  ;;  %v3753_v39 = vadd.f32 %v3208_v31, %v2057_v23  ;;  %v3203_v48 = vpop.permute.xlu0 %3202  ;;  %5733 = vmatpush1.bf16.msra.mxu0 %v4538_v25  ;;  %5683 = vmatprep.mubr.bf16.mxu0 %v6397_v54  ;;  %v2058_v36 = vmul.f32 %v10897_v44, %v362_v60  ;;  %v174_v54 = vld [vmem:[%s10439_s0 + $0x4e0] sm:$0xff]  ;;  %v175_v25 = vld [vmem:[%s10439_s0 + $0x4e8] sm:$0xff]  ;;  %v368_v31 = vld [vmem:[%s10439_s0 + $0xaf0] sm:$0xff] }
 0x357   :  { %v4444_v5 = vpack.c.bf16 %v3984_v41, %v3982_v56  ;;  %v3750_v32 = vadd.f32 %v3203_v48, %v2054_v42  ;;  %v3751_v49 = vadd.f32 %v3203_v48, %v2055_v26  ;;  %v4445_v6 = vpack.c.bf16 %v3985_v12, %v3983_v58  ;;  %v10898_v12 = vld [vmem:[#allocation39_spill] sm:$0xff]  ;;  %v10899_v26 = vld [vmem:[#allocation40_spill] sm:$0xff] }
 0x358   :  { %v4176_v3 = vmax.f32 %v3752_v18, 0.0  ;;  %v4177_v8 = vmax.f32 %v3753_v39, 0.0  ;;  %v2059_v16 = vmul.f32 %v10897_v44, %v363_v4  ;;  %v1872_v24 = vmul.f32 %v10898_v12, %v176_v34  ;;  %v6405_v48 = vld [vmem:[%s10438_s3 + $0x250] ss:$56 sps:$4 sm:$0xff]  }
 0x359   :  { %v4174_v17 = vmax.f32 %v3750_v32, 0.0  ;;  %v4175_v59 = vmax.f32 %v3751_v49, 0.0  ;;  %5395 = vmatprep.subr.bf16.mxu1 %v4445_v6  ;;  %v2738_v46 = vpop.permute.xlu1 %2737  ;;  %v1873_v22 = vmul.f32 %v10898_v12, %v177_v62  ;;  %v1870_v56 = vmul.f32 %v10899_v26, %v174_v54  ;;  %v367_v32 = vld [vmem:[%s10439_s0 + $0xae8] sm:$0xff]  ;;  %v373_v54 = vld [vmem:[%s10439_s0 + $0xb18] sm:$0xff] }
 0x35a   :  { %v3564_v38 = vadd.f32 %v2738_v46, %v1868_v33  ;;  %v3565_v27 = vadd.f32 %v2738_v46, %v1869_v29  ;;  %v2733_v45 = vpop.permute.xlu0 %2732  ;;  %5396 = vmatpush1.bf16.msra.mxu1 %v4444_v5  ;;  %v1871_v58 = vmul.f32 %v10899_v26, %v175_v25  ;;  %v366_v5 = vld [vmem:[%s10439_s0 + $0xae0] sm:$0xff]  ;;  %v181_v46 = vld [vmem:[%s10439_s0 + $0x518] sm:$0xff] }
 0x35b   :  { %v4540_v13 = vpack.c.bf16 %v4176_v3, %v4174_v17  ;;  %v3562_v51 = vadd.f32 %v2733_v45, %v1866_v30  ;;  %v3563_v28 = vadd.f32 %v2733_v45, %v1867_v50  ;;  %v4541_v14 = vpack.c.bf16 %v4177_v8, %v4175_v59  ;;  %v6409_v33 = vld [vmem:[%s10438_s3 + $0x2c4] ss:$56 sps:$4 sm:$0xff]   ;;  %v10900_v30 = vld [vmem:[#allocation135_spill] sm:$0xff]  ;;  %v180_v59 = vld [vmem:[%s10439_s0 + $0x510] sm:$0xff] }
 0x35c   :  { %v3988_v35 = vmax.f32 %v3564_v38, 0.0  ;;  %v3989_v43 = vmax.f32 %v3565_v27, 0.0  ;;  %v2064_v50 = vmul.f32 %v10900_v30, %v368_v31  ;;  %v2065_v1 = vmul.f32 %v10900_v30, %v369_v7 }
 0x35d   :  { %v3986_v9 = vmax.f32 %v3562_v51, 0.0  ;;  %v3987_v61 = vmax.f32 %v3563_v28, 0.0  ;;  %5734 = vmatprep.subr.bf16.mxu0 %v4541_v14  ;;  %v3218_v63 = vpop.permute.xlu1 %3217  ;;  %5684 = vmatmul.mubr.bf16.gmra.mrb[16].mxu0 %v6399_v53  ;;  %v10901_v53 = vld [vmem:[#allocation136_spill] sm:$0xff] }
 0x35e   :  { %v3756_v0 = vadd.f32 %v3218_v63, %v2060_v52  ;;  %v3757_v57 = vadd.f32 %v3218_v63, %v2061_v37  ;;  %v3213_v11 = vpop.permute.xlu0 %3212  ;;  %5735 = vmatpush1.bf16.msra.mxu0 %v4540_v13  ;;  %5693 = vmatprep.mubr.bf16.mxu0 %v6403_v10  ;;  %v2062_v60 = vmul.f32 %v10901_v53, %v366_v5  ;;  %v178_v10 = vld [vmem:[%s10439_s0 + $0x500] sm:$0xff]  ;;  %v179_v13 = vld [vmem:[%s10439_s0 + $0x508] sm:$0xff]  ;;  %v372_v63 = vld [vmem:[%s10439_s0 + $0xb10] sm:$0xff] }
 0x35f   :  { %v4446_v2 = vpack.c.bf16 %v3988_v35, %v3986_v9  ;;  %v3754_v21 = vadd.f32 %v3213_v11, %v2058_v36  ;;  %v3755_v23 = vadd.f32 %v3213_v11, %v2059_v16  ;;  %v4447_v41 = vpack.c.bf16 %v3989_v43, %v3987_v61  ;;  %v10902_v43 = vld [vmem:[#allocation41_spill] sm:$0xff]  ;;  %v10903_v16 = vld [vmem:[#allocation42_spill] sm:$0xff] }
 0x360   :  { %v4180_v55 = vmax.f32 %v3756_v0, 0.0  ;;  %v4181_v42 = vmax.f32 %v3757_v57, 0.0  ;;  %v2063_v4 = vmul.f32 %v10901_v53, %v367_v32  ;;  %v1876_v34 = vmul.f32 %v10902_v43, %v180_v59  ;;  %v6411_v11 = vld [vmem:[%s10438_s3 + $0x2c0] ss:$56 sps:$4 sm:$0xff]  }
 0x361   :  { %v4178_v47 = vmax.f32 %v3754_v21, 0.0  ;;  %v4179_v18 = vmax.f32 %v3755_v23, 0.0  ;;  %5397 = vmatprep.subr.bf16.mxu1 %v4447_v41  ;;  %v2748_v39 = vpop.permute.xlu1 %2747  ;;  %v1877_v62 = vmul.f32 %v10902_v43, %v181_v46  ;;  %v1874_v9 = vmul.f32 %v10903_v16, %v178_v10  ;;  %v371_v21 = vld [vmem:[%s10439_s0 + $0xb08] sm:$0xff]  ;;  %v377_v10 = vld [vmem:[%s10439_s0 + $0xb38] sm:$0xff] }
 0x362   :  { %v3568_v49 = vadd.f32 %v2748_v39, %v1872_v24  ;;  %v3569_v6 = vadd.f32 %v2748_v39, %v1873_v22  ;;  %v2743_v40 = vpop.permute.xlu0 %2742  ;;  %5398 = vmatpush1.bf16.msra.mxu1 %v4446_v2  ;;  %v1875_v61 = vmul.f32 %v10903_v16, %v179_v13  ;;  %v370_v2 = vld [vmem:[%s10439_s0 + $0xb00] sm:$0xff]  ;;  %v6415_v24 = vld [vmem:[%s10438_s3 + $0x334] ss:$56 sps:$4 sm:$0xff]   ;;  %v185_v39 = vld [vmem:[%s10439_s0 + $0x538] sm:$0xff] }
 0x363   :  { %v4542_v29 = vpack.c.bf16 %v4180_v55, %v4178_v47  ;;  %v3566_v3 = vadd.f32 %v2743_v40, %v1870_v56  ;;  %v3567_v8 = vadd.f32 %v2743_v40, %v1871_v58  ;;  %v4543_v19 = vpack.c.bf16 %v4181_v42, %v4179_v18  ;;  %v10904_v56 = vld [vmem:[#allocation137_spill] sm:$0xff]  ;;  %v184_v18 = vld [vmem:[%s10439_s0 + $0x530] sm:$0xff] }
 0x364   :  { %v3992_v20 = vmax.f32 %v3568_v49, 0.0  ;;  %v3993_v17 = vmax.f32 %v3569_v6, 0.0  ;;  %v2068_v58 = vmul.f32 %v10904_v56, %v372_v63  ;;  %v2069_v31 = vmul.f32 %v10904_v56, %v373_v54 }
 0x365   :  { %v3990_v38 = vmax.f32 %v3566_v3, 0.0  ;;  %v3991_v27 = vmax.f32 %v3567_v8, 0.0  ;;  %5736 = vmatprep.subr.bf16.mxu0 %v4543_v19  ;;  %v3228_v45 = vpop.permute.xlu1 %3227  ;;  %5694 = vmatmul.mubr.bf16.gmra.mrb[20].mxu0 %v6405_v48  ;;  %v10905_v48 = vld [vmem:[#allocation138_spill] sm:$0xff] }
 0x366   :  { %v3760_v51 = vadd.f32 %v3228_v45, %v2064_v50  ;;  %v3761_v28 = vadd.f32 %v3228_v45, %v2065_v1  ;;  %v3223_v14 = vpop.permute.xlu0 %3222  ;;  %5737 = vmatpush1.bf16.msra.mxu0 %v4542_v29  ;;  %5703 = vmatprep.mubr.bf16.mxu0 %v6409_v33  ;;  %v2066_v5 = vmul.f32 %v10905_v48, %v370_v2  ;;  %v182_v33 = vld [vmem:[%s10439_s0 + $0x520] sm:$0xff]  ;;  %v183_v29 = vld [vmem:[%s10439_s0 + $0x528] sm:$0xff]  ;;  %v376_v45 = vld [vmem:[%s10439_s0 + $0xb30] sm:$0xff] }
 0x367   :  { %v4448_v15 = vpack.c.bf16 %v3992_v20, %v3990_v38  ;;  %v3758_v52 = vadd.f32 %v3223_v14, %v2062_v60  ;;  %v3759_v37 = vadd.f32 %v3223_v14, %v2063_v4  ;;  %v4449_v35 = vpack.c.bf16 %v3993_v17, %v3991_v27  ;;  %v10906_v17 = vld [vmem:[#allocation43_spill] sm:$0xff]  ;;  %v10907_v4 = vld [vmem:[#allocation44_spill] sm:$0xff] }
 0x368   :  { %v4184_v44 = vmax.f32 %v3760_v51, 0.0  ;;  %v4185_v36 = vmax.f32 %v3761_v28, 0.0  ;;  %v2067_v32 = vmul.f32 %v10905_v48, %v371_v21  ;;  %v1880_v59 = vmul.f32 %v10906_v17, %v184_v18  ;;  %v6417_v14 = vld [vmem:[%s10438_s3 + $0x330] ss:$56 sps:$4 sm:$0xff]  }
 0x369   :  { %v4182_v25 = vmax.f32 %v3758_v52, 0.0  ;;  %v4183_v0 = vmax.f32 %v3759_v37, 0.0  ;;  %5399 = vmatprep.subr.bf16.mxu1 %v4449_v35  ;;  %v2758_v57 = vpop.permute.xlu1 %2757  ;;  %v1881_v46 = vmul.f32 %v10906_v17, %v185_v39  ;;  %v1878_v38 = vmul.f32 %v10907_v4, %v182_v33  ;;  %v375_v52 = vld [vmem:[%s10439_s0 + $0xb28] sm:$0xff]  ;;  %v381_v33 = vld [vmem:[%s10439_s0 + $0xb58] sm:$0xff] }
 0x36a   :  { %v3572_v23 = vadd.f32 %v2758_v57, %v1876_v34  ;;  %v3573_v41 = vadd.f32 %v2758_v57, %v1877_v62  ;;  %v2753_v12 = vpop.permute.xlu0 %2752  ;;  %5400 = vmatpush1.bf16.msra.mxu1 %v4448_v15  ;;  %v1879_v27 = vmul.f32 %v10907_v4, %v183_v29  ;;  %v374_v15 = vld [vmem:[%s10439_s0 + $0xb20] sm:$0xff]  ;;  %v189_v57 = vld [vmem:[%s10439_s0 + $0x558] sm:$0xff] }
 0x36b   :  { %v4544_v22 = vpack.c.bf16 %v4184_v44, %v4182_v25  ;;  %v3570_v55 = vadd.f32 %v2753_v12, %v1874_v9  ;;  %v3571_v42 = vadd.f32 %v2753_v12, %v1875_v61  ;;  %v4545_v26 = vpack.c.bf16 %v4185_v36, %v4183_v0  ;;  %v6423_v34 = vld [vmem:[%s10438_s3 + $0x2c] ss:$56 sps:$4 sm:$0xff]   ;;  %v188_v0 = vld [vmem:[%s10439_s0 + $0x550] sm:$0xff] }
 0x36c   :  { %v3996_v7 = vmax.f32 %v3572_v23, 0.0  ;;  %v3997_v47 = vmax.f32 %v3573_v41, 0.0  ;;  %v10908_v9 = vld [vmem:[#allocation139_spill] sm:$0xff] }
 0x36d   :  { %v3994_v49 = vmax.f32 %v3570_v55, 0.0  ;;  %v3995_v6 = vmax.f32 %v3571_v42, 0.0  ;;  %5738 = vmatprep.subr.bf16.mxu0 %v4545_v26  ;;  %v3238_v40 = vpop.permute.xlu1 %3237  ;;  %5704 = vmatmul.mubr.bf16.gmra.mrb[24].mxu0 %v6411_v11  ;;  %v2072_v61 = vmul.f32 %v10908_v9, %v376_v45  ;;  %v2073_v63 = vmul.f32 %v10908_v9, %v377_v10  ;;  %v10909_v11 = vld [vmem:[#allocation140_spill] sm:$0xff] }
 0x36e   :  { %v3764_v3 = vadd.f32 %v3238_v40, %v2068_v58  ;;  %v3765_v8 = vadd.f32 %v3238_v40, %v2069_v31  ;;  %v3233_v19 = vpop.permute.xlu0 %3232  ;;  %5739 = vmatpush1.bf16.msra.mxu0 %v4544_v22  ;;  %5713 = vmatprep.mubr.bf16.mxu0 %v6415_v24  ;;  %v2070_v2 = vmul.f32 %v10909_v11, %v374_v15  ;;  %v186_v24 = vld [vmem:[%s10439_s0 + $0x540] sm:$0xff]  ;;  %v187_v22 = vld [vmem:[%s10439_s0 + $0x548] sm:$0xff]  ;;  %v380_v40 = vld [vmem:[%s10439_s0 + $0xb50] sm:$0xff] }
 0x36f   :  { %v4450_v30 = vpack.c.bf16 %v3996_v7, %v3994_v49  ;;  %v3762_v50 = vadd.f32 %v3233_v19, %v2066_v5  ;;  %v3763_v1 = vadd.f32 %v3233_v19, %v2067_v32  ;;  %v4451_v20 = vpack.c.bf16 %v3997_v47, %v3995_v6  ;;  %v10910_v47 = vld [vmem:[#allocation45_spill] sm:$0xff]  ;;  %v10911_v32 = vld [vmem:[#allocation46_spill] sm:$0xff]  ;;  %v192_v10 = vld [vmem:[%s10439_s0 + $0x570] sm:$0xff] }
 0x370   :  { %v4188_v53 = vmax.f32 %v3764_v3, 0.0  ;;  %v4189_v60 = vmax.f32 %v3765_v8, 0.0  ;;  %v2071_v21 = vmul.f32 %v10909_v11, %v375_v52  ;;  %v1884_v18 = vmul.f32 %v10910_v47, %v188_v0  ;;  %v378_v19 = vld [vmem:[%s10439_s0 + $0xb40] sm:$0xff]  ;;  %v10915_v11 = vld [vmem:[#allocation48_spill] sm:$0xff] }
 0x371   :  { %v4186_v13 = vmax.f32 %v3762_v50, 0.0  ;;  %v4187_v51 = vmax.f32 %v3763_v1, 0.0  ;;  %5401 = vmatprep.subr.bf16.mxu1 %v4451_v20  ;;  %v2768_v28 = vpop.permute.xlu1 %2767  ;;  %v1885_v39 = vmul.f32 %v10910_v47, %v189_v57  ;;  %v1882_v49 = vmul.f32 %v10911_v32, %v186_v24 }
 0x372   :  { %v3576_v37 = vadd.f32 %v2768_v28, %v1880_v59  ;;  %v3577_v35 = vadd.f32 %v2768_v28, %v1881_v46  ;;  %v2763_v43 = vpop.permute.xlu0 %2762  ;;  %5402 = vmatpush1.bf16.msra.mxu1 %v4450_v30  ;;  %v1883_v6 = vmul.f32 %v10911_v32, %v187_v22  ;;  %v379_v30 = vld [vmem:[%s10439_s0 + $0xb48] sm:$0xff] }
 0x373   :  { %v4546_v62 = vpack.c.bf16 %v4188_v53, %v4186_v13  ;;  %v3574_v44 = vadd.f32 %v2763_v43, %v1878_v38  ;;  %v3575_v36 = vadd.f32 %v2763_v43, %v1879_v27  ;;  %v4547_v16 = vpack.c.bf16 %v4189_v60, %v4187_v51  ;;  %v10912_v60 = vld [vmem:[#allocation141_spill] sm:$0xff]  ;;  %v10913_v51 = vld [vmem:[#allocation142_spill] sm:$0xff]  ;;  %v191_v43 = vld [vmem:[%s10439_s0 + $0x568] sm:$0xff] }
 0x374   :  { %v4000_v54 = vmax.f32 %v3576_v37, 0.0  ;;  %v4001_v25 = vmax.f32 %v3577_v35, 0.0  ;;  %v2076_v4 = vmul.f32 %v10912_v60, %v380_v40  ;;  %v2077_v38 = vmul.f32 %v10912_v60, %v381_v33  ;;  %v193_v13 = vld [vmem:[%s10439_s0 + $0x578] sm:$0xff]  ;;  %v190_v35 = vld [vmem:[%s10439_s0 + $0x560] sm:$0xff]  ;;  %v10917_v33 = vld [vmem:[#allocation144_spill] sm:$0xff] }
 0x375   :  { %v3998_v23 = vmax.f32 %v3574_v44, 0.0  ;;  %v3999_v41 = vmax.f32 %v3575_v36, 0.0  ;;  %5740 = vmatprep.subr.bf16.mxu0 %v4547_v16  ;;  %v3248_v12 = vpop.permute.xlu1 %3247  ;;  %5714 = vmatmul.mubr.bf16.gmra.mrb[28].mxu0 %v6417_v14  ;;  %v2074_v28 = vmul.f32 %v10913_v51, %v378_v19  ;;  %v2075_v14 = vmul.f32 %v10913_v51, %v379_v30  ;;  %v197_v40 = vld [vmem:[%s10439_s0 + $0x598] sm:$0xff]  ;;  %v10919_v51 = vld [vmem:[#allocation50_spill] sm:$0xff] }
 0x376   :  { %v3768_v55 = vadd.f32 %v3248_v12, %v2072_v61  ;;  %v3769_v42 = vadd.f32 %v3248_v12, %v2073_v63  ;;  %v3243_v26 = vpop.permute.xlu0 %3242  ;;  %5741 = vmatpush1.bf16.msra.mxu0 %v4546_v62  ;;  %5756 = vmatprep.mubr.bf16.mxu0 %v6423_v34  ;;  %v10914_v63 = vld [vmem:[#allocation47_spill] sm:$0xff] }
 0x377   :  { %v4452_v56 = vpack.c.bf16 %v4000_v54, %v3998_v23  ;;  %v3766_v58 = vadd.f32 %v3243_v26, %v2070_v2  ;;  %v3767_v31 = vadd.f32 %v3243_v26, %v2071_v21  ;;  %v4453_v7 = vpack.c.bf16 %v4001_v25, %v3999_v41  ;;  %v384_v23 = vld [vmem:[%s10439_s0 + $0xb70] sm:$0xff]  ;;  %v385_v41 = vld [vmem:[%s10439_s0 + $0xb78] sm:$0xff] }
 0x378   :  { %v4192_v48 = vmax.f32 %v3768_v55, 0.0  ;;  %v4193_v5 = vmax.f32 %v3769_v42, 0.0  ;;  %v1888_v54 = vmul.f32 %v10914_v63, %v192_v10  ;;  %v1889_v25 = vmul.f32 %v10914_v63, %v193_v13  ;;  %v382_v55 = vld [vmem:[%s10439_s0 + $0xb60] sm:$0xff]  ;;  %v383_v42 = vld [vmem:[%s10439_s0 + $0xb68] sm:$0xff] }
 0x379   :  { %v4190_v29 = vmax.f32 %v3766_v58, 0.0  ;;  %v4191_v3 = vmax.f32 %v3767_v31, 0.0  ;;  %5403 = vmatprep.subr.bf16.mxu1 %v4453_v7  ;;  %v2778_v8 = vpop.permute.xlu1 %2777  ;;  %v1886_v2 = vmul.f32 %v10915_v11, %v190_v35  ;;  %v1887_v21 = vmul.f32 %v10915_v11, %v191_v43 }
 0x37a   :  { %v3580_v50 = vadd.f32 %v2778_v8, %v1884_v18  ;;  %v3581_v1 = vadd.f32 %v2778_v8, %v1885_v39  ;;  %v2773_v20 = vpop.permute.xlu0 %2772  ;;  %5404 = vmatpush1.bf16.msra.mxu1 %v4452_v56  ;;  %v10916_v39 = vld [vmem:[#allocation143_spill] sm:$0xff] }
 0x37b   :  { %v4548_v17 = vpack.c.bf16 %v4192_v48, %v4190_v29  ;;  %v3578_v59 = vadd.f32 %v2773_v20, %v1882_v49  ;;  %v3579_v46 = vadd.f32 %v2773_v20, %v1883_v6  ;;  %v4549_v53 = vpack.c.bf16 %v4193_v5, %v4191_v3  ;;  %v196_v6 = vld [vmem:[%s10439_s0 + $0x590] sm:$0xff] }
 0x37c   :  { %v4004_v27 = vmax.f32 %v3580_v50, 0.0  ;;  %v4005_v45 = vmax.f32 %v3581_v1, 0.0  ;;  %v2080_v48 = vmul.f32 %v10916_v39, %v384_v23  ;;  %v2081_v5 = vmul.f32 %v10916_v39, %v385_v41  ;;  %v194_v50 = vld [vmem:[%s10439_s0 + $0x580] sm:$0xff]  ;;  %v195_v1 = vld [vmem:[%s10439_s0 + $0x588] sm:$0xff]  ;;  %v201_v23 = vld [vmem:[%s10439_s0 + $0x5b8] sm:$0xff] }
 0x37d   :  { %v4002_v15 = vmax.f32 %v3578_v59, 0.0  ;;  %v4003_v52 = vmax.f32 %v3579_v46, 0.0  ;;  %5742 = vmatprep.subr.bf16.mxu0 %v4549_v53  ;;  %v3258_v37 = vpop.permute.xlu1 %3257  ;;  %v2078_v29 = vmul.f32 %v10917_v33, %v382_v55  ;;  %v2079_v3 = vmul.f32 %v10917_v33, %v383_v42  ;;  %v10921_v41 = vld [vmem:[#allocation146_spill] sm:$0xff]  ;;  %v10923_v33 = vld [vmem:[#allocation52_spill] sm:$0xff] }
 0x37e   :  { %v3772_v34 = vadd.f32 %v3258_v37, %v2076_v4  ;;  %v3773_v62 = vadd.f32 %v3258_v37, %v2077_v38  ;;  %v3253_v44 = vpop.permute.xlu0 %3252  ;;  %5743 = vmatpush1.bf16.msra.mxu0 %v4548_v17  ;;  %v10918_v38 = vld [vmem:[#allocation49_spill] sm:$0xff] }
 0x37f   :  { %v4454_v36 = vpack.c.bf16 %v4004_v27, %v4002_v15  ;;  %v3770_v16 = vadd.f32 %v3253_v44, %v2074_v28  ;;  %v3771_v9 = vadd.f32 %v3253_v44, %v2075_v14  ;;  %v4455_v61 = vpack.c.bf16 %v4005_v45, %v4003_v52  ;;  %v388_v15 = vld [vmem:[%s10439_s0 + $0xb90] sm:$0xff]  ;;  %v389_v52 = vld [vmem:[%s10439_s0 + $0xb98] sm:$0xff] }
 0x380   :  { %v4196_v0 = vmax.f32 %v3772_v34, 0.0  ;;  %v4197_v57 = vmax.f32 %v3773_v62, 0.0  ;;  %v1892_v27 = vmul.f32 %v10918_v38, %v196_v6  ;;  %v1893_v45 = vmul.f32 %v10918_v38, %v197_v40  ;;  %v386_v34 = vld [vmem:[%s10439_s0 + $0xb80] sm:$0xff]  ;;  %v387_v62 = vld [vmem:[%s10439_s0 + $0xb88] sm:$0xff] }
 0x381   :  { %v4194_v12 = vmax.f32 %v3770_v16, 0.0  ;;  %v4195_v24 = vmax.f32 %v3771_v9, 0.0  ;;  %5405 = vmatprep.subr.bf16.mxu1 %v4455_v61  ;;  %v2788_v22 = vpop.permute.xlu1 %2787  ;;  %v1890_v28 = vmul.f32 %v10919_v51, %v194_v50  ;;  %v1891_v14 = vmul.f32 %v10919_v51, %v195_v1 }
 0x382   :  { %v3584_v26 = vadd.f32 %v2788_v22, %v1888_v54  ;;  %v3585_v56 = vadd.f32 %v2788_v22, %v1889_v25  ;;  %v2783_v58 = vpop.permute.xlu0 %2782  ;;  %5406 = vmatpush1.bf16.msra.mxu1 %v4454_v36  ;;  %v10920_v25 = vld [vmem:[#allocation145_spill] sm:$0xff] }
 0x383   :  { %v4550_v31 = vpack.c.bf16 %v4196_v0, %v4194_v12  ;;  %v3582_v7 = vadd.f32 %v2783_v58, %v1886_v2  ;;  %v3583_v47 = vadd.f32 %v2783_v58, %v1887_v21  ;;  %v4551_v18 = vpack.c.bf16 %v4197_v57, %v4195_v24  ;;  %v200_v21 = vld [vmem:[%s10439_s0 + $0x5b0] sm:$0xff] }
 0x384   :  { %v4008_v32 = vmax.f32 %v3584_v26, 0.0  ;;  %v4009_v49 = vmax.f32 %v3585_v56, 0.0  ;;  %v2084_v0 = vmul.f32 %v10920_v25, %v388_v15  ;;  %v2085_v57 = vmul.f32 %v10920_v25, %v389_v52  ;;  %v198_v26 = vld [vmem:[%s10439_s0 + $0x5a0] sm:$0xff]  ;;  %v199_v56 = vld [vmem:[%s10439_s0 + $0x5a8] sm:$0xff]  ;;  %v205_v15 = vld [vmem:[%s10439_s0 + $0x5d8] sm:$0xff] }
 0x385   :  { %v4006_v8 = vmax.f32 %v3582_v7, 0.0  ;;  %v4007_v19 = vmax.f32 %v3583_v47, 0.0  ;;  %5744 = vmatprep.subr.bf16.mxu0 %v4551_v18  ;;  %v3268_v30 = vpop.permute.xlu1 %3267  ;;  %v2082_v12 = vmul.f32 %v10921_v41, %v386_v34  ;;  %v2083_v24 = vmul.f32 %v10921_v41, %v387_v62  ;;  %v10925_v52 = vld [vmem:[#allocation148_spill] sm:$0xff]  ;;  %v10927_v41 = vld [vmem:[#allocation54_spill] sm:$0xff] }
 0x386   :  { %v3776_v20 = vadd.f32 %v3268_v30, %v2080_v48  ;;  %v3777_v17 = vadd.f32 %v3268_v30, %v2081_v5  ;;  %v3263_v59 = vpop.permute.xlu0 %3262  ;;  %5745 = vmatpush1.bf16.msra.mxu0 %v4550_v31  ;;  %v10922_v5 = vld [vmem:[#allocation51_spill] sm:$0xff] }
 0x387   :  { %v4456_v46 = vpack.c.bf16 %v4008_v32, %v4006_v8  ;;  %v3774_v53 = vadd.f32 %v3263_v59, %v2078_v29  ;;  %v3775_v60 = vadd.f32 %v3263_v59, %v2079_v3  ;;  %v4457_v4 = vpack.c.bf16 %v4009_v49, %v4007_v19  ;;  %v392_v8 = vld [vmem:[%s10439_s0 + $0xbb0] sm:$0xff]  ;;  %v393_v19 = vld [vmem:[%s10439_s0 + $0xbb8] sm:$0xff] }
 0x388   :  { %v4200_v10 = vmax.f32 %v3776_v20, 0.0  ;;  %v4201_v13 = vmax.f32 %v3777_v17, 0.0  ;;  %v1896_v32 = vmul.f32 %v10922_v5, %v200_v21  ;;  %v1897_v49 = vmul.f32 %v10922_v5, %v201_v23  ;;  %v390_v20 = vld [vmem:[%s10439_s0 + $0xba0] sm:$0xff]  ;;  %v391_v17 = vld [vmem:[%s10439_s0 + $0xba8] sm:$0xff] }
 0x389   :  { %v4198_v37 = vmax.f32 %v3774_v53, 0.0  ;;  %v4199_v35 = vmax.f32 %v3775_v60, 0.0  ;;  %5407 = vmatprep.subr.bf16.mxu1 %v4457_v4  ;;  %v2798_v43 = vpop.permute.xlu1 %2797  ;;  %v1894_v29 = vmul.f32 %v10923_v33, %v198_v26  ;;  %v1895_v3 = vmul.f32 %v10923_v33, %v199_v56 }
 0x38a   :  { %v3588_v44 = vadd.f32 %v2798_v43, %v1892_v27  ;;  %v3589_v36 = vadd.f32 %v2798_v43, %v1893_v45  ;;  %v2793_v16 = vpop.permute.xlu0 %2792  ;;  %5408 = vmatpush1.bf16.msra.mxu1 %v4456_v46  ;;  %v10924_v45 = vld [vmem:[#allocation147_spill] sm:$0xff] }
 0x38b   :  { %v4552_v9 = vpack.c.bf16 %v4200_v10, %v4198_v37  ;;  %v3586_v61 = vadd.f32 %v2793_v16, %v1890_v28  ;;  %v3587_v63 = vadd.f32 %v2793_v16, %v1891_v14  ;;  %v4553_v54 = vpack.c.bf16 %v4201_v13, %v4199_v35  ;;  %v204_v14 = vld [vmem:[%s10439_s0 + $0x5d0] sm:$0xff] }
 0x38c   :  { %v4012_v11 = vmax.f32 %v3588_v44, 0.0  ;;  %v4013_v2 = vmax.f32 %v3589_v36, 0.0  ;;  %v2088_v10 = vmul.f32 %v10924_v45, %v392_v8  ;;  %v2089_v13 = vmul.f32 %v10924_v45, %v393_v19  ;;  %v202_v44 = vld [vmem:[%s10439_s0 + $0x5c0] sm:$0xff]  ;;  %v203_v36 = vld [vmem:[%s10439_s0 + $0x5c8] sm:$0xff]  ;;  %v209_v8 = vld [vmem:[%s10439_s0 + $0x5f8] sm:$0xff] }
 0x38d   :  { %v4010_v22 = vmax.f32 %v3586_v61, 0.0  ;;  %v4011_v55 = vmax.f32 %v3587_v63, 0.0  ;;  %5746 = vmatprep.subr.bf16.mxu0 %v4553_v54  ;;  %v3278_v42 = vpop.permute.xlu1 %3277  ;;  %v2086_v37 = vmul.f32 %v10925_v52, %v390_v20  ;;  %v2087_v35 = vmul.f32 %v10925_v52, %v391_v17  ;;  %v10929_v19 = vld [vmem:[#allocation150_spill] sm:$0xff]  ;;  %v10931_v52 = vld [vmem:[#allocation56_spill] sm:$0xff] }
 0x38e   :  { %v3780_v58 = vadd.f32 %v3278_v42, %v2084_v0  ;;  %v3781_v31 = vadd.f32 %v3278_v42, %v2085_v57  ;;  %v3273_v7 = vpop.permute.xlu0 %3272  ;;  %5747 = vmatpush1.bf16.msra.mxu0 %v4552_v9  ;;  %v10926_v57 = vld [vmem:[#allocation53_spill] sm:$0xff] }
 0x38f   :  { %v4458_v47 = vpack.c.bf16 %v4012_v11, %v4010_v22  ;;  %v3778_v18 = vadd.f32 %v3273_v7, %v2082_v12  ;;  %v3779_v39 = vadd.f32 %v3273_v7, %v2083_v24  ;;  %v4459_v48 = vpack.c.bf16 %v4013_v2, %v4011_v55  ;;  %v396_v22 = vld [vmem:[%s10439_s0 + $0xbd0] sm:$0xff]  ;;  %v397_v55 = vld [vmem:[%s10439_s0 + $0xbd8] sm:$0xff] }
 0x390   :  { %v4204_v6 = vmax.f32 %v3780_v58, 0.0  ;;  %v4205_v40 = vmax.f32 %v3781_v31, 0.0  ;;  %v1900_v11 = vmul.f32 %v10926_v57, %v204_v14  ;;  %v1901_v2 = vmul.f32 %v10926_v57, %v205_v15  ;;  %v394_v58 = vld [vmem:[%s10439_s0 + $0xbc0] sm:$0xff]  ;;  %v395_v31 = vld [vmem:[%s10439_s0 + $0xbc8] sm:$0xff] }
 0x391   :  { %v4202_v30 = vmax.f32 %v3778_v18, 0.0  ;;  %v4203_v50 = vmax.f32 %v3779_v39, 0.0  ;;  %5409 = vmatprep.subr.bf16.mxu1 %v4459_v48  ;;  %v2808_v1 = vpop.permute.xlu1 %2807  ;;  %v1898_v12 = vmul.f32 %v10927_v41, %v202_v44  ;;  %v1899_v24 = vmul.f32 %v10927_v41, %v203_v36 }
 0x392   :  { %v3592_v59 = vadd.f32 %v2808_v1, %v1896_v32  ;;  %v3593_v46 = vadd.f32 %v2808_v1, %v1897_v49  ;;  %v2803_v53 = vpop.permute.xlu0 %2802  ;;  %5410 = vmatpush1.bf16.msra.mxu1 %v4458_v47  ;;  %v10928_v49 = vld [vmem:[#allocation149_spill] sm:$0xff] }
 0x393   :  { %v4554_v60 = vpack.c.bf16 %v4204_v6, %v4202_v30  ;;  %v3590_v4 = vadd.f32 %v2803_v53, %v1894_v29  ;;  %v3591_v38 = vadd.f32 %v2803_v53, %v1895_v3  ;;  %v4555_v27 = vpack.c.bf16 %v4205_v40, %v4203_v50  ;;  %v208_v3 = vld [vmem:[%s10439_s0 + $0x5f0] sm:$0xff] }
 0x394   :  { %v4016_v51 = vmax.f32 %v3592_v59, 0.0  ;;  %v4017_v28 = vmax.f32 %v3593_v46, 0.0  ;;  %v2092_v6 = vmul.f32 %v10928_v49, %v396_v22  ;;  %v2093_v40 = vmul.f32 %v10928_v49, %v397_v55  ;;  %v206_v59 = vld [vmem:[%s10439_s0 + $0x5e0] sm:$0xff]  ;;  %v207_v46 = vld [vmem:[%s10439_s0 + $0x5e8] sm:$0xff] }
 0x395   :  { %v4014_v43 = vmax.f32 %v3590_v4, 0.0  ;;  %v4015_v34 = vmax.f32 %v3591_v38, 0.0  ;;  %5748 = vmatprep.subr.bf16.mxu0 %v4555_v27  ;;  %v3288_v62 = vpop.permute.xlu1 %3287  ;;  %v2090_v30 = vmul.f32 %v10929_v19, %v394_v58  ;;  %v2091_v50 = vmul.f32 %v10929_v19, %v395_v31  ;;  %v10935_v19 = vld [vmem:[#allocation154_spill] sm:$0xff] }
 0x396   :  { %v3784_v16 = vadd.f32 %v3288_v62, %v2088_v10  ;;  %v3785_v9 = vadd.f32 %v3288_v62, %v2089_v13  ;;  %v3283_v61 = vpop.permute.xlu0 %3282  ;;  %5749 = vmatpush1.bf16.msra.mxu0 %v4554_v60  ;;  %v10930_v13 = vld [vmem:[#allocation55_spill] sm:$0xff] }
 0x397   :  { %v4460_v63 = vpack.c.bf16 %v4016_v51, %v4014_v43  ;;  %v3782_v54 = vadd.f32 %v3283_v61, %v2086_v37  ;;  %v3783_v25 = vadd.f32 %v3283_v61, %v2087_v35  ;;  %v4461_v0 = vpack.c.bf16 %v4017_v28, %v4015_v34  ;;  %v400_v43 = vld [vmem:[%s10439_s0 + $0xbf0] sm:$0xff]  ;;  %v401_v34 = vld [vmem:[%s10439_s0 + $0xbf8] sm:$0xff] }
 0x398   :  { %v4208_v21 = vmax.f32 %v3784_v16, 0.0  ;;  %v4209_v23 = vmax.f32 %v3785_v9, 0.0  ;;  %v1904_v51 = vmul.f32 %v10930_v13, %v208_v3  ;;  %v1905_v28 = vmul.f32 %v10930_v13, %v209_v8  ;;  %v398_v16 = vld [vmem:[%s10439_s0 + $0xbe0] sm:$0xff]  ;;  %v399_v9 = vld [vmem:[%s10439_s0 + $0xbe8] sm:$0xff] }
 0x399   :  { %v4206_v42 = vmax.f32 %v3782_v54, 0.0  ;;  %v4207_v26 = vmax.f32 %v3783_v25, 0.0  ;;  %5411 = vmatprep.subr.bf16.mxu1 %v4461_v0  ;;  %v2818_v56 = vpop.permute.xlu1 %2817  ;;  %v1902_v37 = vmul.f32 %v10931_v52, %v206_v59  ;;  %v1903_v35 = vmul.f32 %v10931_v52, %v207_v46 }
 0x39a   :  { %v3596_v7 = vadd.f32 %v2818_v56, %v1900_v11  ;;  %v3597_v47 = vadd.f32 %v2818_v56, %v1901_v2  ;;  %v2813_v18 = vpop.permute.xlu0 %2812  ;;  %5412 = vmatpush1.bf16.msra.mxu1 %v4460_v63  ;;  %v10932_v2 = vld [vmem:[#allocation151_spill] sm:$0xff] }
 0x39b   :  { %v4556_v39 = vpack.c.bf16 %v4208_v21, %v4206_v42  ;;  %v3594_v48 = vadd.f32 %v2813_v18, %v1898_v12  ;;  %v3595_v5 = vadd.f32 %v2813_v18, %v1899_v24  ;;  %v4557_v32 = vpack.c.bf16 %v4209_v23, %v4207_v26  ;;  %v10933_v24 = vld [vmem:[#allocation152_spill] sm:$0xff]  ;;  %v405_v26 = vld [vmem:[%s10439_s0 + $0xc18] sm:$0xff] }
 0x39c   :  { %v4020_v33 = vmax.f32 %v3596_v7, 0.0  ;;  %v4021_v29 = vmax.f32 %v3597_v47, 0.0  ;;  %v2096_v21 = vmul.f32 %v10932_v2, %v400_v43  ;;  %v2097_v23 = vmul.f32 %v10932_v2, %v401_v34  ;;  %v404_v42 = vld [vmem:[%s10439_s0 + $0xc10] sm:$0xff]  ;;  %v402_v7 = vld [vmem:[%s10439_s0 + $0xc00] sm:$0xff]  ;;  %v403_v47 = vld [vmem:[%s10439_s0 + $0xc08] sm:$0xff] }
 0x39d   :  { %v4018_v1 = vmax.f32 %v3594_v48, 0.0  ;;  %v4019_v20 = vmax.f32 %v3595_v5, 0.0  ;;  %5750 = vmatprep.subr.bf16.mxu0 %v4557_v32  ;;  %v3298_v17 = vpop.permute.xlu1 %3297  ;;  %v2094_v22 = vmul.f32 %v10933_v24, %v398_v16  ;;  %v2095_v55 = vmul.f32 %v10933_v24, %v399_v9  ;;  %v10937_v34 = vld [vmem:[#allocation156_spill] sm:$0xff]  ;;  %v413_v16 = vld [vmem:[%s10439_s0 + $0xc58] sm:$0xff] }
 0x39e   :  { %v3788_v53 = vadd.f32 %v3298_v17, %v2092_v6  ;;  %v3789_v60 = vadd.f32 %v3298_v17, %v2093_v40  ;;  %v3293_v4 = vpop.permute.xlu0 %3292  ;;  %5751 = vmatpush1.bf16.msra.mxu0 %v4556_v39  ;;  %v10934_v40 = vld [vmem:[#allocation153_spill] sm:$0xff] }
 0x39f   :  { %v4462_v38 = vpack.c.bf16 %v4020_v33, %v4018_v1  ;;  %v3786_v27 = vadd.f32 %v3293_v4, %v2090_v30  ;;  %v3787_v45 = vadd.f32 %v3293_v4, %v2091_v50  ;;  %v4463_v10 = vpack.c.bf16 %v4021_v29, %v4019_v20  ;;  %v408_v1 = vld [vmem:[%s10439_s0 + $0xc30] sm:$0xff]  ;;  %v409_v20 = vld [vmem:[%s10439_s0 + $0xc38] sm:$0xff]  ;;  %v407_v4 = vld [vmem:[%s10439_s0 + $0xc28] sm:$0xff] }
 0x3a0   :  { %v4212_v14 = vmax.f32 %v3788_v53, 0.0  ;;  %v4213_v15 = vmax.f32 %v3789_v60, 0.0  ;;  %v2100_v33 = vmul.f32 %v10934_v40, %v404_v42  ;;  %v2101_v29 = vmul.f32 %v10934_v40, %v405_v26  ;;  %v6418_v53 = vld [vmem:[%s10438_s3 + $0x10] ss:$56 sps:$4 sm:$0xff]   ;;  %v406_v60 = vld [vmem:[%s10439_s0 + $0xc20] sm:$0xff]  ;;  %v10938_v24 = vld [vmem:[#allocation157_spill] sm:$0xff] }
 0x3a1   :  { %v4210_v62 = vmax.f32 %v3786_v27, 0.0  ;;  %v4211_v44 = vmax.f32 %v3787_v45, 0.0  ;;  %5413 = vmatprep.subr.bf16.mxu1 %v4463_v10  ;;  %v2828_v36 = vpop.permute.xlu1 %2827  ;;  %v2098_v30 = vmul.f32 %v10935_v19, %v402_v7  ;;  %v2099_v50 = vmul.f32 %v10935_v19, %v403_v47  ;;  %v6424_v10 = vld [vmem:[%s10438_s3 + $0x84] ss:$56 sps:$4 sm:$0xff]   ;;  %v416_v47 = vld [vmem:[%s10439_s0 + $0xc70] sm:$0xff] }
 0x3a2   :  { %v3600_v61 = vadd.f32 %v2828_v36, %v1904_v51  ;;  %v3601_v63 = vadd.f32 %v2828_v36, %v1905_v28  ;;  %v2823_v54 = vpop.permute.xlu0 %2822  ;;  %5414 = vmatpush1.bf16.msra.mxu1 %v4462_v38  ;;  %v412_v36 = vld [vmem:[%s10439_s0 + $0xc50] sm:$0xff] }
 0x3a3   :  { %v4558_v25 = vpack.c.bf16 %v4212_v14, %v4210_v62  ;;  %v3598_v0 = vadd.f32 %v2823_v54, %v1902_v37  ;;  %v3599_v57 = vadd.f32 %v2823_v54, %v1903_v35  ;;  %v4559_v11 = vpack.c.bf16 %v4213_v15, %v4211_v44  ;;  %v10936_v15 = vld [vmem:[#allocation155_spill] sm:$0xff] }
 0x3a4   :  { %v4024_v41 = vmax.f32 %v3600_v61, 0.0  ;;  %v4025_v12 = vmax.f32 %v3601_v63, 0.0  ;;  %v2104_v52 = vmul.f32 %v10936_v15, %v408_v1  ;;  %v2105_v37 = vmul.f32 %v10936_v15, %v409_v20  ;;  %v6421_v54 = vld [vmem:[%s10438_s3 + $0x28] ss:$56 sps:$4 sm:$0xff]  }
 0x3a5   :  { %v4022_v56 = vmax.f32 %v3598_v0, 0.0  ;;  %v4023_v58 = vmax.f32 %v3599_v57, 0.0  ;;  %5752 = vmatprep.subr.bf16.mxu0 %v4559_v11  ;;  %v3308_v31 = vpop.permute.xlu1 %3307  ;;  %v2102_v62 = vmul.f32 %v10937_v34, %v406_v60  ;;  %v2103_v44 = vmul.f32 %v10937_v34, %v407_v4  ;;  %v411_v0 = vld [vmem:[%s10439_s0 + $0xc48] sm:$0xff] }
 0x3a6   :  { %v3792_v18 = vadd.f32 %v3308_v31, %v2096_v21  ;;  %v3793_v39 = vadd.f32 %v3308_v31, %v2097_v23  ;;  %v3303_v48 = vpop.permute.xlu0 %3302  ;;  %5753 = vmatpush1.bf16.msra.mxu0 %v4558_v25  ;;  %v410_v25 = vld [vmem:[%s10439_s0 + $0xc40] sm:$0xff] }
 0x3a7   :  { %v4464_v5 = vpack.c.bf16 %v4024_v41, %v4022_v56  ;;  %v3790_v32 = vadd.f32 %v3303_v48, %v2094_v22  ;;  %v3791_v49 = vadd.f32 %v3303_v48, %v2095_v55  ;;  %v4465_v6 = vpack.c.bf16 %v4025_v12, %v4023_v58  ;;  %v6427_v56 = vld [vmem:[%s10438_s3 + $0x9c] ss:$56 sps:$4 sm:$0xff]   ;;  %v10939_v58 = vld [vmem:[#allocation158_spill] sm:$0xff] }
 0x3a8   :  { %v4216_v3 = vmax.f32 %v3792_v18, 0.0  ;;  %v4217_v8 = vmax.f32 %v3793_v39, 0.0  ;;  %v2108_v22 = vmul.f32 %v10938_v24, %v412_v36  ;;  %v2109_v55 = vmul.f32 %v10938_v24, %v413_v16  ;;  %v417_v18 = vld [vmem:[%s10439_s0 + $0xc78] sm:$0xff]  ;;  %v423_v24 = vld [vmem:[%s10439_s0 + $0xca8] sm:$0xff] }
 0x3a9   :  { %v4214_v17 = vmax.f32 %v3790_v32, 0.0  ;;  %v4215_v59 = vmax.f32 %v3791_v49, 0.0  ;;  %5415 = vmatprep.subr.bf16.mxu1 %v4465_v6  ;;  %v3318_v46 = vpop.permute.xlu1 %3317  ;;  %v2106_v31 = vmul.f32 %v10939_v58, %v410_v25  ;;  %v2107_v7 = vmul.f32 %v10939_v58, %v411_v0  ;;  %v6426_v32 = vld [vmem:[%s10438_s3 + $0x80] ss:$56 sps:$4 sm:$0xff]   ;;  %v415_v6 = vld [vmem:[%s10439_s0 + $0xc68] sm:$0xff] }
 0x3aa   :  { %v3796_v38 = vadd.f32 %v3318_v46, %v2100_v33  ;;  %v3797_v27 = vadd.f32 %v3318_v46, %v2101_v29  ;;  %v3313_v45 = vpop.permute.xlu0 %3312  ;;  %5416 = vmatpush1.bf16.msra.mxu1 %v4464_v5  ;;  %v414_v49 = vld [vmem:[%s10439_s0 + $0xc60] sm:$0xff]  ;;  %v6430_v46 = vld [vmem:[%s10438_s3 + $0xf4] ss:$56 sps:$4 sm:$0xff]  }
 0x3ab   :  { %v4560_v13 = vpack.c.bf16 %v4216_v3, %v4214_v17  ;;  %v3794_v51 = vadd.f32 %v3313_v45, %v2098_v30  ;;  %v3795_v28 = vadd.f32 %v3313_v45, %v2099_v50  ;;  %v4561_v14 = vpack.c.bf16 %v4217_v8, %v4215_v59  ;;  %v10940_v50 = vld [vmem:[#allocation159_spill] sm:$0xff] }
 0x3ac   :  { %v4220_v35 = vmax.f32 %v3796_v38, 0.0  ;;  %v4221_v43 = vmax.f32 %v3797_v27, 0.0  ;;  %v2112_v1 = vmul.f32 %v10940_v50, %v416_v47  ;;  %v2113_v20 = vmul.f32 %v10940_v50, %v417_v18  ;;  %v420_v38 = vld [vmem:[%s10439_s0 + $0xc90] sm:$0xff]  ;;  %v421_v27 = vld [vmem:[%s10439_s0 + $0xc98] sm:$0xff]  ;;  %v427_v50 = vld [vmem:[%s10439_s0 + $0xcc8] sm:$0xff] }
 0x3ad   :  { %v4218_v9 = vmax.f32 %v3794_v51, 0.0  ;;  %v4219_v61 = vmax.f32 %v3795_v28, 0.0  ;;  %5418 = vmatmul.mubr.bf16.vlgmr.msra.gmra.mrb[0].mxu1 %v6418_v53  ;;  %5754 = vmatprep.subr.bf16.mxu0 %v4561_v14  ;;  %v3328_v63 = vpop.permute.xlu1 %3327  ;;  %v10941_v53 = vld [vmem:[#allocation160_spill] sm:$0xff]  ;;  %v418_v28 = vld [vmem:[%s10439_s0 + $0xc80] sm:$0xff]  ;;  %v419_v14 = vld [vmem:[%s10439_s0 + $0xc88] sm:$0xff] }
 0x3ae   :  { %v3800_v57 = vadd.f32 %v3328_v63, %v2104_v52  ;;  %v3801_v11 = vadd.f32 %v3328_v63, %v2105_v37  ;;  %v3323_v2 = vpop.permute.xlu0 %3322  ;;  %5755 = vmatpush1.bf16.msra.mxu0 %v4560_v13  ;;  %5427 = vmatprep.mubr.bf16.mxu1 %v6424_v10  ;;  %v2110_v60 = vmul.f32 %v10941_v53, %v414_v49  ;;  %v6429_v51 = vld [vmem:[%s10438_s3 + $0x98] ss:$56 sps:$4 sm:$0xff]   ;;  %v6433_v63 = vld [vmem:[%s10438_s3 + $0x10c] ss:$56 sps:$4 sm:$0xff]  }
 0x3af   :  { %v4562_v21 = vpack.c.bf16 %v4220_v35, %v4218_v9  ;;  %v3798_v23 = vadd.f32 %v3323_v2, %v2102_v62  ;;  %v3799_v41 = vadd.f32 %v3323_v2, %v2103_v44  ;;  %v4563_v12 = vpack.c.bf16 %v4221_v43, %v4219_v61  ;;  %v10942_v44 = vld [vmem:[#allocation161_spill] sm:$0xff] }
 0x3b0   :  { %v4224_v42 = vmax.f32 %v3800_v57, 0.0  ;;  %v4225_v26 = vmax.f32 %v3801_v11, 0.0  ;;  %v2111_v4 = vmul.f32 %v10941_v53, %v415_v6  ;;  %v2116_v36 = vmul.f32 %v10942_v44, %v420_v38  ;;  %v424_v57 = vld [vmem:[%s10439_s0 + $0xcb0] sm:$0xff]  ;;  %v425_v11 = vld [vmem:[%s10439_s0 + $0xcb8] sm:$0xff] }
 0x3b1   :  { %v4222_v39 = vmax.f32 %v3798_v23, 0.0  ;;  %v4223_v48 = vmax.f32 %v3799_v41, 0.0  ;;  %5757 = vmatmul.mubr.bf16.vlgmr.msra.gmra.mrb[0].mxu0 %v6421_v54  ;;  %5837 = vmatprep.subr.bf16.mxu0 %v4563_v12  ;;  %v3338_v5 = vpop.permute.xlu1 %3337  ;;  %v2117_v16 = vmul.f32 %v10942_v44, %v421_v27  ;;  %v10943_v54 = vld [vmem:[#allocation162_spill] sm:$0xff]  ;;  %v6432_v41 = vld [vmem:[%s10438_s3 + $0xf0] ss:$56 sps:$4 sm:$0xff]  }
 0x3b2   :  { %6107 = vmatprep.subr.bf16.mxu1 %v4563_v12  ;;  %v3804_v40 = vadd.f32 %v3338_v5, %v2108_v22  ;;  %v3805_v33 = vadd.f32 %v3338_v5, %v2109_v55  ;;  %v3333_v29 = vpop.permute.xlu0 %3332  ;;  %5838 = vmatpush1.bf16.msra.mxu0 %v4562_v21  ;;  %v2114_v25 = vmul.f32 %v10943_v54, %v418_v28  ;;  %v422_v12 = vld [vmem:[%s10439_s0 + $0xca0] sm:$0xff]  ;;  %v431_v44 = vld [vmem:[%s10439_s0 + $0xce8] sm:$0xff] }
 0x3b3   :  { %v4564_v3 = vpack.c.bf16 %v4224_v42, %v4222_v39  ;;  %v3802_v8 = vadd.f32 %v3333_v29, %v2106_v31  ;;  %v3803_v19 = vadd.f32 %v3333_v29, %v2107_v7  ;;  %6117 = vmatpush1.bf16.msra.mxu1 %v4562_v21  ;;  %v4565_v30 = vpack.c.bf16 %v4225_v26, %v4223_v48  ;;  %v10944_v7 = vld [vmem:[#allocation163_spill] sm:$0xff]  ;;  %v6436_v5 = vld [vmem:[%s10438_s3 + $0x164] ss:$56 sps:$4 sm:$0xff]  }
 0x3b4   :  { %v4228_v17 = vmax.f32 %v3804_v40, 0.0  ;;  %v4229_v59 = vmax.f32 %v3805_v33, 0.0  ;;  %5766 = vmatprep.mubr.bf16.mxu0 %v6427_v56  ;;  %v2115_v0 = vmul.f32 %v10943_v54, %v419_v14  ;;  %v2120_v47 = vmul.f32 %v10944_v7, %v424_v57  ;;  %v428_v40 = vld [vmem:[%s10439_s0 + $0xcd0] sm:$0xff]  ;;  %v429_v33 = vld [vmem:[%s10439_s0 + $0xcd8] sm:$0xff] }
 0x3b5   :  { %v4226_v45 = vmax.f32 %v3802_v8, 0.0  ;;  %v4227_v10 = vmax.f32 %v3803_v19, 0.0  ;;  %5428 = vmatmul.mubr.bf16.gmra.mrb[4].mxu1 %v6426_v32  ;;  %5839 = vmatprep.subr.bf16.mxu0 %v4565_v30  ;;  %v3348_v13 = vpop.permute.xlu1 %3347  ;;  %v2121_v18 = vmul.f32 %v10944_v7, %v425_v11  ;;  %v10945_v32 = vld [vmem:[#allocation164_spill] sm:$0xff]  ;;  %v6435_v19 = vld [vmem:[%s10438_s3 + $0x108] ss:$56 sps:$4 sm:$0xff]  }
 0x3b6   :  { %6108 = vmatprep.subr.bf16.mxu1 %v4565_v30  ;;  %v3808_v15 = vadd.f32 %v3348_v13, %v2112_v1  ;;  %v3809_v52 = vadd.f32 %v3348_v13, %v2113_v20  ;;  %v3343_v37 = vpop.permute.xlu0 %3342  ;;  %5840 = vmatpush1.bf16.msra.mxu0 %v4564_v3  ;;  %v2118_v49 = vmul.f32 %v10945_v32, %v422_v12  ;;  %v426_v30 = vld [vmem:[%s10439_s0 + $0xcc0] sm:$0xff]  ;;  %v6439_v13 = vld [vmem:[%s10438_s3 + $0x17c] ss:$56 sps:$4 sm:$0xff]   ;;  %v435_v7 = vld [vmem:[%s10439_s0 + $0xd08] sm:$0xff] }
 0x3b7   :  { %v4566_v35 = vpack.c.bf16 %v4228_v17, %v4226_v45  ;;  %v3806_v43 = vadd.f32 %v3343_v37, %v2110_v60  ;;  %v3807_v34 = vadd.f32 %v3343_v37, %v2111_v4  ;;  %6118 = vmatpush1.bf16.msra.mxu1 %v4564_v3  ;;  %v4567_v62 = vpack.c.bf16 %v4229_v59, %v4227_v10  ;;  %v10946_v4 = vld [vmem:[#allocation165_spill] sm:$0xff] }
 0x3b8   :  { %v4232_v9 = vmax.f32 %v3808_v15, 0.0  ;;  %v4233_v61 = vmax.f32 %v3809_v52, 0.0  ;;  %5437 = vmatprep.mubr.bf16.mxu1 %v6430_v46  ;;  %v2119_v6 = vmul.f32 %v10945_v32, %v423_v24  ;;  %v2124_v38 = vmul.f32 %v10946_v4, %v428_v40  ;;  %v432_v15 = vld [vmem:[%s10439_s0 + $0xcf0] sm:$0xff]  ;;  %v433_v52 = vld [vmem:[%s10439_s0 + $0xcf8] sm:$0xff] }
 0x3b9   :  { %v4230_v2 = vmax.f32 %v3806_v43, 0.0  ;;  %v4231_v21 = vmax.f32 %v3807_v34, 0.0  ;;  %5767 = vmatmul.mubr.bf16.gmra.mrb[4].mxu0 %v6429_v51  ;;  %5841 = vmatprep.subr.bf16.mxu0 %v4567_v62  ;;  %v3358_v23 = vpop.permute.xlu1 %3357  ;;  %v2125_v27 = vmul.f32 %v10946_v4, %v429_v33  ;;  %v10947_v51 = vld [vmem:[#allocation166_spill] sm:$0xff] }
 0x3ba   :  { %6109 = vmatprep.subr.bf16.mxu1 %v4567_v62  ;;  %v3812_v22 = vadd.f32 %v3358_v23, %v2116_v36  ;;  %v3813_v55 = vadd.f32 %v3358_v23, %v2117_v16  ;;  %v3353_v42 = vpop.permute.xlu0 %3352  ;;  %5842 = vmatpush1.bf16.msra.mxu0 %v4566_v35  ;;  %v2122_v28 = vmul.f32 %v10947_v51, %v426_v30  ;;  %v6438_v34 = vld [vmem:[%s10438_s3 + $0x160] ss:$56 sps:$4 sm:$0xff]   ;;  %v6442_v23 = vld [vmem:[%s10438_s3 + $0x1d4] ss:$56 sps:$4 sm:$0xff]  }
 0x3bb   :  { %v4568_v26 = vpack.c.bf16 %v4232_v9, %v4230_v2  ;;  %v3810_v56 = vadd.f32 %v3353_v42, %v2114_v25  ;;  %v3811_v58 = vadd.f32 %v3353_v42, %v2115_v0  ;;  %6119 = vmatpush1.bf16.msra.mxu1 %v4566_v35  ;;  %v4569_v31 = vpack.c.bf16 %v4233_v61, %v4231_v21  ;;  %v430_v62 = vld [vmem:[%s10439_s0 + $0xce0] sm:$0xff]  ;;  %v10948_v0 = vld [vmem:[#allocation167_spill] sm:$0xff] }
 0x3bc   :  { %v4236_v39 = vmax.f32 %v3812_v22, 0.0  ;;  %v4237_v48 = vmax.f32 %v3813_v55, 0.0  ;;  %5776 = vmatprep.mubr.bf16.mxu0 %v6433_v63  ;;  %v2123_v14 = vmul.f32 %v10947_v51, %v427_v50  ;;  %v2128_v57 = vmul.f32 %v10948_v0, %v432_v15  ;;  %v436_v22 = vld [vmem:[%s10439_s0 + $0xd10] sm:$0xff]  ;;  %v437_v55 = vld [vmem:[%s10439_s0 + $0xd18] sm:$0xff] }
 0x3bd   :  { %v4234_v29 = vmax.f32 %v3810_v56, 0.0  ;;  %v4235_v3 = vmax.f32 %v3811_v58, 0.0  ;;  %5438 = vmatmul.mubr.bf16.gmra.mrb[8].mxu1 %v6432_v41  ;;  %5843 = vmatprep.subr.bf16.mxu0 %v4569_v31  ;;  %v3368_v8 = vpop.permute.xlu1 %3367  ;;  %v2129_v11 = vmul.f32 %v10948_v0, %v433_v52  ;;  %v10949_v41 = vld [vmem:[#allocation168_spill] sm:$0xff]  ;;  %v10952_v52 = vld [vmem:[#allocation171_spill] sm:$0xff] }
 0x3be   :  { %6110 = vmatprep.subr.bf16.mxu1 %v4569_v31  ;;  %v3816_v1 = vadd.f32 %v3368_v8, %v2120_v47  ;;  %v3817_v20 = vadd.f32 %v3368_v8, %v2121_v18  ;;  %v3363_v17 = vpop.permute.xlu0 %3362  ;;  %5844 = vmatpush1.bf16.msra.mxu0 %v4568_v26  ;;  %v2126_v12 = vmul.f32 %v10949_v41, %v430_v62  ;;  %v6441_v58 = vld [vmem:[%s10438_s3 + $0x178] ss:$56 sps:$4 sm:$0xff]   ;;  %v434_v31 = vld [vmem:[%s10439_s0 + $0xd00] sm:$0xff] }
 0x3bf   :  { %v4570_v59 = vpack.c.bf16 %v4236_v39, %v4234_v29  ;;  %v3814_v46 = vadd.f32 %v3363_v17, %v2118_v49  ;;  %v3815_v53 = vadd.f32 %v3363_v17, %v2119_v6  ;;  %6120 = vmatpush1.bf16.msra.mxu1 %v4568_v26  ;;  %v4571_v60 = vpack.c.bf16 %v4237_v48, %v4235_v3  ;;  %v10950_v6 = vld [vmem:[#allocation169_spill] sm:$0xff]  ;;  %v6445_v8 = vld [vmem:[%s10438_s3 + $0x1ec] ss:$56 sps:$4 sm:$0xff]  }
 0x3c0   :  { %v4240_v45 = vmax.f32 %v3816_v1, 0.0  ;;  %v4241_v10 = vmax.f32 %v3817_v20, 0.0  ;;  %5447 = vmatprep.mubr.bf16.mxu1 %v6436_v5  ;;  %v2127_v24 = vmul.f32 %v10949_v41, %v431_v44  ;;  %v2132_v40 = vmul.f32 %v10950_v6, %v436_v22  ;;  %v6450_v22 = vld [vmem:[%s10438_s3 + $0x240] ss:$56 sps:$4 sm:$0xff]  }
 0x3c1   :  { %v4238_v37 = vmax.f32 %v3814_v46, 0.0  ;;  %v4239_v35 = vmax.f32 %v3815_v53, 0.0  ;;  %5777 = vmatmul.mubr.bf16.gmra.mrb[8].mxu0 %v6435_v19  ;;  %5845 = vmatprep.subr.bf16.mxu0 %v4571_v60  ;;  %v3378_v43 = vpop.permute.xlu1 %3377  ;;  %v2133_v33 = vmul.f32 %v10950_v6, %v437_v55  ;;  %v10951_v19 = vld [vmem:[#allocation170_spill] sm:$0xff]  ;;  %v440_v46 = vld [vmem:[%s10439_s0 + $0xd30] sm:$0xff]  ;;  %v441_v53 = vld [vmem:[%s10439_s0 + $0xd38] sm:$0xff] }
 0x3c2   :  { %6111 = vmatprep.subr.bf16.mxu1 %v4571_v60  ;;  %v3820_v36 = vadd.f32 %v3378_v43, %v2124_v38  ;;  %v3821_v16 = vadd.f32 %v3378_v43, %v2125_v27  ;;  %v3373_v9 = vpop.permute.xlu0 %3372  ;;  %5846 = vmatpush1.bf16.msra.mxu0 %v4570_v59  ;;  %v2130_v30 = vmul.f32 %v10951_v19, %v434_v31  ;;  %v438_v27 = vld [vmem:[%s10439_s0 + $0xd20] sm:$0xff]  ;;  %v6456_v31 = vld [vmem:[%s10438_s3 + $0x2b0] ss:$56 sps:$4 sm:$0xff]  }
 0x3c3   :  { %v4572_v61 = vpack.c.bf16 %v4240_v45, %v4238_v37  ;;  %v3818_v63 = vadd.f32 %v3373_v9, %v2122_v28  ;;  %v3819_v54 = vadd.f32 %v3373_v9, %v2123_v14  ;;  %6121 = vmatpush1.bf16.msra.mxu1 %v4570_v59  ;;  %v4573_v25 = vpack.c.bf16 %v4241_v10, %v4239_v35  ;;  %v6444_v59 = vld [vmem:[%s10438_s3 + $0x1d0] ss:$56 sps:$4 sm:$0xff]   ;;  %v6448_v43 = vld [vmem:[%s10438_s3 + $0x244] ss:$56 sps:$4 sm:$0xff]  }
 0x3c4   :  { %v4244_v2 = vmax.f32 %v3820_v36, 0.0  ;;  %v4245_v21 = vmax.f32 %v3821_v16, 0.0  ;;  %5786 = vmatprep.mubr.bf16.mxu0 %v6439_v13  ;;  %v2131_v50 = vmul.f32 %v10951_v19, %v435_v7  ;;  %v439_v45 = vld [vmem:[%s10439_s0 + $0xd28] sm:$0xff]  ;;  %v2136_v37 = vmul.f32 %v10952_v52, %v440_v46  ;;  %v10953_v36 = vld [vmem:[#allocation172_spill] sm:$0xff]  ;;  %v6460_v7 = vld [vmem:[%s10438_s3 + $0x324] ss:$56 sps:$4 sm:$0xff]  }
 0x3c5   :  { %v4242_v42 = vmax.f32 %v3818_v63, 0.0  ;;  %v4243_v26 = vmax.f32 %v3819_v54, 0.0  ;;  %5448 = vmatmul.mubr.bf16.gmra.mrb[12].mxu1 %v6438_v34  ;;  %5847 = vmatprep.subr.bf16.mxu0 %v4573_v25  ;;  %v3388_v56 = vpop.permute.xlu1 %3387  ;;  %v2137_v35 = vmul.f32 %v10952_v52, %v441_v53  ;;  %v2134_v16 = vmul.f32 %v10953_v36, %v438_v27  ;;  %v6472_v6 = vld [vmem:[%s10438_s3 + $0x264] ss:$56 sps:$4 sm:$0xff]   ;;  %v6481_v19 = vld [vmem:[%s10438_s3 + $0x114] ss:$56 sps:$4 sm:$0xff]  }
 0x3c6   :  { %6112 = vmatprep.subr.bf16.mxu1 %v4573_v25  ;;  %v3824_v47 = vadd.f32 %v3388_v56, %v2128_v57  ;;  %v3825_v18 = vadd.f32 %v3388_v56, %v2129_v11  ;;  %v3383_v39 = vpop.permute.xlu0 %3382  ;;  %5848 = vmatpush1.bf16.msra.mxu0 %v4572_v61  ;;  %v2135_v9 = vmul.f32 %v10953_v36, %v439_v45  ;;  %v6453_v56 = vld [vmem:[%s10438_s3 + $0x258] ss:$56 sps:$4 sm:$0xff]  }
 0x3c7   :  { %v4574_v48 = vpack.c.bf16 %v4244_v2, %v4242_v42  ;;  %v3822_v5 = vadd.f32 %v3383_v39, %v2126_v12  ;;  %v3823_v32 = vadd.f32 %v3383_v39, %v2127_v24  ;;  %6122 = vmatpush1.bf16.msra.mxu1 %v4572_v61  ;;  %v4575_v49 = vpack.c.bf16 %v4245_v21, %v4243_v26  ;;  %v6447_v61 = vld [vmem:[%s10438_s3 + $0x1e8] ss:$56 sps:$4 sm:$0xff]   ;;  %v6451_v21 = vld [vmem:[%s10438_s3 + $0x25c] ss:$56 sps:$4 sm:$0xff]  }
 0x3c8   :  { %v4248_v29 = vmax.f32 %v3824_v47, 0.0  ;;  %v4249_v3 = vmax.f32 %v3825_v18, 0.0  ;;  %5457 = vmatprep.mubr.bf16.mxu1 %v6442_v23  ;;  %v6454_v26 = vld [vmem:[%s10438_s3 + $0x2b4] ss:$56 sps:$4 sm:$0xff]   ;;  %v6459_v47 = vld [vmem:[%s10438_s3 + $0x2c8] ss:$56 sps:$4 sm:$0xff]  }
 0x3c9   :  { %v4246_v1 = vmax.f32 %v3822_v5, 0.0  ;;  %v4247_v20 = vmax.f32 %v3823_v32, 0.0  ;;  %5787 = vmatmul.mubr.bf16.gmra.mrb[12].mxu0 %v6441_v58  ;;  %5849 = vmatprep.subr.bf16.mxu0 %v4575_v49  ;;  %v3398_v17 = vpop.permute.xlu1 %3397  ;;  %v6457_v58 = vld [vmem:[%s10438_s3 + $0x2cc] ss:$56 sps:$4 sm:$0xff]   ;;  %v6463_v18 = vld [vmem:[%s10438_s3 + $0x33c] ss:$56 sps:$4 sm:$0xff]  }
 0x3ca   :  { %6113 = vmatprep.subr.bf16.mxu1 %v4575_v49  ;;  %v3828_v60 = vadd.f32 %v3398_v17, %v2132_v40  ;;  %v3829_v4 = vadd.f32 %v3398_v17, %v2133_v33  ;;  %v3393_v38 = vpop.permute.xlu0 %3392  ;;  %5850 = vmatpush1.bf16.msra.mxu0 %v4574_v48  ;;  %v6462_v39 = vld [vmem:[%s10438_s3 + $0x320] ss:$56 sps:$4 sm:$0xff]   ;;  %v6471_v32 = vld [vmem:[%s10438_s3 + $0x34] ss:$56 sps:$4 sm:$0xff]   ;;  %v6466_v49 = vld [vmem:[%s10438_s3 + $0x1f0] ss:$56 sps:$4 sm:$0xff]  }
 0x3cb   :  { %v4576_v10 = vpack.c.bf16 %v4248_v29, %v4246_v1  ;;  %v3826_v13 = vadd.f32 %v3393_v38, %v2130_v30  ;;  %v3827_v51 = vadd.f32 %v3393_v38, %v2131_v50  ;;  %6123 = vmatpush1.bf16.msra.mxu1 %v4574_v48  ;;  %v4577_v28 = vpack.c.bf16 %v4249_v3, %v4247_v20  ;;  %v6468_v48 = vld [vmem:[%s10438_s3 + $0x1f4] ss:$56 sps:$4 sm:$0xff]   ;;  %v6465_v5 = vld [vmem:[%s10438_s3 + $0x338] ss:$56 sps:$4 sm:$0xff]   ;;  %v6475_v33 = vld [vmem:[%s10438_s3 + $0xa4] ss:$56 sps:$4 sm:$0xff]  }
 0x3cc   :  { %v4252_v14 = vmax.f32 %v3828_v60, 0.0  ;;  %v4253_v15 = vmax.f32 %v3829_v4, 0.0  ;;  %5796 = vmatprep.mubr.bf16.mxu0 %v6445_v8  ;;  %v6469_v40 = vld [vmem:[%s10438_s3 + $0x30] ss:$56 sps:$4 sm:$0xff]   ;;  %v6474_v29 = vld [vmem:[%s10438_s3 + $0x260] ss:$56 sps:$4 sm:$0xff]  }
 0x3cd   :  { %v4250_v34 = vmax.f32 %v3826_v13, 0.0  ;;  %v4251_v62 = vmax.f32 %v3827_v51, 0.0  ;;  %5458 = vmatmul.mubr.bf16.gmra.mrb[16].mxu1 %v6444_v59  ;;  %5851 = vmatprep.subr.bf16.mxu0 %v4577_v28  ;;  %v3408_v44 = vpop.permute.xlu1 %3407  ;;  %v6478_v3 = vld [vmem:[%s10438_s3 + $0x2d4] ss:$56 sps:$4 sm:$0xff]   ;;  %v6477_v8 = vld [vmem:[%s10438_s3 + $0xa0] ss:$56 sps:$4 sm:$0xff]  }
 0x3ce   :  { %6114 = vmatprep.subr.bf16.mxu1 %v4577_v28  ;;  %v3832_v63 = vadd.f32 %v3408_v44, %v2136_v37  ;;  %v3833_v54 = vadd.f32 %v3408_v44, %v2137_v35  ;;  %v3403_v25 = vpop.permute.xlu0 %3402  ;;  %5852 = vmatpush1.bf16.msra.mxu0 %v4576_v10  ;;  %v6480_v30 = vld [vmem:[%s10438_s3 + $0x2d0] ss:$56 sps:$4 sm:$0xff]   ;;  %v6484_v50 = vld [vmem:[%s10438_s3 + $0x344] ss:$56 sps:$4 sm:$0xff]   ;;  %v6486_v17 = vld [vmem:[%s10438_s3 + $0x340] ss:$56 sps:$4 sm:$0xff]  }
 0x3cf   :  { %v4578_v0 = vpack.c.bf16 %v4252_v14, %v4250_v34  ;;  %v3830_v57 = vadd.f32 %v3403_v25, %v2134_v16  ;;  %v3831_v11 = vadd.f32 %v3403_v25, %v2135_v9  ;;  %6124 = vmatpush1.bf16.msra.mxu1 %v4576_v10  ;;  %v4579_v2 = vpack.c.bf16 %v4253_v15, %v4251_v62  ;;  %v6483_v1 = vld [vmem:[%s10438_s3 + $0x110] ss:$56 sps:$4 sm:$0xff]   ;;  %v6487_v20 = vld [vmem:[%s10438_s3 + $0x184] ss:$56 sps:$4 sm:$0xff]   ;;  %v6489_v59 = vld [vmem:[%s10438_s3 + $0x180] ss:$56 sps:$4 sm:$0xff]  }
 0x3d0   :  { %v4256_v23 = vmax.f32 %v3832_v63, 0.0  ;;  %v4257_v41 = vmax.f32 %v3833_v54, 0.0  ;;  %5467 = vmatprep.mubr.bf16.mxu1 %v6448_v43 }
 0x3d1   :  { %v4254_v12 = vmax.f32 %v3830_v57, 0.0  ;;  %v4255_v24 = vmax.f32 %v3831_v11, 0.0  ;;  %5797 = vmatmul.mubr.bf16.gmra.mrb[16].mxu0 %v6447_v61  ;;  %5853 = vmatprep.subr.bf16.mxu0 %v4579_v2 }
 0x3d2   :  { %6115 = vmatprep.subr.bf16.mxu1 %v4579_v2  ;;  %5854 = vmatpush1.bf16.msra.mxu0 %v4578_v0 }
 0x3d3   :  { %v4580_v55 = vpack.c.bf16 %v4256_v23, %v4254_v12  ;;  %v4581_v42 = vpack.c.bf16 %v4257_v41, %v4255_v24  ;;  %6125 = vmatpush1.bf16.msra.mxu1 %v4578_v0  ;;  %5806 = vmatprep.mubr.bf16.mxu0 %v6451_v21 }
 0x3d5   :  { %5468 = vmatmul.mubr.bf16.gmra.mrb[20].mxu1 %v6450_v22  ;;  %5855 = vmatprep.subr.bf16.mxu0 %v4581_v42 }
 0x3d6   :  { %6116 = vmatprep.subr.bf16.mxu1 %v4581_v42  ;;  %5856 = vmatpush1.bf16.msra.mxu0 %v4580_v55 }
 0x3d7   :  { %6126 = vmatpush1.bf16.msra.mxu1 %v4580_v55  ;;  %5477 = vmatprep.mubr.bf16.mxu1 %v6454_v26 }
 0x3d9   :  { %5807 = vmatmul.mubr.bf16.gmra.mrb[20].mxu0 %v6453_v56 }
 0x3da   :  { %5816 = vmatprep.mubr.bf16.mxu0 %v6457_v58 }
 0x3dd   :  { %5478 = vmatmul.mubr.bf16.gmra.mrb[24].mxu1 %v6456_v31 }
 0x3de   :  { %5487 = vmatprep.mubr.bf16.mxu1 %v6460_v7 }
 0x3e1   :  { %5817 = vmatmul.mubr.bf16.gmra.mrb[24].mxu0 %v6459_v47 }
 0x3e2   :  { %5826 = vmatprep.mubr.bf16.mxu0 %v6463_v18 }
 0x3e5   :  { %5488 = vmatmul.mubr.bf16.gmra.mrb[28].mxu1 %v6462_v39 }
 0x3e6   :  { %6103 = vmatprep.mubr.msk.bf16.mxu1 %vm5134_vm0, %v6468_v48 }
 0x3e9   :  { %5827 = vmatmul.mubr.bf16.gmra.mrb[28].mxu0 %v6465_v5 }
 0x3ea   :  { %6099 = vmatprep.mubr.msk.bf16.mxu0 %vm5134_vm0, %v6471_v32 }
 0x3ed   :  { %5910 = vmatmul.mubr.bf16.vlgmr.msra.gmra.mrb[32].mxu1 %v6466_v49 }
 0x3ee   :  { %6104 = vmatprep.mubr.msk.bf16.mxu1 %vm5134_vm0, %v6472_v6 }
 0x3f1   :  { %5870 = vmatmul.mubr.bf16.vlgmr.msra.gmra.mrb[0].mxu0 %v6469_v40 }
 0x3f2   :  { %6100 = vmatprep.mubr.msk.bf16.mxu0 %vm5134_vm0, %v6475_v33 }
 0x3f5   :  { %5920 = vmatmul.mubr.bf16.gmra.mrb[36].mxu1 %v6474_v29 }
 0x3f6   :  { %6105 = vmatprep.mubr.msk.bf16.mxu1 %vm5134_vm0, %v6478_v3 }
 0x3f9   :  { %5880 = vmatmul.mubr.bf16.gmra.mrb[4].mxu0 %v6477_v8 }
 0x3fa   :  { %6101 = vmatprep.mubr.msk.bf16.mxu0 %vm5134_vm0, %v6481_v19 }
 0x3fd   :  { %5930 = vmatmul.mubr.bf16.gmra.mrb[40].mxu1 %v6480_v30 }
 0x3fe   :  { %6106 = vmatprep.mubr.msk.bf16.mxu1 %vm5134_vm0, %v6484_v50 }
 0x401   :  { %5890 = vmatmul.mubr.bf16.gmra.mrb[8].mxu0 %v6483_v1 }
 0x402   :  { %6102 = vmatprep.mubr.msk.bf16.mxu0 %vm5134_vm0, %v6487_v20 }
 0x405   :  { %5940 = vmatmul.mubr.bf16.gmra.mrb[44].mxu1 %v6486_v17 }
 0x409   :  { %5900 = vmatmul.mubr.bf16.gmra.mrb[12].mxu0 %v6489_v59 }
 0x480   :  { %v10252_v46 = vpop.f32.mrb[0].mxu1 }
 0x481   :  { %v10254_v53 = vpop.f32.mrb[1].mxu1 }
 0x482   :  { %v10256_v60 = vpop.f32.mrb[2].mxu1 }
 0x483   :  { %v10258_v4 = vpop.f32.mrb[3].mxu1 }
 0x488   :  { %v10260_v38 = vpop.f32.mrb[4].mxu1 }
 0x489   :  { %v10262_v27 = vpop.f32.mrb[5].mxu1 }
 0x48a   :  { %v10264_v45 = vpop.f32.mrb[6].mxu1 }
 0x48b   :  { %v10266_v10 = vpop.f32.mrb[7].mxu1 }
 0x490   :  { %v10268_v13 = vpop.f32.mrb[8].mxu1 }
 0x491   :  { %v10270_v51 = vpop.f32.mrb[9].mxu1 }
 0x492   :  { %v10272_v28 = vpop.f32.mrb[10].mxu1 }
 0x493   :  { %v10274_v14 = vpop.f32.mrb[11].mxu1 }
 0x498   :  { %v10276_v15 = vpop.f32.mrb[12].mxu1 }
 0x499   :  { %v10278_v52 = vpop.f32.mrb[13].mxu1 }
 0x49a   :  { %v10280_v37 = vpop.f32.mrb[14].mxu1 }
 0x49b   :  { %v10282_v35 = vpop.f32.mrb[15].mxu1 }
 0x4a0   :  { %v5459_v43 = vpop.f32.mrb[16].mxu1 }
 0x4a1   :  { %v5461_v34 = vpop.f32.mrb[17].mxu1 }
 0x4a2   :  { %v5463_v62 = vpop.f32.mrb[18].mxu1 }
 0x4a3   :  { %v5465_v44 = vpop.f32.mrb[19].mxu1 }
 0x4a4   :  { %v5798_v36 = vpop.f32.mrb[16].mxu0 }
 0x4a5   :  { %v6143_v16 = vadd.f32 %v5798_v36, %v5459_v43  ;;  %v5800_v9 = vpop.f32.mrb[17].mxu0 }
 0x4a6   :  { %v6145_v61 = vadd.f32 %v5800_v9, %v5461_v34  ;;  %v5802_v63 = vpop.f32.mrb[18].mxu0 }
 0x4a7   :  { %v6147_v54 = vadd.f32 %v5802_v63, %v5463_v62  ;;  %v5804_v25 = vpop.f32.mrb[19].mxu0 }
 0x4a8   :  { %v6149_v0 = vadd.f32 %v5804_v25, %v5465_v44  ;;  %v5469_v57 = vpop.f32.mrb[20].mxu1 }
 0x4a9   :  { %v5471_v11 = vpop.f32.mrb[21].mxu1 }
 0x4aa   :  { %v5473_v2 = vpop.f32.mrb[22].mxu1 }
 0x4ab   :  { %v5475_v21 = vpop.f32.mrb[23].mxu1 }
 0x4ac   :  { %v5808_v23 = vpop.f32.mrb[20].mxu0 }
 0x4ad   :  { %v6151_v41 = vadd.f32 %v5808_v23, %v5469_v57  ;;  %v5810_v12 = vpop.f32.mrb[21].mxu0 }
 0x4ae   :  { %v6153_v24 = vadd.f32 %v5810_v12, %v5471_v11  ;;  %v5812_v22 = vpop.f32.mrb[22].mxu0 }
 0x4af   :  { %v6155_v55 = vadd.f32 %v5812_v22, %v5473_v2  ;;  %v5814_v42 = vpop.f32.mrb[23].mxu0 }
 0x4b0   :  { %v6157_v26 = vadd.f32 %v5814_v42, %v5475_v21  ;;  %v5479_v56 = vpop.f32.mrb[24].mxu1 }
 0x4b1   :  { %v5481_v58 = vpop.f32.mrb[25].mxu1 }
 0x4b2   :  { %v5483_v31 = vpop.f32.mrb[26].mxu1 }
 0x4b3   :  { %v5485_v7 = vpop.f32.mrb[27].mxu1 }
 0x4b4   :  { %v5818_v47 = vpop.f32.mrb[24].mxu0 }
 0x4b5   :  { %v10284_v18 = vadd.f32 %v5818_v47, %v5479_v56  ;;  %v5820_v39 = vpop.f32.mrb[25].mxu0 }
 0x4b6   :  { %v10286_v48 = vadd.f32 %v5820_v39, %v5481_v58  ;;  %v5822_v5 = vpop.f32.mrb[26].mxu0 }
 0x4b7   :  { %v10288_v32 = vadd.f32 %v5822_v5, %v5483_v31  ;;  %v5824_v49 = vpop.f32.mrb[27].mxu0 }
 0x4b8   :  { %v10290_v6 = vadd.f32 %v5824_v49, %v5485_v7  ;;  %v5489_v40 = vpop.f32.mrb[28].mxu1 }
 0x4b9   :  { %v5491_v33 = vpop.f32.mrb[29].mxu1 }
 0x4ba   :  { %v5493_v29 = vpop.f32.mrb[30].mxu1 }
 0x4bb   :  { %v5495_v3 = vpop.f32.mrb[31].mxu1 }
 0x4bc   :  { %v5828_v8 = vpop.f32.mrb[28].mxu0 }
 0x4bd   :  { %v10292_v19 = vadd.f32 %v5828_v8, %v5489_v40  ;;  %v5830_v30 = vpop.f32.mrb[29].mxu0 }
 0x4be   :  { %v10294_v50 = vadd.f32 %v5830_v30, %v5491_v33  ;;  %v5832_v1 = vpop.f32.mrb[30].mxu0 }
 0x4bf   :  { %v10296_v20 = vadd.f32 %v5832_v1, %v5493_v29  ;;  %v5834_v17 = vpop.f32.mrb[31].mxu0 }
 0x4c0   :  { %v10298_v59 = vadd.f32 %v5834_v17, %v5495_v3  ;;  %v5911_v43 = vpop.f32.mrb[32].mxu1 }
 0x4c1   :  { %v6144_v34 = vadd.f32 %v6143_v16, %v5911_v43  ;;  %v5913_v62 = vpop.f32.mrb[33].mxu1 }
 0x4c2   :  { %v6146_v44 = vadd.f32 %v6145_v61, %v5913_v62  ;;  %v5915_v36 = vpop.f32.mrb[34].mxu1 }
 0x4c3   :  { %5967 = vst [vmem:[%s10440_s4 + $0x80] sm:$0xff] %v6144_v34  ;;  %v6148_v9 = vadd.f32 %v6147_v54, %v5915_v36  ;;  %v5917_v63 = vpop.f32.mrb[35].mxu1 }
 0x4c4   :  { %5968 = vst.msk [vmem:[%s10440_s4 + $0x88] sm:$0xff] %vm5951_vm1, %v6146_v44  ;;  %v6150_v25 = vadd.f32 %v6149_v0, %v5917_v63  ;;  %v5871_v57 = vpop.f32.mrb[0].mxu0 }
 0x4c5   :  { %5969 = vst [vmem:[%s10440_s4 + $0x90] sm:$0xff] %v6148_v9  ;;  %v6127_v16 = vadd.f32 %v5871_v57, %v10252_v46  ;;  %v5873_v61 = vpop.f32.mrb[1].mxu0 }
 0x4c6   :  { %5970 = vst.msk [vmem:[%s10440_s4 + $0x98] sm:$0xff] %vm5951_vm1, %v6150_v25  ;;  %v6128_v54 = vadd.f32 %v5873_v61, %v10254_v53  ;;  %v5875_v11 = vpop.f32.mrb[2].mxu0 }
 0x4c7   :  { %5950 = vst [vmem:[%s10440_s4] sm:$0xff] %v6127_v16  ;;  %v6129_v0 = vadd.f32 %v5875_v11, %v10256_v60  ;;  %v5877_v2 = vpop.f32.mrb[3].mxu0 }
 0x4c8   :  { %5952 = vst.msk [vmem:[%s10440_s4 + $0x8] sm:$0xff] %vm5951_vm1, %v6128_v54  ;;  %v6130_v46 = vadd.f32 %v5877_v2, %v10258_v4  ;;  %v5921_v21 = vpop.f32.mrb[36].mxu1 }
 0x4c9   :  { %5953 = vst [vmem:[%s10440_s4 + $0x10] sm:$0xff] %v6129_v0  ;;  %v6152_v53 = vadd.f32 %v6151_v41, %v5921_v21  ;;  %v5923_v23 = vpop.f32.mrb[37].mxu1 }
 0x4ca   :  { %5954 = vst.msk [vmem:[%s10440_s4 + $0x18] sm:$0xff] %vm5951_vm1, %v6130_v46  ;;  %v6154_v60 = vadd.f32 %v6153_v24, %v5923_v23  ;;  %v5925_v12 = vpop.f32.mrb[38].mxu1 }
 0x4cb   :  { %5971 = vst [vmem:[%s10440_s4 + $0xa0] sm:$0xff] %v6152_v53  ;;  %v6156_v22 = vadd.f32 %v6155_v55, %v5925_v12  ;;  %v5927_v4 = vpop.f32.mrb[39].mxu1 }
 0x4cc   :  { %5972 = vst.msk [vmem:[%s10440_s4 + $0xa8] sm:$0xff] %vm5951_vm1, %v6154_v60  ;;  %v6158_v41 = vadd.f32 %v6157_v26, %v5927_v4  ;;  %v5881_v42 = vpop.f32.mrb[4].mxu0 }
 0x4cd   :  { %5973 = vst [vmem:[%s10440_s4 + $0xb0] sm:$0xff] %v6156_v22  ;;  %v6131_v24 = vadd.f32 %v5881_v42, %v10260_v38  ;;  %v5883_v56 = vpop.f32.mrb[5].mxu0 }
 0x4ce   :  { %5974 = vst.msk [vmem:[%s10440_s4 + $0xb8] sm:$0xff] %vm5951_vm1, %v6158_v41  ;;  %v6132_v55 = vadd.f32 %v5883_v56, %v10262_v27  ;;  %v5885_v58 = vpop.f32.mrb[6].mxu0 }
 0x4cf   :  { %5955 = vst [vmem:[%s10440_s4 + $0x20] sm:$0xff] %v6131_v24  ;;  %v6133_v26 = vadd.f32 %v5885_v58, %v10264_v45  ;;  %v5887_v31 = vpop.f32.mrb[7].mxu0 }
 0x4d0   :  { %5956 = vst.msk [vmem:[%s10440_s4 + $0x28] sm:$0xff] %vm5951_vm1, %v6132_v55  ;;  %v6134_v38 = vadd.f32 %v5887_v31, %v10266_v10  ;;  %v5931_v7 = vpop.f32.mrb[40].mxu1 }
 0x4d1   :  { %5957 = vst [vmem:[%s10440_s4 + $0x30] sm:$0xff] %v6133_v26  ;;  %v6160_v27 = vadd.f32 %v10284_v18, %v5931_v7  ;;  %v5933_v47 = vpop.f32.mrb[41].mxu1 }
 0x4d2   :  { %5958 = vst.msk [vmem:[%s10440_s4 + $0x38] sm:$0xff] %vm5951_vm1, %v6134_v38  ;;  %v6162_v45 = vadd.f32 %v10286_v48, %v5933_v47  ;;  %v5935_v39 = vpop.f32.mrb[42].mxu1 }
 0x4d3   :  { %5975 = vst [vmem:[%s10440_s4 + $0xc0] sm:$0xff] %v6160_v27  ;;  %v6164_v10 = vadd.f32 %v10288_v32, %v5935_v39  ;;  %v5937_v5 = vpop.f32.mrb[43].mxu1 }
 0x4d4   :  { %5976 = vst.msk [vmem:[%s10440_s4 + $0xc8] sm:$0xff] %vm5951_vm1, %v6162_v45  ;;  %v6166_v18 = vadd.f32 %v10290_v6, %v5937_v5  ;;  %v5891_v49 = vpop.f32.mrb[8].mxu0 }
 0x4d5   :  { %5977 = vst [vmem:[%s10440_s4 + $0xd0] sm:$0xff] %v6164_v10  ;;  %v6135_v48 = vadd.f32 %v5891_v49, %v10268_v13  ;;  %v5893_v40 = vpop.f32.mrb[9].mxu0 }
 0x4d6   :  { %5978 = vst.msk [vmem:[%s10440_s4 + $0xd8] sm:$0xff] %vm5951_vm1, %v6166_v18  ;;  %v6136_v32 = vadd.f32 %v5893_v40, %v10270_v51  ;;  %v5895_v33 = vpop.f32.mrb[10].mxu0 }
 0x4d7   :  { %5959 = vst [vmem:[%s10440_s4 + $0x40] sm:$0xff] %v6135_v48  ;;  %v6137_v6 = vadd.f32 %v5895_v33, %v10272_v28  ;;  %v5897_v29 = vpop.f32.mrb[11].mxu0 }
 0x4d8   :  { %5960 = vst.msk [vmem:[%s10440_s4 + $0x48] sm:$0xff] %vm5951_vm1, %v6136_v32  ;;  %v6138_v13 = vadd.f32 %v5897_v29, %v10274_v14  ;;  %v5941_v3 = vpop.f32.mrb[44].mxu1 }
 0x4d9   :  { %5961 = vst [vmem:[%s10440_s4 + $0x50] sm:$0xff] %v6137_v6  ;;  %v6168_v51 = vadd.f32 %v10292_v19, %v5941_v3  ;;  %v5943_v8 = vpop.f32.mrb[45].mxu1 }
 0x4da   :  { %5962 = vst.msk [vmem:[%s10440_s4 + $0x58] sm:$0xff] %vm5951_vm1, %v6138_v13  ;;  %v6170_v28 = vadd.f32 %v10294_v50, %v5943_v8  ;;  %v5945_v30 = vpop.f32.mrb[46].mxu1 }
 0x4db   :  { %5979 = vst [vmem:[%s10440_s4 + $0xe0] sm:$0xff] %v6168_v51  ;;  %v6172_v14 = vadd.f32 %v10296_v20, %v5945_v30  ;;  %v5947_v1 = vpop.f32.mrb[47].mxu1 }
 0x4dc   :  { %5980 = vst.msk [vmem:[%s10440_s4 + $0xe8] sm:$0xff] %vm5951_vm1, %v6170_v28  ;;  %v6174_v19 = vadd.f32 %v10298_v59, %v5947_v1  ;;  %v5901_v17 = vpop.f32.mrb[12].mxu0 }
 0x4dd   :  { %5981 = vst [vmem:[%s10440_s4 + $0xf0] sm:$0xff] %v6172_v14  ;;  %v6139_v50 = vadd.f32 %v5901_v17, %v10276_v15  ;;  %v5903_v43 = vpop.f32.mrb[13].mxu0 }
 0x4de   :  { %5982 = vst.msk [vmem:[%s10440_s4 + $0xf8] sm:$0xff] %vm5951_vm1, %v6174_v19  ;;  %v6140_v20 = vadd.f32 %v5903_v43, %v10278_v52  ;;  %v5905_v34 = vpop.f32.mrb[14].mxu0 }
 0x4df   :  { %5963 = vst [vmem:[%s10440_s4 + $0x60] sm:$0xff] %v6139_v50  ;;  %v6141_v59 = vadd.f32 %v5905_v34, %v10280_v37  ;;  %v5907_v62 = vpop.f32.mrb[15].mxu0 }
 0x4e0   :  { %5964 = vst.msk [vmem:[%s10440_s4 + $0x68] sm:$0xff] %vm5951_vm1, %v6140_v20  ;;  %v6142_v15 = vadd.f32 %v5907_v62, %v10282_v35 }
 0x4e1   :  { %5965 = vst [vmem:[%s10440_s4 + $0x70] sm:$0xff] %v6141_v59 }
 0x4e2   :  { %5966 = vst.msk [vmem:[%s10440_s4 + $0x78] sm:$0xff] %vm5951_vm1, %v6142_v15 }

</bundles_post_ra>
